<compile_context>
chip_gen: v6e
topology: v6e:2x2x1
jax: 0.10.0
libtpu: 0.0.40
codegen_flags: <defaults>
</compile_context>

<pallas_src>
import functools

import jax
import jax.numpy as jnp
from jax import lax
from jax.experimental import pallas as pl
from jax.experimental.pallas import tpu as pltpu

LAYER_DIMS = [512, 256, 128, 64, 32, 16, 1]  # output dims of layer1..layer7


def _round_up(x, m):
    return ((x + m - 1) // m) * m


def _mlp_kernel(inference, num_layers, x_ref, *refs):
    """Fused forward pass for one batch tile.

    refs = (w1, b1, ..., w6, b6, w7_row, b7, o_ref)
      w1..w6 : bf16 (in, out)      b1..b6 : f32 (1, out)
      w7_row : bf16 (1, 16)        b7     : f32 (1, 1)
      o_ref  : f32 (1, batch_tile) -- lane-dense logits / probabilities row
    """
    o_ref = refs[-1]
    p = refs[:-1]

    # x arrives f32; cast to bf16 in-kernel (free under MXU slack).
    h = x_ref[...].astype(jnp.bfloat16)              # (batch_tile, in_features)

    for li in range(num_layers - 1):
        w = p[2 * li][...]                            # bf16 (in, out)
        b = p[2 * li + 1][...]                        # f32  (1, out)
        acc = jnp.dot(h, w, preferred_element_type=jnp.float32) + b
        h = jnp.maximum(acc, 0.0).astype(jnp.bfloat16)  # ReLU in f32 (VPU), back to bf16

    # Final 16 -> 1 layer computed lane-dense:
    #   (1, 16) . (batch_tile, 16)^T  ->  (1, batch_tile)   (MXU, f32 acc)
    w_last = p[-2][...]                               # bf16 (1, 16)
    b_last = p[-1][...]                               # f32  (1, 1)
    row = lax.dot_general(
        w_last, h, (((1,), (1,)), ((), ())),
        preferred_element_type=jnp.float32) + b_last
    if inference:
        row = jax.nn.sigmoid(row)                     # EUP, f32
    o_ref[...] = row.astype(o_ref.dtype)


def classification_nn_forward(x, kernel_params, *, inference=True, batch_tile=None):
    """kernel_params = prepare_params(params): flat [w1,b1,...,w6,b6,w7_row,b7].

    Returns probabilities (inference=True) or logits, shape (B, 1) f32.
    """
    B, in_features = x.shape
    num_layers = len(kernel_params) // 2

    if batch_tile is None:
        # Split real work across (up to) 2 TensorCores in 256-row multiples,
        # capped at 2048 rows (still only a few MiB of VMEM).
        batch_tile = min(_round_up(pl.cdiv(B, 2), 256), 2048)
    assert batch_tile % 128 == 0, "batch_tile must be a multiple of 128"

    num_tiles = pl.cdiv(B, batch_tile)
    B_pad = num_tiles * batch_tile
    if B_pad != B:
        x = jnp.pad(x, ((0, B_pad - B), (0, 0)))      # only when actually needed

    # x tile: (batch_tile, in_features) f32, tiled over batch.
    in_specs = [pl.BlockSpec((batch_tile, in_features), lambda i: (i, 0))]
    param_bytes = 0
    for arr in kernel_params:
        param_bytes += int(arr.size) * arr.dtype.itemsize
        # Constant across the grid: single-buffer, fetched once.
        in_specs.append(
            pl.BlockSpec(arr.shape, lambda i: (0, 0), pipeline_mode=pl.Buffered(1))
        )

    kernel = functools.partial(_mlp_kernel, inference, num_layers)

    # Cost estimate: 2*M*K*N flops per layer; x read f32, params streamed once,
    # one f32 output row.
    weight_elems = sum(int(kernel_params[2 * li].size) for li in range(num_layers))
    flops = 2 * B_pad * weight_elems
    bytes_accessed = B_pad * in_features * 4 + B_pad * 4 + param_bytes
    transcendentals = B_pad if inference else 0

    # VMEM budget: double-buffered f32 x tile + single-buffered params + room
    # for f32 activation temporaries + headroom. Capped at 48 MiB (v7x: 64 MiB
    # physical), no artificial floor.
    x_tile_bytes = 2 * batch_tile * in_features * 4
    act_bytes = batch_tile * 512 * 4                  # largest f32 activation tile
    vmem_limit = min(int(param_bytes + x_tile_bytes + 4 * act_bytes + (8 << 20)),
                     48 << 20)

    out_row = pl.pallas_call(
        kernel,
        out_shape=jax.ShapeDtypeStruct((1, B_pad), jnp.float32),
        grid_spec=pltpu.PrefetchScalarGridSpec(
            num_scalar_prefetch=0,
            grid=(num_tiles,),
            in_specs=in_specs,
            out_specs=pl.BlockSpec((1, batch_tile), lambda i: (0, i)),
        ),
        compiler_params=pltpu.CompilerParams(
            dimension_semantics=("parallel",),
            vmem_limit_bytes=vmem_limit,
        ),
        cost_estimate=pl.CostEstimate(
            flops=flops,
            transcendentals=transcendentals,
            bytes_accessed=bytes_accessed,
        ),
    )(x, *kernel_params)

    return out_row[0, :B].reshape(B, 1)


def init_params(key, input_size):
    """Deterministic init mimicking PyTorch nn.Linear default:
    W, b ~ U(-1/sqrt(fan_in), 1/sqrt(fan_in)). Stored as (in, out) / (1, out) f32."""
    params = []
    fan_in = input_size
    for out_dim in LAYER_DIMS:
        key, kw, kb = jax.random.split(key, 3)
        bound = 1.0 / jnp.sqrt(jnp.float32(fan_in))
        w_t = jax.random.uniform(kw, (fan_in, out_dim), jnp.float32,
                                 minval=-bound, maxval=bound)
        b_row = jax.random.uniform(kb, (1, out_dim), jnp.float32,
                                   minval=-bound, maxval=bound)
        params.append((w_t, b_row))
        fan_in = out_dim
    return params


def prepare_params(params):
    """One-time (model-load) conversion to the kernel layout.

    Layers 1..6: bf16 (in, out) weight + f32 (1, out) bias.
    Layer 7    : bf16 (1, in) weight row + f32 (1, 1) bias (lane-dense final layer).
    Avoids per-call casts / transposes over HBM.
    """
    flat = []
    n = len(params)
    for li, (w_t, b_row) in enumerate(params):
        if li == n - 1:
            flat.append(jnp.transpose(w_t).astype(jnp.bfloat16))   # (1, 16)
        else:
            flat.append(w_t.astype(jnp.bfloat16))                  # (in, out)
        flat.append(b_row.astype(jnp.float32))
    return flat


def reference_forward(x, params, inference=True, compute_dtype=jnp.float32):
    """Plain-JAX reference. compute_dtype=bf16 mimics the kernel's rounding
    points (bf16 matmul inputs, f32 accumulation/elementwise)."""
    h = x
    n = len(params)
    for li, (w_t, b_row) in enumerate(params):
        h = jnp.dot(
            h.astype(compute_dtype),
            w_t.astype(compute_dtype),
            preferred_element_type=jnp.float32,
        ) + b_row
        if li < n - 1:
            h = jnp.maximum(h, 0.0)
    if inference:
        h = jax.nn.sigmoid(h)
    return h


if __name__ == "__main__":
    key = jax.random.PRNGKey(0)
    k_param, k_x = jax.random.split(key)

    batch = 300        # not a multiple of the tile -> exercises padding + 2-tile grid
    input_size = 64

    params = init_params(k_param, input_size)
    kernel_params = prepare_params(params)          # bf16 weights, once
    x = jax.random.normal(k_x, (batch, input_size), jnp.float32)

    fwd = jax.jit(functools.partial(classification_nn_forward, inference=True))
    out = jax.block_until_ready(fwd(x, kernel_params))
    assert out.shape == (batch, 1), out.shape

    # Tight check vs. a reference matching the kernel's bf16/f32 rounding.
    ref_bf16 = reference_forward(x, params, inference=True, compute_dtype=jnp.bfloat16)
    err_bf16 = float(jnp.max(jnp.abs(out - ref_bf16)))
    assert err_bf16 < 2e-3, err_bf16

    # Loose check vs. the full-f32 reference (semantics of the PyTorch module).
    ref_f32 = reference_forward(x, params, inference=True, compute_dtype=jnp.float32)
    err_f32 = float(jnp.max(jnp.abs(out - ref_f32)))
    assert err_f32 < 5e-2, err_f32

    print("KERNEL_OK")
</pallas_src>

<mosaic_0001>
module attributes {stable_mosaic.version = 11 : i64} {
  func.func @_mlp_kernel(%arg0: i32, %arg1: memref<256x64xf32, #tpu.memory_space<vmem>>, %arg2: memref<64x512xbf16, #tpu.memory_space<vmem>>, %arg3: memref<1x512xf32, #tpu.memory_space<vmem>>, %arg4: memref<512x256xbf16, #tpu.memory_space<vmem>>, %arg5: memref<1x256xf32, #tpu.memory_space<vmem>>, %arg6: memref<256x128xbf16, #tpu.memory_space<vmem>>, %arg7: memref<1x128xf32, #tpu.memory_space<vmem>>, %arg8: memref<128x64xbf16, #tpu.memory_space<vmem>>, %arg9: memref<1x64xf32, #tpu.memory_space<vmem>>, %arg10: memref<64x32xbf16, #tpu.memory_space<vmem>>, %arg11: memref<1x32xf32, #tpu.memory_space<vmem>>, %arg12: memref<32x16xbf16, #tpu.memory_space<vmem>>, %arg13: memref<1x16xf32, #tpu.memory_space<vmem>>, %arg14: memref<1x16xbf16, #tpu.memory_space<vmem>>, %arg15: memref<1x1xf32, #tpu.memory_space<vmem>>, %arg16: memref<1x256xf32, #tpu.memory_space<vmem>>) attributes {dimension_semantics = [#tpu.dimension_semantics<parallel>], iteration_bounds = array<i64: 2>, scalar_prefetch = 0 : i64, scratch_operands = 0 : i64, tpu.core_type = #tpu.core_type<tc>, window_params = [{transform_indices = @transform_0, window_bounds = array<i64: 256, 64>}, {pipeline_mode = #tpu.pipeline_mode<synchronous>, transform_indices = @transform_1, window_bounds = array<i64: 64, 512>}, {pipeline_mode = #tpu.pipeline_mode<synchronous>, transform_indices = @transform_2, window_bounds = array<i64: 1, 512>}, {pipeline_mode = #tpu.pipeline_mode<synchronous>, transform_indices = @transform_3, window_bounds = array<i64: 512, 256>}, {pipeline_mode = #tpu.pipeline_mode<synchronous>, transform_indices = @transform_4, window_bounds = array<i64: 1, 256>}, {pipeline_mode = #tpu.pipeline_mode<synchronous>, transform_indices = @transform_5, window_bounds = array<i64: 256, 128>}, {pipeline_mode = #tpu.pipeline_mode<synchronous>, transform_indices = @transform_6, window_bounds = array<i64: 1, 128>}, {pipeline_mode = #tpu.pipeline_mode<synchronous>, transform_indices = @transform_7, window_bounds = array<i64: 128, 64>}, {pipeline_mode = #tpu.pipeline_mode<synchronous>, transform_indices = @transform_8, window_bounds = array<i64: 1, 64>}, {pipeline_mode = #tpu.pipeline_mode<synchronous>, transform_indices = @transform_9, window_bounds = array<i64: 64, 32>}, {pipeline_mode = #tpu.pipeline_mode<synchronous>, transform_indices = @transform_10, window_bounds = array<i64: 1, 32>}, {pipeline_mode = #tpu.pipeline_mode<synchronous>, transform_indices = @transform_11, window_bounds = array<i64: 32, 16>}, {pipeline_mode = #tpu.pipeline_mode<synchronous>, transform_indices = @transform_12, window_bounds = array<i64: 1, 16>}, {pipeline_mode = #tpu.pipeline_mode<synchronous>, transform_indices = @transform_13, window_bounds = array<i64: 1, 16>}, {pipeline_mode = #tpu.pipeline_mode<synchronous>, transform_indices = @transform_14, window_bounds = array<i64: 1, 1>}, {transform_indices = @transform_15, window_bounds = array<i64: 1, 256>}]} {
    %c0 = arith.constant 0 : index
    %c0_0 = arith.constant 0 : index
    %0 = vector.load %arg1[%c0, %c0_0] : memref<256x64xf32, #tpu.memory_space<vmem>>, vector<256x64xf32>
    %1 = arith.truncf %0 : vector<256x64xf32> to vector<256x64xbf16>
    %c0_1 = arith.constant 0 : index
    %c0_2 = arith.constant 0 : index
    %2 = vector.load %arg2[%c0_1, %c0_2] : memref<64x512xbf16, #tpu.memory_space<vmem>>, vector<64x512xbf16>
    %c0_3 = arith.constant 0 : index
    %c0_4 = arith.constant 0 : index
    %3 = vector.load %arg3[%c0_3, %c0_4] : memref<1x512xf32, #tpu.memory_space<vmem>>, vector<1x512xf32>
    %cst = arith.constant dense<0.000000e+00> : vector<256x512xf32>
    %4 = tpu.matmul %1, %2, %cst {dimension_numbers = #tpu.dot_dimension_numbers<[1], [0], [0], [1], [0, 0, 1, 1], [], []>} : vector<256x64xbf16>, vector<64x512xbf16>, vector<256x512xf32> -> vector<256x512xf32>
    %5 = vector.broadcast %3 : vector<1x512xf32> to vector<256x512xf32>
    %6 = arith.addf %4, %5 : vector<256x512xf32>
    %cst_5 = arith.constant 0.000000e+00 : f32
    %7 = vector.broadcast %cst_5 : f32 to vector<256x512xf32>
    %8 = arith.maximumf %6, %7 : vector<256x512xf32>
    %9 = arith.truncf %8 : vector<256x512xf32> to vector<256x512xbf16>
    %c0_6 = arith.constant 0 : index
    %c0_7 = arith.constant 0 : index
    %10 = vector.load %arg4[%c0_6, %c0_7] : memref<512x256xbf16, #tpu.memory_space<vmem>>, vector<512x256xbf16>
    %c0_8 = arith.constant 0 : index
    %c0_9 = arith.constant 0 : index
    %11 = vector.load %arg5[%c0_8, %c0_9] : memref<1x256xf32, #tpu.memory_space<vmem>>, vector<1x256xf32>
    %cst_10 = arith.constant dense<0.000000e+00> : vector<256x256xf32>
    %12 = tpu.matmul %9, %10, %cst_10 {dimension_numbers = #tpu.dot_dimension_numbers<[1], [0], [0], [1], [0, 0, 1, 1], [], []>} : vector<256x512xbf16>, vector<512x256xbf16>, vector<256x256xf32> -> vector<256x256xf32>
    %13 = vector.broadcast %11 : vector<1x256xf32> to vector<256x256xf32>
    %14 = arith.addf %12, %13 : vector<256x256xf32>
    %cst_11 = arith.constant 0.000000e+00 : f32
    %15 = vector.broadcast %cst_11 : f32 to vector<256x256xf32>
    %16 = arith.maximumf %14, %15 : vector<256x256xf32>
    %17 = arith.truncf %16 : vector<256x256xf32> to vector<256x256xbf16>
    %c0_12 = arith.constant 0 : index
    %c0_13 = arith.constant 0 : index
    %18 = vector.load %arg6[%c0_12, %c0_13] : memref<256x128xbf16, #tpu.memory_space<vmem>>, vector<256x128xbf16>
    %c0_14 = arith.constant 0 : index
    %c0_15 = arith.constant 0 : index
    %19 = vector.load %arg7[%c0_14, %c0_15] : memref<1x128xf32, #tpu.memory_space<vmem>>, vector<1x128xf32>
    %cst_16 = arith.constant dense<0.000000e+00> : vector<256x128xf32>
    %20 = tpu.matmul %17, %18, %cst_16 {dimension_numbers = #tpu.dot_dimension_numbers<[1], [0], [0], [1], [0, 0, 1, 1], [], []>} : vector<256x256xbf16>, vector<256x128xbf16>, vector<256x128xf32> -> vector<256x128xf32>
    %21 = vector.broadcast %19 : vector<1x128xf32> to vector<256x128xf32>
    %22 = arith.addf %20, %21 : vector<256x128xf32>
    %cst_17 = arith.constant 0.000000e+00 : f32
    %23 = vector.broadcast %cst_17 : f32 to vector<256x128xf32>
    %24 = arith.maximumf %22, %23 : vector<256x128xf32>
    %25 = arith.truncf %24 : vector<256x128xf32> to vector<256x128xbf16>
    %c0_18 = arith.constant 0 : index
    %c0_19 = arith.constant 0 : index
    %26 = vector.load %arg8[%c0_18, %c0_19] : memref<128x64xbf16, #tpu.memory_space<vmem>>, vector<128x64xbf16>
    %c0_20 = arith.constant 0 : index
    %c0_21 = arith.constant 0 : index
    %27 = vector.load %arg9[%c0_20, %c0_21] : memref<1x64xf32, #tpu.memory_space<vmem>>, vector<1x64xf32>
    %cst_22 = arith.constant dense<0.000000e+00> : vector<256x64xf32>
    %28 = tpu.matmul %25, %26, %cst_22 {dimension_numbers = #tpu.dot_dimension_numbers<[1], [0], [0], [1], [0, 0, 1, 1], [], []>} : vector<256x128xbf16>, vector<128x64xbf16>, vector<256x64xf32> -> vector<256x64xf32>
    %29 = vector.broadcast %27 : vector<1x64xf32> to vector<256x64xf32>
    %30 = arith.addf %28, %29 : vector<256x64xf32>
    %cst_23 = arith.constant 0.000000e+00 : f32
    %31 = vector.broadcast %cst_23 : f32 to vector<256x64xf32>
    %32 = arith.maximumf %30, %31 : vector<256x64xf32>
    %33 = arith.truncf %32 : vector<256x64xf32> to vector<256x64xbf16>
    %c0_24 = arith.constant 0 : index
    %c0_25 = arith.constant 0 : index
    %34 = vector.load %arg10[%c0_24, %c0_25] : memref<64x32xbf16, #tpu.memory_space<vmem>>, vector<64x32xbf16>
    %c0_26 = arith.constant 0 : index
    %c0_27 = arith.constant 0 : index
    %35 = vector.load %arg11[%c0_26, %c0_27] : memref<1x32xf32, #tpu.memory_space<vmem>>, vector<1x32xf32>
    %cst_28 = arith.constant dense<0.000000e+00> : vector<256x32xf32>
    %36 = tpu.matmul %33, %34, %cst_28 {dimension_numbers = #tpu.dot_dimension_numbers<[1], [0], [0], [1], [0, 0, 1, 1], [], []>} : vector<256x64xbf16>, vector<64x32xbf16>, vector<256x32xf32> -> vector<256x32xf32>
    %37 = vector.broadcast %35 : vector<1x32xf32> to vector<256x32xf32>
    %38 = arith.addf %36, %37 : vector<256x32xf32>
    %cst_29 = arith.constant 0.000000e+00 : f32
    %39 = vector.broadcast %cst_29 : f32 to vector<256x32xf32>
    %40 = arith.maximumf %38, %39 : vector<256x32xf32>
    %41 = arith.truncf %40 : vector<256x32xf32> to vector<256x32xbf16>
    %c0_30 = arith.constant 0 : index
    %c0_31 = arith.constant 0 : index
    %42 = vector.load %arg12[%c0_30, %c0_31] : memref<32x16xbf16, #tpu.memory_space<vmem>>, vector<32x16xbf16>
    %c0_32 = arith.constant 0 : index
    %c0_33 = arith.constant 0 : index
    %43 = vector.load %arg13[%c0_32, %c0_33] : memref<1x16xf32, #tpu.memory_space<vmem>>, vector<1x16xf32>
    %cst_34 = arith.constant dense<0.000000e+00> : vector<256x16xf32>
    %44 = tpu.matmul %41, %42, %cst_34 {dimension_numbers = #tpu.dot_dimension_numbers<[1], [0], [0], [1], [0, 0, 1, 1], [], []>} : vector<256x32xbf16>, vector<32x16xbf16>, vector<256x16xf32> -> vector<256x16xf32>
    %45 = vector.broadcast %43 : vector<1x16xf32> to vector<256x16xf32>
    %46 = arith.addf %44, %45 : vector<256x16xf32>
    %cst_35 = arith.constant 0.000000e+00 : f32
    %47 = vector.broadcast %cst_35 : f32 to vector<256x16xf32>
    %48 = arith.maximumf %46, %47 : vector<256x16xf32>
    %49 = arith.truncf %48 : vector<256x16xf32> to vector<256x16xbf16>
    %c0_36 = arith.constant 0 : index
    %c0_37 = arith.constant 0 : index
    %50 = vector.load %arg14[%c0_36, %c0_37] : memref<1x16xbf16, #tpu.memory_space<vmem>>, vector<1x16xbf16>
    %c0_38 = arith.constant 0 : index
    %c0_39 = arith.constant 0 : index
    %51 = vector.load %arg15[%c0_38, %c0_39] : memref<1x1xf32, #tpu.memory_space<vmem>>, vector<1x1xf32>
    %cst_40 = arith.constant dense<0.000000e+00> : vector<1x256xf32>
    %52 = tpu.matmul %50, %49, %cst_40 {dimension_numbers = #tpu.dot_dimension_numbers<[1], [1], [0], [0], [0, 0, 1, 0], [], []>} : vector<1x16xbf16>, vector<256x16xbf16>, vector<1x256xf32> -> vector<1x256xf32>
    %53 = vector.broadcast %51 : vector<1x1xf32> to vector<1x256xf32>
    %54 = arith.addf %52, %53 : vector<1x256xf32>
    %55 = arith.negf %54 : vector<1x256xf32>
    %56 = math.exp %55 : vector<1x256xf32>
    %cst_41 = arith.constant 1.000000e+00 : f32
    %57 = vector.broadcast %cst_41 : f32 to vector<1x256xf32>
    %58 = arith.addf %57, %56 : vector<1x256xf32>
    %59 = arith.divf %57, %58 : vector<1x256xf32>
    %c0_42 = arith.constant 0 : index
    %c0_43 = arith.constant 0 : index
    %60 = vector.load %arg16[%c0_42, %c0_43] : memref<1x256xf32, #tpu.memory_space<vmem>>, vector<1x256xf32>
    tpu.vector_store %arg16[%c0_42, %c0_43], %59 {strides = array<i32>} : memref<1x256xf32, #tpu.memory_space<vmem>>, vector<1x256xf32>,
    return
  }
  func.func @transform_0(%arg0: i32) -> (i32, i32) {
    %c0_i32 = arith.constant 0 : i32
    %c0_i32_0 = arith.constant 0 : i32
    return %arg0, %c0_i32 : i32, i32
  }
  func.func @transform_1(%arg0: i32) -> (i32, i32) {
    %c0_i32 = arith.constant 0 : i32
    %c0_i32_0 = arith.constant 0 : i32
    %c0_i32_1 = arith.constant 0 : i32
    return %c0_i32, %c0_i32_0 : i32, i32
  }
  func.func @transform_2(%arg0: i32) -> (i32, i32) {
    %c0_i32 = arith.constant 0 : i32
    %c0_i32_0 = arith.constant 0 : i32
    %c0_i32_1 = arith.constant 0 : i32
    return %c0_i32, %c0_i32_0 : i32, i32
  }
  func.func @transform_3(%arg0: i32) -> (i32, i32) {
    %c0_i32 = arith.constant 0 : i32
    %c0_i32_0 = arith.constant 0 : i32
    %c0_i32_1 = arith.constant 0 : i32
    return %c0_i32, %c0_i32_0 : i32, i32
  }
  func.func @transform_4(%arg0: i32) -> (i32, i32) {
    %c0_i32 = arith.constant 0 : i32
    %c0_i32_0 = arith.constant 0 : i32
    %c0_i32_1 = arith.constant 0 : i32
    return %c0_i32, %c0_i32_0 : i32, i32
  }
  func.func @transform_5(%arg0: i32) -> (i32, i32) {
    %c0_i32 = arith.constant 0 : i32
    %c0_i32_0 = arith.constant 0 : i32
    %c0_i32_1 = arith.constant 0 : i32
    return %c0_i32, %c0_i32_0 : i32, i32
  }
  func.func @transform_6(%arg0: i32) -> (i32, i32) {
    %c0_i32 = arith.constant 0 : i32
    %c0_i32_0 = arith.constant 0 : i32
    %c0_i32_1 = arith.constant 0 : i32
    return %c0_i32, %c0_i32_0 : i32, i32
  }
  func.func @transform_7(%arg0: i32) -> (i32, i32) {
    %c0_i32 = arith.constant 0 : i32
    %c0_i32_0 = arith.constant 0 : i32
    %c0_i32_1 = arith.constant 0 : i32
    return %c0_i32, %c0_i32_0 : i32, i32
  }
  func.func @transform_8(%arg0: i32) -> (i32, i32) {
    %c0_i32 = arith.constant 0 : i32
    %c0_i32_0 = arith.constant 0 : i32
    %c0_i32_1 = arith.constant 0 : i32
    return %c0_i32, %c0_i32_0 : i32, i32
  }
  func.func @transform_9(%arg0: i32) -> (i32, i32) {
    %c0_i32 = arith.constant 0 : i32
    %c0_i32_0 = arith.constant 0 : i32
    %c0_i32_1 = arith.constant 0 : i32
    return %c0_i32, %c0_i32_0 : i32, i32
  }
  func.func @transform_10(%arg0: i32) -> (i32, i32) {
    %c0_i32 = arith.constant 0 : i32
    %c0_i32_0 = arith.constant 0 : i32
    %c0_i32_1 = arith.constant 0 : i32
    return %c0_i32, %c0_i32_0 : i32, i32
  }
  func.func @transform_11(%arg0: i32) -> (i32, i32) {
    %c0_i32 = arith.constant 0 : i32
    %c0_i32_0 = arith.constant 0 : i32
    %c0_i32_1 = arith.constant 0 : i32
    return %c0_i32, %c0_i32_0 : i32, i32
  }
  func.func @transform_12(%arg0: i32) -> (i32, i32) {
    %c0_i32 = arith.constant 0 : i32
    %c0_i32_0 = arith.constant 0 : i32
    %c0_i32_1 = arith.constant 0 : i32
    return %c0_i32, %c0_i32_0 : i32, i32
  }
  func.func @transform_13(%arg0: i32) -> (i32, i32) {
    %c0_i32 = arith.constant 0 : i32
    %c0_i32_0 = arith.constant 0 : i32
    %c0_i32_1 = arith.constant 0 : i32
    return %c0_i32, %c0_i32_0 : i32, i32
  }
  func.func @transform_14(%arg0: i32) -> (i32, i32) {
    %c0_i32 = arith.constant 0 : i32
    %c0_i32_0 = arith.constant 0 : i32
    %c0_i32_1 = arith.constant 0 : i32
    return %c0_i32, %c0_i32_0 : i32, i32
  }
  func.func @transform_15(%arg0: i32) -> (i32, i32) {
    %c0_i32 = arith.constant 0 : i32
    %c0_i32_0 = arith.constant 0 : i32
    return %c0_i32, %arg0 : i32, i32
  }
}

</mosaic_0001>

<bundles_post_ra>
// kernel: classification_nn_forward.1
= control target key start
LH: loop header
LB: loop body
LE: loop exit
PB: predicated region body
PF: predicated region fallthrough
CT: control target
= control target key end

     0   :  { %s4345_s20 = smov 0   ;;  %s5482_s0 = inlined_call_operand.vmem [shape: f32[512,64], index: 0, kind: input, shape index: {}]   ;;  %s5483_s1 = inlined_call_operand.vmem [shape: bf16[64,512], index: 1, kind: input, shape index: {}]   ;;  %s5484_s2 = inlined_call_operand.vmem [shape: f32[1,512], index: 2, kind: input, shape index: {}]   ;;  %s5485_s3 = inlined_call_operand.vmem [shape: bf16[512,256], index: 3, kind: input, shape index: {}]   ;;  %s5486_s4 = inlined_call_operand.vmem [shape: f32[1,256], index: 4, kind: input, shape index: {}]   ;;  %s5487_s5 = inlined_call_operand.vmem [shape: bf16[256,128], index: 5, kind: input, shape index: {}]   ;;  %s5488_s6 = inlined_call_operand.vmem [shape: f32[1,128], index: 6, kind: input, shape index: {}]   ;;  %s5489_s7 = inlined_call_operand.vmem [shape: bf16[128,64], index: 7, kind: input, shape index: {}]   ;;  %s5490_s8 = inlined_call_operand.vmem [shape: f32[1,64], index: 8, kind: input, shape index: {}]   ;;  %s5491_s9 = inlined_call_operand.vmem [shape: bf16[64,32], index: 9, kind: input, shape index: {}]   ;;  %s5492_s10 = inlined_call_operand.vmem [shape: f32[1,32], index: 10, kind: input, shape index: {}]   ;;  %s5493_s11 = inlined_call_operand.vmem [shape: bf16[32,16], index: 11, kind: input, shape index: {}]   ;;  %s5494_s12 = inlined_call_operand.vmem [shape: f32[1,16], index: 12, kind: input, shape index: {}]   ;;  %s5495_s13 = inlined_call_operand.vmem [shape: bf16[1,16], index: 13, kind: input, shape index: {}]   ;;  %s5496_s14 = inlined_call_operand.<no memory space> [shape: f32[1,1], index: 14, kind: input, shape index: {}]   ;;  %s5497_s15 = inlined_call_operand.vmem [shape: f32[1,512], index: 15, kind: output, shape index: {}]  }
   0x1   :  { %v20_v0 = vstv %s5496_s14 }
   0x2   :  { %21 = vst [vmem:[#allocation2] sm:$0x1] %v20_v0 }
   0x3 LB: > { %s3560_s21 = sadd.s32 4294967295, %s4258_s20   ;;  %p3564_p0 = scmp.ge.s32.totalorder %s4258_s20, 1  ;;  %s4258_s20 = sphi %s4345_s20, %s27_s20  }
   0x4   : > { %p440_p1 = scmp.lt.s32.totalorder %s4258_s20, 3 }
   0x6   : > { %p441_p2 = pnand %p3564_p0, %p440_p1 }
   0x7   : > { %s3565_s14 = sshll.u32 (!%p441_p2), %s3560_s21, 5 }
   0x8   : > { %444 = sbr.rel (%p441_p2) target bundleno = 1709 (0x6ad), region = 80  ;;  %p488_p3 = scmp.lt.s32.totalorder (!%p441_p2), %s3565_s14, 63 }
   0xd   : > { %v4094_v1 = vld [vmem:[%s5483_s1 + $0x64] ss:$16 sps:$4 sm:$0xff]   ;;  %v4096_v2 = vld [vmem:[%s5483_s1 + $0x60] ss:$16 sps:$4 sm:$0xff]   ;;  %v4260_v3 = vmov 0   ;;  %s5499_s14 = smov (!%p488_p3, %s3565_s14), 63 }
   0xe   : > { %746 = vmatprep.mubr.bf16.mxu0 %v4260_v3  ;;  %876 = vmatprep.mubr.bf16.mxu1 %v4260_v3  ;;  %v4097_v4 = vld [vmem:[%s5483_s1 + $0x44] ss:$16 sps:$4 sm:$0xff]   ;;  %v4099_v5 = vld [vmem:[%s5483_s1 + $0x40] ss:$16 sps:$4 sm:$0xff]   ;;  %s3566_s17 = sshll.u32 %s5499_s14, 3  ;;  %vm665_vm0 = vcmask 523264  }
   0xf   : > { %722 = vmatprep.subr.bf16.mxu0 %v4094_v1  ;;  %4067 = vmatprep.subr.bf16.mxu1 %v4094_v1  ;;  %v4100_v6 = vld [vmem:[%s5483_s1 + $0x24] ss:$16 sps:$4 sm:$0xff]   ;;  %v4102_v7 = vld [vmem:[%s5483_s1 + $0x20] ss:$16 sps:$4 sm:$0xff]   ;;  %s4379_s24 = scalar_lea.vmem %s5482_s0, %s3566_s17  ;;  %v4108_v14 = vld [vmem:[%s5483_s1 + $0x6c] ss:$16 sps:$4 sm:$0xff]  }
  0x10   : > { %723 = vmatpush1.bf16.msra.mxu0 %v4096_v2  ;;  %4071 = vmatpush1.bf16.msra.mxu1 %v4096_v2  ;;  %v4103_v8 = vld [vmem:[%s5483_s1 + $0x4] ss:$16 sps:$4 sm:$0xff]   ;;  %v4105_v9 = vld [vmem:[%s5483_s1] ss:$16 sps:$4 sm:$0xff]   ;;  %v500_v11 = vld [vmem:[%s4379_s24 + $0x8] sm:$0xff]  ;;  %vm3113_vm1 = vcmask 261120  }
  0x11   : > { %724 = vmatprep.subr.bf16.mxu0 %v4097_v4  ;;  %4068 = vmatprep.subr.bf16.mxu1 %v4097_v4  ;;  %v499_v10 = vld [vmem:[%s4379_s24] sm:$0xff]  ;;  %v525_v12 = vld [vmem:[%s4379_s24 + $0xd0] sm:$0xff]  ;;  %v526_v13 = vld [vmem:[%s4379_s24 + $0xd8] sm:$0xff]  ;;  %vm3382_vm2 = vcmask 130048   ;;  %s3567_s17 = sshll.u32 %s3560_s21, 1 }
  0x12   : > { %4093 = vset.pattern.permute.xlu0 %v4260_v3  ;;  %v4394_v15 = vpack.c.bf16 %v500_v11, %v499_v10  ;;  %v4396_v16 = vpack.c.bf16 %v526_v13, %v525_v12  ;;  %v4106_v17 = vld [vmem:[%s5483_s1 + $0x68] ss:$16 sps:$4 sm:$0xff]   ;;  %v4111_v18 = vld [vmem:[%s5483_s1 + $0x4c] ss:$16 sps:$4 sm:$0xff]   ;;  %v501_v20 = vld [vmem:[%s4379_s24 + $0x10] sm:$0xff]  ;;  %p494_p4 = scmp.lt.s32.totalorder %s3567_s17, 3 }
  0x13   : > { %v4109_v19 = vld [vmem:[%s5483_s1 + $0x48] ss:$16 sps:$4 sm:$0xff]   ;;  %v527_v22 = vld [vmem:[%s4379_s24 + $0xe0] sm:$0xff]  ;;  %v4114_v24 = vld [vmem:[%s5483_s1 + $0x2c] ss:$16 sps:$4 sm:$0xff]  }
  0x14   : > { %725 = vmatpush1.bf16.msra.mxu0 %v4099_v5  ;;  %4072 = vmatpush1.bf16.msra.mxu1 %v4099_v5  ;;  %v502_v21 = vld [vmem:[%s4379_s24 + $0x18] sm:$0xff]  ;;  %v528_v23 = vld [vmem:[%s4379_s24 + $0xe8] sm:$0xff]  ;;  %v503_v29 = vld [vmem:[%s4379_s24 + $0x20] sm:$0xff]  ;;  %s5501_s17 = smov (!%p494_p4, %s3567_s17), 3 }
  0x15   : > { %726 = vmatprep.subr.bf16.mxu0 %v4100_v6  ;;  %4069 = vmatprep.subr.bf16.mxu1 %v4100_v6  ;;  %v4420_v25 = vpack.c.bf16 %v502_v21, %v501_v20  ;;  %v4422_v26 = vpack.c.bf16 %v528_v23, %v527_v22  ;;  %v4112_v27 = vld [vmem:[%s5483_s1 + $0x28] ss:$16 sps:$4 sm:$0xff]   ;;  %v4117_v28 = vld [vmem:[%s5483_s1 + $0xc] ss:$16 sps:$4 sm:$0xff]   ;;  %v529_v31 = vld [vmem:[%s4379_s24 + $0xf0] sm:$0xff]  ;;  %s496_s22 = scalar_lea.vmem %s5497_s15, %s5501_s17 }
  0x16   : > { %v504_v30 = vld [vmem:[%s4379_s24 + $0x28] sm:$0xff]  ;;  %v4127_v32 = vld [vmem:[%s5485_s3 + $0x70] ss:$8 sps:$4 sm:$0xff]   ;;  %v4129_v33 = vld [vmem:[%s5485_s3 + $0x74] ss:$8 sps:$4 sm:$0xff]  }
  0x17   : > { %v530_v34 = vld [vmem:[%s4379_s24 + $0xf8] sm:$0xff]  ;;  %v4135_v37 = vld [vmem:[%s5485_s3 + $0x64] ss:$8 sps:$4 sm:$0xff]   ;;  %v4455_v38 = vpack.c.bf16 %v504_v30, %v503_v29  ;;  %v4133_v40 = vld [vmem:[%s5485_s3 + $0x60] ss:$8 sps:$4 sm:$0xff]  }
  0x18   : > { %727 = vmatpush1.bf16.msra.mxu0 %v4102_v7  ;;  %4073 = vmatpush1.bf16.msra.mxu1 %v4102_v7  ;;  %v4115_v35 = vld [vmem:[%s5483_s1 + $0x8] ss:$16 sps:$4 sm:$0xff]   ;;  %v4120_v36 = vld [vmem:[%s5485_s3 + $0x174] ss:$8 sps:$4 sm:$0xff]   ;;  %v4457_v39 = vpack.c.bf16 %v530_v34, %v529_v31  ;;  %v4147_v45 = vld [vmem:[%s5485_s3 + $0x44] ss:$8 sps:$4 sm:$0xff]  }
  0x19   : > { %728 = vmatprep.subr.bf16.mxu0 %v4103_v8  ;;  %4070 = vmatprep.subr.bf16.mxu1 %v4103_v8  ;;  %v4141_v41 = vld [vmem:[%s5485_s3 + $0x54] ss:$8 sps:$4 sm:$0xff]   ;;  %v4139_v44 = vld [vmem:[%s5485_s3 + $0x50] ss:$8 sps:$4 sm:$0xff]   ;;  %v4123_v48 = vld [vmem:[%s5485_s3 + $0x164] ss:$8 sps:$4 sm:$0xff]  }
  0x1a   : > { %v505_v42 = vld [vmem:[%s4379_s24 + $0x30] sm:$0xff]  ;;  %v506_v43 = vld [vmem:[%s4379_s24 + $0x38] sm:$0xff]  ;;  %v4145_v49 = vld [vmem:[%s5485_s3 + $0x40] ss:$8 sps:$4 sm:$0xff]  }
  0x1b   : > { %v4479_v46 = vpack.c.bf16 %v506_v43, %v505_v42  ;;  %v4118_v47 = vld [vmem:[%s5485_s3 + $0x170] ss:$8 sps:$4 sm:$0xff]   ;;  %v4150_v50 = vld [vmem:[%s5485_s3 + $0x34] ss:$8 sps:$4 sm:$0xff]   ;;  %v507_v51 = vld [vmem:[%s4379_s24 + $0x40] sm:$0xff] }
  0x1c   : > { %729 = vmatpush1.bf16.msra.mxu0 %v4105_v9  ;;  %4074 = vmatpush1.bf16.msra.mxu1 %v4105_v9  ;;  %v508_v52 = vld [vmem:[%s4379_s24 + $0x48] sm:$0xff]  ;;  %v4126_v54 = vld [vmem:[%s5485_s3 + $0x154] ss:$8 sps:$4 sm:$0xff]   ;;  %v4148_v55 = vld [vmem:[%s5485_s3 + $0x30] ss:$8 sps:$4 sm:$0xff]  }
  0x1d   : > { %915 = vmatprep.subr.bf16.mxu1 %v4108_v14  ;;  %1688 = vmatprep.subr.bf16.mxu0 %v4129_v33  ;;  %v4121_v53 = vld [vmem:[%s5485_s3 + $0x160] ss:$8 sps:$4 sm:$0xff]   ;;  %v4156_v56 = vld [vmem:[%s5485_s3 + $0x24] ss:$8 sps:$4 sm:$0xff]   ;;  %v4513_v57 = vpack.c.bf16 %v508_v52, %v507_v51  ;;  %v4124_v58 = vld [vmem:[%s5485_s3 + $0x150] ss:$8 sps:$4 sm:$0xff]  }
  0x1e   : > { %v4132_v59 = vld [vmem:[%s5485_s3 + $0x144] ss:$8 sps:$4 sm:$0xff]   ;;  %v4154_v60 = vld [vmem:[%s5485_s3 + $0x20] ss:$8 sps:$4 sm:$0xff]   ;;  %v4162_v61 = vld [vmem:[%s5485_s3 + $0x14] ss:$8 sps:$4 sm:$0xff]  }
  0x1f   : > { %3584 = vmatmul.mubr.msk.bf16.vlgmr.msra.gmra.mxu0 %vm665_vm0, %v4394_v15  ;;  %3597 = vmatmul.mubr.msk.bf16.vlgmr.msra.gmra.mxu1 %vm665_vm0, %v4396_v16  ;;  %v509_v62 = vld [vmem:[%s4379_s24 + $0x50] sm:$0xff]  ;;  %v510_v63 = vld [vmem:[%s4379_s24 + $0x58] sm:$0xff]  ;;  %v4130_v0 = vld [vmem:[%s5485_s3 + $0x140] ss:$8 sps:$4 sm:$0xff]  }
  0x20   : > { %916 = vmatpush1.bf16.msra.mxu1 %v4106_v17  ;;  %756 = vmatprep.mubr.bf16.mxu0 %v4260_v3  ;;  %v4138_v1 = vld [vmem:[%s5485_s3 + $0x134] ss:$8 sps:$4 sm:$0xff]   ;;  %v4160_v2 = vld [vmem:[%s5485_s3 + $0x10] ss:$8 sps:$4 sm:$0xff]   ;;  %v4168_v4 = vld [vmem:[%s5485_s3 + $0x4] ss:$8 sps:$4 sm:$0xff]   ;;  %v4547_v5 = vpack.c.bf16 %v510_v63, %v509_v62 }
  0x21   : > { %917 = vmatprep.subr.bf16.mxu1 %v4111_v18  ;;  %886 = vmatprep.mubr.bf16.mxu1 %v4260_v3  ;;  %v4136_v6 = vld [vmem:[%s5485_s3 + $0x130] ss:$8 sps:$4 sm:$0xff]   ;;  %v4166_v7 = vld [vmem:[%s5485_s3] ss:$8 sps:$4 sm:$0xff]   ;;  %v4144_v8 = vld [vmem:[%s5485_s3 + $0x124] ss:$8 sps:$4 sm:$0xff]  }
  0x22   : > { %1689 = vmatpush1.bf16.msra.mxu0 %v4127_v32  ;;  %v4171_v9 = vld [vmem:[%s5485_s3 + $0xf4] ss:$8 sps:$4 sm:$0xff]   ;;  %v511_v10 = vld [vmem:[%s4379_s24 + $0x60] sm:$0xff]  ;;  %v512_v11 = vld [vmem:[%s4379_s24 + $0x68] sm:$0xff] }
  0x23   : > { %1690 = vmatprep.subr.bf16.mxu0 %v4135_v37  ;;  %v4142_v12 = vld [vmem:[%s5485_s3 + $0x120] ss:$8 sps:$4 sm:$0xff]   ;;  %v4169_v13 = vld [vmem:[%s5485_s3 + $0xf0] ss:$8 sps:$4 sm:$0xff]   ;;  %v4153_v14 = vld [vmem:[%s5485_s3 + $0x114] ss:$8 sps:$4 sm:$0xff]   ;;  %v4581_v17 = vpack.c.bf16 %v512_v11, %v511_v10 }
  0x24   : > { %918 = vmatpush1.bf16.msra.mxu1 %v4109_v19  ;;  %v4151_v18 = vld [vmem:[%s5485_s3 + $0x110] ss:$8 sps:$4 sm:$0xff]   ;;  %v4175_v19 = vld [vmem:[%s5485_s3 + $0xe0] ss:$8 sps:$4 sm:$0xff]   ;;  %v4159_v20 = vld [vmem:[%s5485_s3 + $0x104] ss:$8 sps:$4 sm:$0xff]  }
  0x25   : > { %919 = vmatprep.subr.bf16.mxu1 %v4114_v24  ;;  %v4180_v21 = vld [vmem:[%s5485_s3 + $0xd4] ss:$8 sps:$4 sm:$0xff]   ;;  %v4157_v24 = vld [vmem:[%s5485_s3 + $0x100] ss:$8 sps:$4 sm:$0xff]   ;;  %v4163_v30 = vld [vmem:[%s5485_s3 + $0x1f0] ss:$8 sps:$4 sm:$0xff]  }
  0x26   : > { %1691 = vmatpush1.bf16.msra.mxu0 %v4133_v40  ;;  %v513_v22 = vld [vmem:[%s4379_s24 + $0x70] sm:$0xff]  ;;  %v514_v23 = vld [vmem:[%s4379_s24 + $0x78] sm:$0xff]  ;;  %v4184_v31 = vld [vmem:[%s5485_s3 + $0xc0] ss:$8 sps:$4 sm:$0xff]  }
  0x27   : > { %3585 = vmatmul.mubr.msk.bf16.gmra.mxu0 %vm665_vm0, %v4420_v25  ;;  %3598 = vmatmul.mubr.msk.bf16.gmra.mxu1 %vm665_vm0, %v4422_v26  ;;  %v4615_v29 = vpack.c.bf16 %v514_v23, %v513_v22  ;;  %v4174_v32 = vld [vmem:[%s5485_s3 + $0x1e4] ss:$8 sps:$4 sm:$0xff]   ;;  %v4189_v33 = vld [vmem:[%s5485_s3 + $0xb4] ss:$8 sps:$4 sm:$0xff]   ;;  %v4187_v37 = vld [vmem:[%s5485_s3 + $0xb0] ss:$8 sps:$4 sm:$0xff]  }
  0x28   : > { %920 = vmatpush1.bf16.msra.mxu1 %v4112_v27  ;;  %766 = vmatprep.mubr.bf16.mxu0 %v4260_v3  ;;  %v4165_v27 = vld [vmem:[%s5485_s3 + $0x1f4] ss:$8 sps:$4 sm:$0xff]   ;;  %v515_v34 = vld [vmem:[%s4379_s24 + $0x80] sm:$0xff]  ;;  %v520_v52 = vld [vmem:[%s4379_s24 + $0xa8] sm:$0xff] }
  0x29   : > { %896 = vmatprep.mubr.bf16.mxu1 %v4260_v3  ;;  %921 = vmatprep.subr.bf16.mxu1 %v4117_v28  ;;  %v4186_v28 = vld [vmem:[%s5485_s3 + $0xc4] ss:$8 sps:$4 sm:$0xff]  }
  0x2a   : > { %1692 = vmatprep.subr.bf16.mxu0 %v4141_v41  ;;  %v4181_v41 = vld [vmem:[%s5485_s3 + $0x1d0] ss:$8 sps:$4 sm:$0xff]   ;;  %v4192_v42 = vld [vmem:[%s5485_s3 + $0x1c4] ss:$8 sps:$4 sm:$0xff]  }
  0x2b   : > { %1693 = vmatpush1.bf16.msra.mxu0 %v4139_v44  ;;  %v4195_v43 = vld [vmem:[%s5485_s3 + $0xa4] ss:$8 sps:$4 sm:$0xff]   ;;  %v517_v44 = vld [vmem:[%s4379_s24 + $0x90] sm:$0xff] }
  0x2c   : > { %922 = vmatpush1.bf16.msra.mxu1 %v4115_v35  ;;  %1694 = vmatprep.subr.bf16.mxu0 %v4147_v45  ;;  %v516_v35 = vld [vmem:[%s4379_s24 + $0x88] sm:$0xff]  ;;  %v518_v45 = vld [vmem:[%s4379_s24 + $0x98] sm:$0xff]  ;;  %v519_v51 = vld [vmem:[%s4379_s24 + $0xa0] sm:$0xff] }
  0x2d   : > { %1881 = vmatprep.subr.bf16.mxu1 %v4120_v36  ;;  %v4172_v36 = vld [vmem:[%s5485_s3 + $0x1e0] ss:$8 sps:$4 sm:$0xff]   ;;  %v539_v40 = vpack.c.bf16 %v516_v35, %v515_v34 }
  0x2e   : > { %v523_v63 = vld [vmem:[%s4379_s24 + $0xc0] sm:$0xff] }
  0x2f   : > { %3586 = vmatmul.mubr.msk.bf16.gmra.mxu0 %vm665_vm0, %v4455_v38  ;;  %3599 = vmatmul.mubr.msk.bf16.gmra.mxu1 %vm665_vm0, %v4457_v39 }
  0x30   : > { %776 = vmatprep.mubr.bf16.mxu0 %v4260_v3  ;;  %939 = vmatprep.mubr.bf16.mxu1 %v4260_v3 }
  0x31   : > { %1695 = vmatpush1.bf16.msra.mxu0 %v4145_v49  ;;  %v4198_v49 = vld [vmem:[%s5485_s3 + $0x94] ss:$8 sps:$4 sm:$0xff]  }
  0x32   : > { %1696 = vmatprep.subr.bf16.mxu0 %v4150_v50  ;;  %v4196_v50 = vld [vmem:[%s5485_s3 + $0x90] ss:$8 sps:$4 sm:$0xff]  }
  0x35   : > { %1697 = vmatpush1.bf16.msra.mxu0 %v4148_v55  ;;  %v4204_v55 = vld [vmem:[%s5485_s3 + $0x84] ss:$8 sps:$4 sm:$0xff]  }
  0x36   : > { %1698 = vmatprep.subr.bf16.mxu0 %v4156_v56  ;;  %v4202_v56 = vld [vmem:[%s5485_s3 + $0x80] ss:$8 sps:$4 sm:$0xff]  }
  0x37   : > { %3587 = vmatmul.mubr.msk.bf16.gmra.mxu0 %vm665_vm0, %v4479_v46  ;;  %3600 = vmatmul.mubr.msk.bf16.vlgmr.msra.gmra.mxu1 %vm665_vm0, %v4394_v15  ;;  %v4177_v15 = vld [vmem:[%s5485_s3 + $0xe4] ss:$8 sps:$4 sm:$0xff]  }
  0x38   : > { %786 = vmatprep.mubr.bf16.mxu0 %v4260_v3  ;;  %949 = vmatprep.mubr.bf16.mxu1 %v4260_v3 }
  0x39   : > { %1882 = vmatpush1.bf16.msra.mxu1 %v4118_v47  ;;  %1699 = vmatpush1.bf16.msra.mxu0 %v4154_v60  ;;  %v4190_v47 = vld [vmem:[%s5485_s3 + $0x1c0] ss:$8 sps:$4 sm:$0xff]  }
  0x3a   : > { %1883 = vmatprep.subr.bf16.mxu1 %v4123_v48  ;;  %1700 = vmatprep.subr.bf16.mxu0 %v4162_v61  ;;  %v540_v48 = vpack.c.bf16 %v518_v45, %v517_v44  ;;  %v4205_v60 = vld [vmem:[%s5485_s3 + $0x1a0] ss:$8 sps:$4 sm:$0xff]   ;;  %v4207_v61 = vld [vmem:[%s5485_s3 + $0x1a4] ss:$8 sps:$4 sm:$0xff]   ;;  %v4215_v44 = vld [vmem:[%s5487_s5 + $0x38] sm:$0xff]  }
  0x3d   : > { %1884 = vmatpush1.bf16.msra.mxu1 %v4121_v53  ;;  %1701 = vmatpush1.bf16.msra.mxu0 %v4160_v2  ;;  %v4199_v53 = vld [vmem:[%s5485_s3 + $0x1b0] ss:$8 sps:$4 sm:$0xff]   ;;  %v4210_v2 = vld [vmem:[%s5485_s3 + $0x194] ss:$8 sps:$4 sm:$0xff]  }
  0x3e   : > { %1885 = vmatprep.subr.bf16.mxu1 %v4126_v54  ;;  %1702 = vmatprep.subr.bf16.mxu0 %v4168_v4  ;;  %v4201_v54 = vld [vmem:[%s5485_s3 + $0x1b4] ss:$8 sps:$4 sm:$0xff]  }
  0x3f   : > { %3588 = vmatmul.mubr.msk.bf16.gmra.mxu0 %vm665_vm0, %v4513_v57  ;;  %3601 = vmatmul.mubr.msk.bf16.gmra.mxu1 %vm665_vm0, %v4420_v25  ;;  %v4178_v25 = vld [vmem:[%s5485_s3 + $0xd0] ss:$8 sps:$4 sm:$0xff]  }
  0x40   : > { %796 = vmatprep.mubr.bf16.mxu0 %v4260_v3  ;;  %959 = vmatprep.mubr.bf16.mxu1 %v4260_v3 }
  0x41   : > { %1886 = vmatpush1.bf16.msra.mxu1 %v4124_v58  ;;  %1703 = vmatpush1.bf16.msra.mxu0 %v4166_v7  ;;  %v521_v58 = vld [vmem:[%s4379_s24 + $0xb0] sm:$0xff]  ;;  %v565_v7 = vlaneseq }
  0x42   : > { %1887 = vmatprep.subr.bf16.mxu1 %v4132_v59  ;;  %1704 = vmatprep.subr.bf16.mxu0 %v4171_v9  ;;  %v522_v59 = vld [vmem:[%s4379_s24 + $0xb8] sm:$0xff] }
  0x43   : > { %v542_v62 = vpack.c.bf16 %v522_v59, %v521_v58  ;;  %v4214_v9 = vld [vmem:[%s5487_s5 + $0x78] sm:$0xff]   ;;  %v4217_v58 = vld [vmem:[%s5487_s5 + $0x30] sm:$0xff]   ;;  %vm3507_vm3 = vcmp.lt.s32.totalorder %v565_v7, 256 }
  0x45   : > { %1888 = vmatpush1.bf16.msra.mxu1 %v4130_v0  ;;  %1705 = vmatpush2.bf16.msra.mxu0 %v4169_v13  ;;  %v524_v0 = vld [vmem:[%s4379_s24 + $0xc8] sm:$0xff] }
  0x46   : > { %1889 = vmatprep.subr.bf16.mxu1 %v4138_v1  ;;  %1706 = vmatprep.subr.bf16.mxu0 %v4177_v15  ;;  %v4208_v1 = vld [vmem:[%s5485_s3 + $0x190] ss:$8 sps:$4 sm:$0xff]   ;;  %v543_v4 = vpack.c.bf16 %v524_v0, %v523_v63 }
  0x47   : > { %3589 = vmatmul.mubr.msk.bf16.gmra.mxu0 %vm665_vm0, %v4547_v5  ;;  %3602 = vmatmul.mubr.msk.bf16.gmra.mxu1 %vm665_vm0, %v4455_v38  ;;  %v4183_v38 = vld [vmem:[%s5485_s3 + $0x1d4] ss:$8 sps:$4 sm:$0xff]  }
  0x48   : > { %806 = vmatprep.mubr.bf16.mxu0 %v4260_v3  ;;  %969 = vmatprep.mubr.bf16.mxu1 %v4260_v3 }
  0x49   : > { %1890 = vmatpush1.bf16.msra.mxu1 %v4136_v6  ;;  %1707 = vmatpush2.bf16.msra.mxu0 %v4175_v19  ;;  %v4213_v6 = vld [vmem:[%s5485_s3 + $0x184] ss:$8 sps:$4 sm:$0xff]  }
  0x4a   : > { %1891 = vmatprep.subr.bf16.mxu1 %v4144_v8  ;;  %1708 = vmatprep.subr.bf16.mxu0 %v4180_v21  ;;  %v4742_v8 = vshrl.u32 %v565_v7, 7 }
  0x4d   : > { %1892 = vmatpush1.bf16.msra.mxu1 %v4142_v12  ;;  %1709 = vmatpush2.bf16.msra.mxu0 %v4178_v25 }
  0x4e   : > { %1893 = vmatprep.subr.bf16.mxu1 %v4153_v14  ;;  %1710 = vmatprep.subr.bf16.mxu0 %v4186_v28 }
  0x4f   : > { %3590 = vmatmul.mubr.msk.bf16.gmra.mxu0 %vm665_vm0, %v4581_v17  ;;  %3603 = vmatmul.mubr.msk.bf16.gmra.mxu1 %vm665_vm0, %v4479_v46  ;;  %v4193_v46 = vld [vmem:[%s5485_s3 + $0xa0] ss:$8 sps:$4 sm:$0xff]  }
  0x50   : > { %816 = vmatprep.mubr.bf16.mxu0 %v4260_v3  ;;  %979 = vmatprep.mubr.bf16.mxu1 %v4260_v3 }
  0x51   : > { %1894 = vmatpush1.bf16.msra.mxu1 %v4151_v18  ;;  %1711 = vmatpush2.bf16.msra.mxu0 %v4184_v31 }
  0x52   : > { %1895 = vmatprep.subr.bf16.mxu1 %v4159_v20  ;;  %1712 = vmatprep.subr.bf16.mxu0 %v4189_v33 }
  0x55   : > { %1896 = vmatpush1.bf16.msra.mxu1 %v4157_v24  ;;  %1713 = vmatpush2.bf16.msra.mxu0 %v4187_v37 }
  0x56   : > { %1897 = vmatprep.subr.bf16.mxu1 %v4165_v27  ;;  %1714 = vmatprep.subr.bf16.mxu0 %v4195_v43 }
  0x57   : > { %3591 = vmatmul.mubr.msk.bf16.gmra.mxu0 %vm665_vm0, %v4615_v29  ;;  %3604 = vmatmul.mubr.msk.bf16.gmra.mxu1 %vm665_vm0, %v4513_v57  ;;  %v541_v57 = vpack.c.bf16 %v520_v52, %v519_v51 }
  0x58   : > { %826 = vmatprep.mubr.bf16.mxu0 %v4260_v3  ;;  %989 = vmatprep.mubr.bf16.mxu1 %v4260_v3 }
  0x59   : > { %1898 = vmatpush2.bf16.msra.mxu1 %v4163_v30  ;;  %1715 = vmatpush2.bf16.msra.mxu0 %v4193_v46 }
  0x5a   : > { %1899 = vmatprep.subr.bf16.mxu1 %v4174_v32  ;;  %1716 = vmatprep.subr.bf16.mxu0 %v4198_v49 }
  0x5d   : > { %1900 = vmatpush2.bf16.msra.mxu1 %v4172_v36  ;;  %1717 = vmatpush2.bf16.msra.mxu0 %v4196_v50 }
  0x5e   : > { %1901 = vmatprep.subr.bf16.mxu1 %v4183_v38  ;;  %1718 = vmatprep.subr.bf16.mxu0 %v4204_v55 }
  0x5f   : > { %3592 = vmatmul.mubr.msk.bf16.gmra.mxu0 %vm665_vm0, %v539_v40  ;;  %3605 = vmatmul.mubr.msk.bf16.gmra.mxu1 %vm665_vm0, %v4547_v5  ;;  %v4211_v5 = vld [vmem:[%s5485_s3 + $0x180] ss:$8 sps:$4 sm:$0xff]  }
  0x60   : > { %836 = vmatprep.mubr.bf16.mxu0 %v4260_v3  ;;  %999 = vmatprep.mubr.bf16.mxu1 %v4260_v3 }
  0x61   : > { %1902 = vmatpush2.bf16.msra.mxu1 %v4181_v41  ;;  %1719 = vmatpush2.bf16.msra.mxu0 %v4202_v56 }
  0x62   : > { %1903 = vmatprep.subr.bf16.mxu1 %v4192_v42  ;;  %3751 = vmatprep.subr.bf16.mxu0 %v4214_v9 }
  0x65   : > { %1904 = vmatpush2.bf16.msra.mxu1 %v4190_v47  ;;  %v4216_v47 = vld [vmem:[%s5487_s5 + $0x70] sm:$0xff]  }
  0x66   : > { %1905 = vmatprep.subr.bf16.mxu1 %v4201_v54 }
  0x67   : > { %3593 = vmatmul.mubr.msk.bf16.gmra.mxu0 %vm665_vm0, %v540_v48  ;;  %3606 = vmatmul.mubr.msk.bf16.gmra.mxu1 %vm665_vm0, %v4581_v17 }
  0x68   : > { %846 = vmatprep.mubr.bf16.mxu0 %v4260_v3  ;;  %1009 = vmatprep.mubr.bf16.mxu1 %v4260_v3 }
  0x69   : > { %1906 = vmatpush2.bf16.msra.mxu1 %v4199_v53 }
  0x6a   : > { %1907 = vmatprep.subr.bf16.mxu1 %v4207_v61 }
  0x6d   : > { %1908 = vmatpush2.bf16.msra.mxu1 %v4205_v60 }
  0x6e   : > { %1909 = vmatprep.subr.bf16.mxu1 %v4210_v2 }
  0x6f   : > { %3594 = vmatmul.mubr.msk.bf16.gmra.mxu0 %vm665_vm0, %v541_v57  ;;  %3607 = vmatmul.mubr.msk.bf16.gmra.mxu1 %vm665_vm0, %v4615_v29 }
  0x70   : > { %856 = vmatprep.mubr.bf16.mxu0 %v4260_v3  ;;  %1019 = vmatprep.mubr.bf16.mxu1 %v4260_v3 }
  0x71   : > { %1910 = vmatpush2.bf16.msra.mxu1 %v4208_v1 }
  0x72   : > { %1911 = vmatprep.subr.bf16.mxu1 %v4213_v6 }
  0x75   : > { %1912 = vmatpush2.bf16.msra.mxu1 %v4211_v5 }
  0x77   : > { %3595 = vmatmul.mubr.msk.bf16.gmra.mxu0 %vm665_vm0, %v542_v62  ;;  %3608 = vmatmul.mubr.msk.bf16.gmra.mxu1 %vm665_vm0, %v539_v40 }
  0x78   : > { %866 = vmatprep.mubr.bf16.mxu0 %v4260_v3  ;;  %1029 = vmatprep.mubr.bf16.mxu1 %v4260_v3 }
  0x7f   : > { %3596 = vmatmul.mubr.msk.bf16.gmra.mxu0 %vm665_vm0, %v543_v4  ;;  %3609 = vmatmul.mubr.msk.bf16.gmra.mxu1 %vm665_vm0, %v540_v48 }
  0x80   : > { %1039 = vmatprep.mubr.bf16.mxu1 %v4260_v3 }
  0x87   : > { %3610 = vmatmul.mubr.msk.bf16.gmra.mxu1 %vm665_vm0, %v541_v57 }
  0x88   : > { %1049 = vmatprep.mubr.bf16.mxu1 %v4260_v3 }
  0x8f   : > { %3611 = vmatmul.mubr.msk.bf16.gmra.mxu1 %vm665_vm0, %v542_v62 }
  0x90   : > { %1059 = vmatprep.mubr.bf16.mxu1 %v4260_v3 }
  0x97   : > { %3612 = vmatmul.mubr.msk.bf16.gmra.mxu1 %vm665_vm0, %v543_v4 }
  0x98   : > { %1069 = vmatprep.mubr.bf16.mxu1 %v4260_v3 }
  0x9f   : > { %3613 = vmatmul.mubr.msk.bf16.gmra.mxu1 %vm665_vm0, %v4396_v16  ;;  %v4748_v16 = vsub.s32 0, %v4742_v8 }
  0xa0   : > { %1079 = vmatprep.mubr.bf16.mxu1 %v4260_v3 }
  0xa7   : > { %3614 = vmatmul.mubr.msk.bf16.gmra.mxu1 %vm665_vm0, %v4422_v26  ;;  %v4753_v26 = vld [vmem:[%s5484_s2] sm:$0xf] }
  0xa8   : > { %1089 = vmatprep.mubr.bf16.mxu1 %v4260_v3  ;;  %v571_v3 = vsub.s32 1, %v4742_v8 }
  0xaa   : > { %v4763_v12 = vrot.slane %v4753_v26, %v571_v3 }
  0xaf   : > { %3615 = vmatmul.mubr.msk.bf16.gmra.mxu1 %vm665_vm0, %v4457_v39  ;;  %v4758_v39 = vrot.slane %v4753_v26, %v4748_v16 }
  0xdf   : > { %v748_v10 = vpop.f32.mrf.mxu0  ;;  %v878_v11 = vpop.f32.mrf.mxu1 }
  0xe0   : > { %v749_v13 = vadd.f32 %v748_v10, %v4758_v39  ;;  %v879_v14 = vadd.f32 %v878_v11, %v4758_v39 }
  0xe1   : > { %v750_v15 = vpop.f32.mrf.mxu0  ;;  %v4767_v17 = vpop.f32.mrf.mxu1 }
  0xe2   : > { %v751_v18 = vadd.f32 %v750_v15, %v4763_v12  ;;  %v1100_v23 = vmax.f32 %v749_v13, 0.0  ;;  %v1204_v24 = vmax.f32 %v879_v14, 0.0  ;;  %v579_v14 = vsub.s32 3, %v4742_v8 }
  0xe3   : > { %v752_v19 = vpop.f32.mrf.mxu0  ;;  %v882_v20 = vpop.f32.mrf.mxu1 }
  0xe4   : > { %v753_v21 = vadd.f32 %v752_v19, %v4758_v39  ;;  %v883_v22 = vadd.f32 %v882_v20, %v4758_v39  ;;  %v1101_v28 = vmax.f32 %v751_v18, 0.0 }
  0xe5   : > { %v754_v25 = vpop.f32.mrf.mxu0  ;;  %v4772_v27 = vpop.f32.mrf.mxu1 }
  0xe6   : > { %v1104_v29 = vmax.f32 %v753_v21, 0.0  ;;  %v1208_v30 = vmax.f32 %v883_v22, 0.0  ;;  %v755_v31 = vadd.f32 %v754_v25, %v4763_v12  ;;  %v575_v21 = vsub.s32 2, %v4742_v8 }
  0xe7   : > { %v758_v32 = vpop.f32.mrf.mxu0  ;;  %v888_v33 = vpop.f32.mrf.mxu1 }
  0xe8   : > { %v4775_v34 = vpack.c.bf16 %v1208_v30, %v1204_v24  ;;  %v1105_v35 = vmax.f32 %v755_v31, 0.0  ;;  %v1228_v36 = vpack.c.bf16 %v1104_v29, %v1100_v23  ;;  %v759_v37 = vadd.f32 %v758_v32, %v4758_v39 }
  0xe9   : > { %v889_v38 = vadd.f32 %v888_v33, %v4758_v39  ;;  %v760_v40 = vpop.f32.mrf.mxu0  ;;  %v4779_v41 = vpop.f32.mrf.mxu1  ;;  %v4813_v32 = vrot.slane %v4753_v26, %v579_v14  ;;  %v4218_v33 = vld [vmem:[%s5487_s5 + $0x68] sm:$0xff]  }
  0xea   : > { %v761_v42 = vadd.f32 %v760_v40, %v4763_v12  ;;  %v1229_v43 = vpack.c.bf16 %v1105_v35, %v1101_v28  ;;  %v1108_v50 = vmax.f32 %v759_v37, 0.0  ;;  %v4219_v35 = vld [vmem:[%s5487_s5 + $0x28] sm:$0xff]  }
  0xeb   : > { %v762_v45 = vpop.f32.mrf.mxu0  ;;  %v892_v46 = vpop.f32.mrf.mxu1  ;;  %v1212_v51 = vmax.f32 %v889_v38, 0.0  ;;  %v4823_v38 = vrot.slane %v4753_v26, %v575_v21 }
  0xec   : > { %v763_v48 = vadd.f32 %v762_v45, %v4758_v39  ;;  %v893_v49 = vadd.f32 %v892_v46, %v4758_v39  ;;  %1720 = vmatprep.mubr.bf16.mxu0 %v1229_v43  ;;  %v1109_v54 = vmax.f32 %v761_v42, 0.0 }
  0xed   : > { %v764_v52 = vpop.f32.mrf.mxu0  ;;  %v4790_v53 = vpop.f32.mrf.mxu1  ;;  %1721 = vmatmul.mubr.bf16.vlgmr.msra.gmra.mxu0 %v1228_v36 }
  0xee   : > { %v1112_v55 = vmax.f32 %v763_v48, 0.0  ;;  %v1216_v56 = vmax.f32 %v893_v49, 0.0  ;;  %v765_v57 = vadd.f32 %v764_v52, %v4763_v12  ;;  %3752 = vmatpush3.bf16.msra.mxu0 %v4215_v44 }
  0xef   : > { %v768_v59 = vpop.f32.mrf.mxu0  ;;  %v898_v60 = vpop.f32.mrf.mxu1  ;;  %3753 = vmatprep.subr.bf16.mxu0 %v4216_v47 }
  0xf0   : > { %v4796_v61 = vpack.c.bf16 %v1216_v56, %v1212_v51  ;;  %v1113_v62 = vmax.f32 %v765_v57, 0.0  ;;  %v1232_v63 = vpack.c.bf16 %v1112_v55, %v1108_v50  ;;  %v769_v0 = vadd.f32 %v768_v59, %v4758_v39  ;;  %v4221_v55 = vld [vmem:[%s5487_s5 + $0x20] sm:$0xff]   ;;  %v4222_v56 = vld [vmem:[%s5487_s5 + $0x58] sm:$0xff]  }
  0xf1   : > { %v899_v1 = vadd.f32 %v898_v60, %v4758_v39  ;;  %v770_v2 = vpop.f32.mrf.mxu0  ;;  %v4800_v4 = vpop.f32.mrf.mxu1 }
  0xf2   : > { %v771_v5 = vadd.f32 %v770_v2, %v4763_v12  ;;  %v1233_v6 = vpack.c.bf16 %v1113_v62, %v1109_v54  ;;  %3754 = vmatpush3.bf16.msra.mxu0 %v4217_v58  ;;  %v1116_v15 = vmax.f32 %v769_v0, 0.0  ;;  %v4220_v54 = vld [vmem:[%s5487_s5 + $0x60] sm:$0xff]  }
  0xf3   : > { %v772_v9 = vpop.f32.mrf.mxu0  ;;  %v902_v10 = vpop.f32.mrf.mxu1  ;;  %v1220_v18 = vmax.f32 %v899_v1, 0.0  ;;  %3755 = vmatprep.subr.bf16.mxu0 %v4218_v33 }
  0xf4   : > { %v773_v11 = vadd.f32 %v772_v9, %v4758_v39  ;;  %v903_v13 = vadd.f32 %v902_v10, %v4758_v39  ;;  %1730 = vmatprep.mubr.bf16.mxu0 %v1233_v6  ;;  %v1117_v22 = vmax.f32 %v771_v5, 0.0 }
  0xf5   : > { %v774_v19 = vpop.f32.mrf.mxu0  ;;  %v4806_v20 = vpop.f32.mrf.mxu1  ;;  %1731 = vmatmul.mubr.bf16.gmra.mxu0 %v1232_v63 }
  0xf6   : > { %v1120_v23 = vmax.f32 %v773_v11, 0.0  ;;  %v1224_v24 = vmax.f32 %v903_v13, 0.0  ;;  %v775_v25 = vadd.f32 %v774_v19, %v4763_v12  ;;  %3756 = vmatpush3.bf16.msra.mxu0 %v4219_v35  ;;  %v4223_v19 = vld [vmem:[%s5487_s5 + $0x18] sm:$0xff]  }
  0xf7   : > { %v778_v28 = vpop.f32.mrf.mxu0  ;;  %v941_v29 = vpop.f32.mrf.mxu1  ;;  %3757 = vmatprep.subr.bf16.mxu0 %v4220_v54 }
  0xf8   : > { %v4810_v30 = vpack.c.bf16 %v1224_v24, %v1220_v18  ;;  %v1121_v31 = vmax.f32 %v775_v25, 0.0  ;;  %v1236_v36 = vpack.c.bf16 %v1120_v23, %v1116_v15  ;;  %v779_v37 = vadd.f32 %v778_v28, %v4758_v39  ;;  %v4224_v24 = vld [vmem:[%s5487_s5 + $0x50] sm:$0xff]  }
  0xf9   : > { %v780_v40 = vpop.f32.mrf.mxu0  ;;  %v943_v42 = vpop.f32.mrf.mxu1  ;;  %v942_v26 = vadd.f32 %v941_v29, %v4823_v38 }
  0xfa   : > { %v781_v43 = vadd.f32 %v780_v40, %v4763_v12  ;;  %v1237_v44 = vpack.c.bf16 %v1121_v31, %v1117_v22  ;;  %v944_v47 = vadd.f32 %v943_v42, %v4813_v32  ;;  %v1124_v50 = vmax.f32 %v779_v37, 0.0  ;;  %3758 = vmatpush3.bf16.msra.mxu0 %v4221_v55 }
  0xfb   : > { %v782_v45 = vpop.f32.mrf.mxu0  ;;  %v945_v46 = vpop.f32.mrf.mxu1  ;;  %v1102_v6 = vmax.f32 %v942_v26, 0.0  ;;  %3759 = vmatprep.subr.bf16.mxu0 %v4222_v56 }
  0xfc   : > { %v783_v48 = vadd.f32 %v782_v45, %v4758_v39  ;;  %v946_v49 = vadd.f32 %v945_v46, %v4823_v38  ;;  %1740 = vmatprep.mubr.bf16.mxu0 %v1237_v44  ;;  %v1125_v57 = vmax.f32 %v781_v43, 0.0  ;;  %v1103_v1 = vmax.f32 %v944_v47, 0.0  ;;  %v4225_v44 = vld [vmem:[%s5487_s5 + $0x10] sm:$0xff]  }
  0xfd   : > { %v784_v51 = vpop.f32.mrf.mxu0  ;;  %v947_v52 = vpop.f32.mrf.mxu1  ;;  %1741 = vmatmul.mubr.bf16.gmra.mxu0 %v1236_v36 }
  0xfe   : > { %v1128_v58 = vmax.f32 %v783_v48, 0.0  ;;  %v785_v59 = vadd.f32 %v784_v51, %v4763_v12  ;;  %v948_v60 = vadd.f32 %v947_v52, %v4813_v32  ;;  %v1106_v62 = vmax.f32 %v946_v49, 0.0  ;;  %3760 = vmatpush3.bf16.msra.mxu0 %v4223_v19 }
  0xff   : > { %v788_v63 = vpop.f32.mrf.mxu0  ;;  %v951_v0 = vpop.f32.mrf.mxu1  ;;  %3761 = vmatprep.subr.bf16.mxu0 %v4224_v24 }
 0x100   : > { %v1129_v2 = vmax.f32 %v785_v59, 0.0  ;;  %v1107_v5 = vmax.f32 %v948_v60, 0.0  ;;  %v1240_v9 = vpack.c.bf16 %v1128_v58, %v1124_v50  ;;  %v789_v10 = vadd.f32 %v788_v63, %v4758_v39 }
 0x101   : > { %v790_v11 = vpop.f32.mrf.mxu0  ;;  %v953_v13 = vpop.f32.mrf.mxu1  ;;  %v1230_v21 = vpack.c.bf16 %v1106_v62, %v1102_v6  ;;  %v952_v33 = vadd.f32 %v951_v0, %v4823_v38 }
 0x102   : > { %v791_v14 = vadd.f32 %v790_v11, %v4763_v12  ;;  %v1241_v15 = vpack.c.bf16 %v1129_v2, %v1125_v57  ;;  %v1231_v18 = vpack.c.bf16 %v1107_v5, %v1103_v1  ;;  %v954_v25 = vadd.f32 %v953_v13, %v4813_v32  ;;  %3762 = vmatpush3.bf16.msra.mxu0 %v4225_v44 }
 0x103   : > { %v792_v22 = vpop.f32.mrf.mxu0  ;;  %v955_v23 = vpop.f32.mrf.mxu1  ;;  %v1132_v31 = vmax.f32 %v789_v10, 0.0  ;;  %v1110_v26 = vmax.f32 %v952_v33, 0.0 }
 0x104   : > { %v793_v28 = vadd.f32 %v792_v22, %v4758_v39  ;;  %v956_v29 = vadd.f32 %v955_v23, %v4823_v38  ;;  %1750 = vmatprep.mubr.bf16.mxu0 %v1241_v15  ;;  %1913 = vmatprep.mubr.bf16.mxu1 %v1231_v18  ;;  %v1133_v37 = vmax.f32 %v791_v14, 0.0  ;;  %v1111_v48 = vmax.f32 %v954_v25, 0.0 }
 0x105   : > { %v794_v35 = vpop.f32.mrf.mxu0  ;;  %v957_v36 = vpop.f32.mrf.mxu1  ;;  %1751 = vmatmul.mubr.bf16.gmra.mxu0 %v1240_v9  ;;  %1914 = vmatmul.mubr.bf16.vlgmr.msra.gmra.mxu1 %v1230_v21 }
 0x106   : > { %v1136_v40 = vmax.f32 %v793_v28, 0.0  ;;  %v795_v42 = vadd.f32 %v794_v35, %v4763_v12  ;;  %v958_v43 = vadd.f32 %v957_v36, %v4813_v32  ;;  %v1114_v45 = vmax.f32 %v956_v29, 0.0 }
 0x107   : > { %v798_v46 = vpop.f32.mrf.mxu0  ;;  %v961_v47 = vpop.f32.mrf.mxu1 }
 0x108   : > { %v1137_v49 = vmax.f32 %v795_v42, 0.0  ;;  %v1115_v50 = vmax.f32 %v958_v43, 0.0  ;;  %v1244_v51 = vpack.c.bf16 %v1136_v40, %v1132_v31  ;;  %v799_v52 = vadd.f32 %v798_v46, %v4758_v39 }
 0x109   : > { %v800_v54 = vpop.f32.mrf.mxu0  ;;  %v963_v55 = vpop.f32.mrf.mxu1  ;;  %v1234_v59 = vpack.c.bf16 %v1114_v45, %v1110_v26  ;;  %v962_v5 = vadd.f32 %v961_v47, %v4823_v38 }
 0x10a   : > { %v801_v56 = vadd.f32 %v800_v54, %v4763_v12  ;;  %v1245_v57 = vpack.c.bf16 %v1137_v49, %v1133_v37  ;;  %v1235_v58 = vpack.c.bf16 %v1115_v50, %v1111_v48  ;;  %v964_v63 = vadd.f32 %v963_v55, %v4813_v32 }
 0x10b   : > { %v802_v60 = vpop.f32.mrf.mxu0  ;;  %v965_v62 = vpop.f32.mrf.mxu1  ;;  %v1140_v2 = vmax.f32 %v799_v52, 0.0  ;;  %v1118_v24 = vmax.f32 %v962_v5, 0.0 }
 0x10c   : > { %v803_v0 = vadd.f32 %v802_v60, %v4758_v39  ;;  %v966_v1 = vadd.f32 %v965_v62, %v4823_v38  ;;  %1760 = vmatprep.mubr.bf16.mxu0 %v1245_v57  ;;  %1923 = vmatprep.mubr.bf16.mxu1 %v1235_v58  ;;  %v1141_v10 = vmax.f32 %v801_v56, 0.0  ;;  %v1119_v21 = vmax.f32 %v964_v63, 0.0 }
 0x10d   : > { %v804_v6 = vpop.f32.mrf.mxu0  ;;  %v967_v9 = vpop.f32.mrf.mxu1  ;;  %1761 = vmatmul.mubr.bf16.gmra.mxu0 %v1244_v51  ;;  %1924 = vmatmul.mubr.bf16.gmra.mxu1 %v1234_v59 }
 0x10e   : > { %v1144_v11 = vmax.f32 %v803_v0, 0.0  ;;  %v805_v13 = vadd.f32 %v804_v6, %v4763_v12  ;;  %v968_v14 = vadd.f32 %v967_v9, %v4813_v32  ;;  %v1122_v15 = vmax.f32 %v966_v1, 0.0 }
 0x10f   : > { %v808_v18 = vpop.f32.mrf.mxu0  ;;  %v971_v19 = vpop.f32.mrf.mxu1 }
 0x110   : > { %v1145_v22 = vmax.f32 %v805_v13, 0.0  ;;  %v1123_v23 = vmax.f32 %v968_v14, 0.0  ;;  %v1248_v25 = vpack.c.bf16 %v1144_v11, %v1140_v2  ;;  %v809_v28 = vadd.f32 %v808_v18, %v4758_v39 }
 0x111   : > { %v810_v29 = vpop.f32.mrf.mxu0  ;;  %v973_v31 = vpop.f32.mrf.mxu1  ;;  %v1238_v37 = vpack.c.bf16 %v1122_v15, %v1118_v24  ;;  %v972_v47 = vadd.f32 %v971_v19, %v4823_v38 }
 0x112   : > { %v811_v33 = vadd.f32 %v810_v29, %v4763_v12  ;;  %v1249_v35 = vpack.c.bf16 %v1145_v22, %v1141_v10  ;;  %v1239_v36 = vpack.c.bf16 %v1123_v23, %v1119_v21  ;;  %v974_v43 = vadd.f32 %v973_v31, %v4813_v32 }
 0x113   : > { %v812_v40 = vpop.f32.mrf.mxu0  ;;  %v975_v42 = vpop.f32.mrf.mxu1  ;;  %v1148_v46 = vmax.f32 %v809_v28, 0.0  ;;  %v1126_v60 = vmax.f32 %v972_v47, 0.0 }
 0x114   : > { %v813_v44 = vadd.f32 %v812_v40, %v4758_v39  ;;  %v976_v45 = vadd.f32 %v975_v42, %v4823_v38  ;;  %1770 = vmatprep.mubr.bf16.mxu0 %v1249_v35  ;;  %1933 = vmatprep.mubr.bf16.mxu1 %v1239_v36  ;;  %v1149_v50 = vmax.f32 %v811_v33, 0.0  ;;  %v1127_v57 = vmax.f32 %v974_v43, 0.0 }
 0x115   : > { %v814_v48 = vpop.f32.mrf.mxu0  ;;  %v977_v49 = vpop.f32.mrf.mxu1  ;;  %1771 = vmatmul.mubr.bf16.gmra.mxu0 %v1248_v25  ;;  %1934 = vmatmul.mubr.bf16.gmra.mxu1 %v1238_v37 }
 0x116   : > { %v1152_v26 = vmax.f32 %v813_v44, 0.0  ;;  %v815_v51 = vadd.f32 %v814_v48, %v4763_v12  ;;  %v978_v52 = vadd.f32 %v977_v49, %v4813_v32  ;;  %v1130_v54 = vmax.f32 %v976_v45, 0.0 }
 0x117   : > { %v818_v55 = vpop.f32.mrf.mxu0  ;;  %v981_v56 = vpop.f32.mrf.mxu1 }
 0x118   : > { %v1153_v58 = vmax.f32 %v815_v51, 0.0  ;;  %v1131_v59 = vmax.f32 %v978_v52, 0.0  ;;  %v1252_v62 = vpack.c.bf16 %v1152_v26, %v1148_v46  ;;  %v819_v63 = vadd.f32 %v818_v55, %v4758_v39 }
 0x119   : > { %v820_v0 = vpop.f32.mrf.mxu0  ;;  %v983_v1 = vpop.f32.mrf.mxu1  ;;  %v1242_v9 = vpack.c.bf16 %v1130_v54, %v1126_v60  ;;  %v982_v19 = vadd.f32 %v981_v56, %v4823_v38 }
 0x11a   : > { %v821_v2 = vadd.f32 %v820_v0, %v4763_v12  ;;  %v1253_v5 = vpack.c.bf16 %v1153_v58, %v1149_v50  ;;  %v1243_v6 = vpack.c.bf16 %v1131_v59, %v1127_v57  ;;  %v984_v13 = vadd.f32 %v983_v1, %v4813_v32 }
 0x11b   : > { %v822_v10 = vpop.f32.mrf.mxu0  ;;  %v985_v11 = vpop.f32.mrf.mxu1  ;;  %v1156_v18 = vmax.f32 %v819_v63, 0.0  ;;  %v1134_v40 = vmax.f32 %v982_v19, 0.0 }
 0x11c   : > { %v823_v14 = vadd.f32 %v822_v10, %v4758_v39  ;;  %v986_v15 = vadd.f32 %v985_v11, %v4823_v38  ;;  %1780 = vmatprep.mubr.bf16.mxu0 %v1253_v5  ;;  %1943 = vmatprep.mubr.bf16.mxu1 %v1243_v6  ;;  %v1157_v23 = vmax.f32 %v821_v2, 0.0  ;;  %v1135_v35 = vmax.f32 %v984_v13, 0.0 }
 0x11d   : > { %v824_v21 = vpop.f32.mrf.mxu0  ;;  %v987_v22 = vpop.f32.mrf.mxu1  ;;  %1781 = vmatmul.mubr.bf16.gmra.mxu0 %v1252_v62  ;;  %1944 = vmatmul.mubr.bf16.gmra.mxu1 %v1242_v9 }
 0x11e   : > { %v1160_v24 = vmax.f32 %v823_v14, 0.0  ;;  %v825_v25 = vadd.f32 %v824_v21, %v4763_v12  ;;  %v988_v28 = vadd.f32 %v987_v22, %v4813_v32  ;;  %v1138_v29 = vmax.f32 %v986_v15, 0.0 }
 0x11f   : > { %v828_v31 = vpop.f32.mrf.mxu0  ;;  %v991_v33 = vpop.f32.mrf.mxu1 }
 0x120   : > { %v1161_v36 = vmax.f32 %v825_v25, 0.0  ;;  %v1139_v37 = vmax.f32 %v988_v28, 0.0  ;;  %v1256_v42 = vpack.c.bf16 %v1160_v24, %v1156_v18  ;;  %v829_v43 = vadd.f32 %v828_v31, %v4758_v39 }
 0x121   : > { %v830_v44 = vpop.f32.mrf.mxu0  ;;  %v993_v45 = vpop.f32.mrf.mxu1  ;;  %v1246_v49 = vpack.c.bf16 %v1138_v29, %v1134_v40  ;;  %v992_v56 = vadd.f32 %v991_v33, %v4823_v38 }
 0x122   : > { %v831_v46 = vadd.f32 %v830_v44, %v4763_v12  ;;  %v1257_v47 = vpack.c.bf16 %v1161_v36, %v1157_v23  ;;  %v1247_v48 = vpack.c.bf16 %v1139_v37, %v1135_v35  ;;  %v994_v51 = vadd.f32 %v993_v45, %v4813_v32 }
 0x123   : > { %v832_v50 = vpop.f32.mrf.mxu0  ;;  %v995_v26 = vpop.f32.mrf.mxu1  ;;  %v1164_v55 = vmax.f32 %v829_v43, 0.0  ;;  %v1142_v10 = vmax.f32 %v992_v56, 0.0 }
 0x124   : > { %v833_v52 = vadd.f32 %v832_v50, %v4758_v39  ;;  %v996_v54 = vadd.f32 %v995_v26, %v4823_v38  ;;  %1790 = vmatprep.mubr.bf16.mxu0 %v1257_v47  ;;  %1953 = vmatprep.mubr.bf16.mxu1 %v1247_v48  ;;  %v1165_v59 = vmax.f32 %v831_v46, 0.0  ;;  %v1143_v5 = vmax.f32 %v994_v51, 0.0 }
 0x125   : > { %v834_v57 = vpop.f32.mrf.mxu0  ;;  %v997_v58 = vpop.f32.mrf.mxu1  ;;  %1791 = vmatmul.mubr.bf16.gmra.mxu0 %v1256_v42  ;;  %1954 = vmatmul.mubr.bf16.gmra.mxu1 %v1246_v49 }
 0x126   : > { %v1168_v60 = vmax.f32 %v833_v52, 0.0  ;;  %v835_v62 = vadd.f32 %v834_v57, %v4763_v12  ;;  %v998_v63 = vadd.f32 %v997_v58, %v4813_v32  ;;  %v1146_v0 = vmax.f32 %v996_v54, 0.0 }
 0x127   : > { %v838_v1 = vpop.f32.mrf.mxu0  ;;  %v1001_v2 = vpop.f32.mrf.mxu1 }
 0x128   : > { %v1169_v6 = vmax.f32 %v835_v62, 0.0  ;;  %v1147_v9 = vmax.f32 %v998_v63, 0.0  ;;  %v1260_v11 = vpack.c.bf16 %v1168_v60, %v1164_v55  ;;  %v839_v13 = vadd.f32 %v838_v1, %v4758_v39  ;;  %v4226_v1 = vld [vmem:[%s5487_s5 + $0x48] sm:$0xff]  }
 0x129   : > { %v840_v14 = vpop.f32.mrf.mxu0  ;;  %v1003_v15 = vpop.f32.mrf.mxu1  ;;  %v1250_v22 = vpack.c.bf16 %v1146_v0, %v1142_v10  ;;  %v1002_v33 = vadd.f32 %v1001_v2, %v4823_v38  ;;  %v4227_v2 = vld [vmem:[%s5487_s5 + $0x8] sm:$0xff]   ;;  %3763 = vmatprep.subr.bf16.mxu0 %v4226_v1 }
 0x12a   : > { %v841_v18 = vadd.f32 %v840_v14, %v4763_v12  ;;  %v1261_v19 = vpack.c.bf16 %v1169_v6, %v1165_v59  ;;  %v1251_v21 = vpack.c.bf16 %v1147_v9, %v1143_v5  ;;  %v1004_v25 = vadd.f32 %v1003_v15, %v4813_v32  ;;  %3764 = vmatpush3.bf16.msra.mxu0 %v4227_v2 }
 0x12b   : > { %v842_v23 = vpop.f32.mrf.mxu0  ;;  %v1005_v24 = vpop.f32.mrf.mxu1  ;;  %v1172_v31 = vmax.f32 %v839_v13, 0.0  ;;  %v1150_v50 = vmax.f32 %v1002_v33, 0.0 }
 0x12c   : > { %v843_v28 = vadd.f32 %v842_v23, %v4758_v39  ;;  %v1006_v29 = vadd.f32 %v1005_v24, %v4823_v38  ;;  %1800 = vmatprep.mubr.bf16.mxu0 %v1261_v19  ;;  %1963 = vmatprep.mubr.bf16.mxu1 %v1251_v21  ;;  %v1173_v37 = vmax.f32 %v841_v18, 0.0  ;;  %v1151_v47 = vmax.f32 %v1004_v25, 0.0 }
 0x12d   : > { %v844_v35 = vpop.f32.mrf.mxu0  ;;  %v1007_v36 = vpop.f32.mrf.mxu1  ;;  %1801 = vmatmul.mubr.bf16.gmra.mxu0 %v1260_v11  ;;  %1964 = vmatmul.mubr.bf16.gmra.mxu1 %v1250_v22 }
 0x12e   : > { %v1176_v40 = vmax.f32 %v843_v28, 0.0  ;;  %v845_v42 = vadd.f32 %v844_v35, %v4763_v12  ;;  %v1008_v43 = vadd.f32 %v1007_v36, %v4813_v32  ;;  %v1154_v44 = vmax.f32 %v1006_v29, 0.0 }
 0x12f   : > { %v848_v45 = vpop.f32.mrf.mxu0  ;;  %v1011_v46 = vpop.f32.mrf.mxu1 }
 0x130   : > { %v1177_v48 = vmax.f32 %v845_v42, 0.0  ;;  %v1155_v49 = vmax.f32 %v1008_v43, 0.0  ;;  %v1264_v26 = vpack.c.bf16 %v1176_v40, %v1172_v31  ;;  %v849_v51 = vadd.f32 %v848_v45, %v4758_v39 }
 0x131   : > { %v850_v52 = vpop.f32.mrf.mxu0  ;;  %v1013_v54 = vpop.f32.mrf.mxu1  ;;  %v1254_v58 = vpack.c.bf16 %v1154_v44, %v1150_v50  ;;  %v1012_v6 = vadd.f32 %v1011_v46, %v4823_v38 }
 0x132   : > { %v851_v55 = vadd.f32 %v850_v52, %v4763_v12  ;;  %v1265_v56 = vpack.c.bf16 %v1177_v48, %v1173_v37  ;;  %v1255_v57 = vpack.c.bf16 %v1155_v49, %v1151_v47  ;;  %v1014_v62 = vadd.f32 %v1013_v54, %v4813_v32 }
 0x133   : > { %v852_v59 = vpop.f32.mrf.mxu0  ;;  %v1015_v60 = vpop.f32.mrf.mxu1  ;;  %v1180_v5 = vmax.f32 %v849_v51, 0.0  ;;  %v1158_v25 = vmax.f32 %v1012_v6, 0.0 }
 0x134   : > { %v853_v63 = vadd.f32 %v852_v59, %v4758_v39  ;;  %v1016_v0 = vadd.f32 %v1015_v60, %v4823_v38  ;;  %1810 = vmatprep.mubr.bf16.mxu0 %v1265_v56  ;;  %1973 = vmatprep.mubr.bf16.mxu1 %v1255_v57  ;;  %v1181_v11 = vmax.f32 %v851_v55, 0.0  ;;  %v1159_v22 = vmax.f32 %v1014_v62, 0.0 }
 0x135   : > { %v854_v9 = vpop.f32.mrf.mxu0  ;;  %v1017_v10 = vpop.f32.mrf.mxu1  ;;  %1811 = vmatmul.mubr.bf16.gmra.mxu0 %v1264_v26  ;;  %1974 = vmatmul.mubr.bf16.gmra.mxu1 %v1254_v58 }
 0x136   : > { %v1184_v13 = vmax.f32 %v853_v63, 0.0  ;;  %v855_v14 = vadd.f32 %v854_v9, %v4763_v12  ;;  %v1018_v15 = vadd.f32 %v1017_v10, %v4813_v32  ;;  %v1162_v18 = vmax.f32 %v1016_v0, 0.0 }
 0x137   : > { %v858_v19 = vpop.f32.mrf.mxu0  ;;  %v1021_v21 = vpop.f32.mrf.mxu1  ;;  %v885_v10 = vadd.f32 %v4772_v27, %v4763_v12  ;;  %v881_v27 = vadd.f32 %v4767_v17, %v4763_v12 }
 0x138   : > { %v1185_v23 = vmax.f32 %v855_v14, 0.0  ;;  %v1163_v24 = vmax.f32 %v1018_v15, 0.0  ;;  %v1268_v28 = vpack.c.bf16 %v1184_v13, %v1180_v5  ;;  %v859_v29 = vadd.f32 %v858_v19, %v4758_v39 }
 0x139   : > { %v860_v31 = vpop.f32.mrf.mxu0  ;;  %v1023_v33 = vpop.f32.mrf.mxu1  ;;  %v1258_v40 = vpack.c.bf16 %v1162_v18, %v1158_v25  ;;  %v1022_v48 = vadd.f32 %v1021_v21, %v4823_v38  ;;  %v4228_v21 = vld [vmem:[%s5487_s5 + $0x40] sm:$0xff]  }
 0x13a   : > { %v861_v35 = vadd.f32 %v860_v31, %v4763_v12  ;;  %v1269_v36 = vpack.c.bf16 %v1185_v23, %v1181_v11  ;;  %v1259_v37 = vpack.c.bf16 %v1163_v24, %v1159_v22  ;;  %v1024_v44 = vadd.f32 %v1023_v33, %v4813_v32  ;;  %v4229_v22 = vld [vmem:[%s5487_s5] sm:$0xff]   ;;  %3765 = vmatprep.subr.bf16.mxu0 %v4228_v21 }
 0x13b   : > { %v862_v42 = vpop.f32.mrf.mxu0  ;;  %v1025_v43 = vpop.f32.mrf.mxu1  ;;  %v1188_v47 = vmax.f32 %v859_v29, 0.0  ;;  %v1166_v62 = vmax.f32 %v1022_v48, 0.0  ;;  %3766 = vmatpush3.bf16.msra.mxu0 %v4229_v22 }
 0x13c   : > { %v863_v45 = vadd.f32 %v862_v42, %v4758_v39  ;;  %v1026_v46 = vadd.f32 %v1025_v43, %v4823_v38  ;;  %1820 = vmatprep.mubr.bf16.mxu0 %v1269_v36  ;;  %1983 = vmatprep.mubr.bf16.mxu1 %v1259_v37  ;;  %v1189_v26 = vmax.f32 %v861_v35, 0.0  ;;  %v1167_v58 = vmax.f32 %v1024_v44, 0.0 }
 0x13d   : > { %v864_v49 = vpop.f32.mrf.mxu0  ;;  %v1027_v50 = vpop.f32.mrf.mxu1  ;;  %1821 = vmatmul.mubr.bf16.gmra.mxu0 %v1268_v28  ;;  %1984 = vmatmul.mubr.bf16.gmra.mxu1 %v1258_v40  ;;  %v1209_v35 = vmax.f32 %v885_v10, 0.0  ;;  %v1205_v43 = vmax.f32 %v881_v27, 0.0  ;;  %v905_v10 = vadd.f32 %v4806_v20, %v4763_v12 }
 0x13e   : > { %v1192_v51 = vmax.f32 %v863_v45, 0.0  ;;  %v865_v52 = vadd.f32 %v864_v49, %v4763_v12  ;;  %v1028_v54 = vadd.f32 %v1027_v50, %v4813_v32  ;;  %v1170_v55 = vmax.f32 %v1026_v46, 0.0 }
 0x13f   : > { %v868_v56 = vpop.f32.mrf.mxu0  ;;  %v1031_v57 = vpop.f32.mrf.mxu1  ;;  %v1225_v22 = vmax.f32 %v905_v10, 0.0 }
 0x140   : > { %v1193_v59 = vmax.f32 %v865_v52, 0.0  ;;  %v1171_v60 = vmax.f32 %v1028_v54, 0.0  ;;  %v1272_v63 = vpack.c.bf16 %v1192_v51, %v1188_v47  ;;  %v869_v0 = vadd.f32 %v868_v56, %v4758_v39 }
 0x141   : > { %v870_v1 = vpop.f32.mrf.mxu0  ;;  %v1033_v2 = vpop.f32.mrf.mxu1  ;;  %v1262_v11 = vpack.c.bf16 %v1170_v55, %v1166_v62  ;;  %v1032_v24 = vadd.f32 %v1031_v57, %v4823_v38  ;;  %v895_v51 = vadd.f32 %v4790_v53, %v4763_v12  ;;  %v891_v57 = vadd.f32 %v4779_v41, %v4763_v12 }
 0x142   : > { %v871_v5 = vadd.f32 %v870_v1, %v4763_v12  ;;  %v1273_v6 = vpack.c.bf16 %v1193_v59, %v1189_v26  ;;  %v1263_v9 = vpack.c.bf16 %v1171_v60, %v1167_v58  ;;  %v1034_v15 = vadd.f32 %v1033_v2, %v4813_v32 }
 0x143   : > { %v872_v13 = vpop.f32.mrf.mxu0  ;;  %v1035_v14 = vpop.f32.mrf.mxu1  ;;  %v1196_v23 = vmax.f32 %v869_v0, 0.0  ;;  %v1174_v44 = vmax.f32 %v1032_v24, 0.0  ;;  %v1281_v26 = vpack.c.bf16 %v1209_v35, %v1205_v43  ;;  %v1217_v53 = vmax.f32 %v895_v51, 0.0 }
 0x144   : > { %v873_v18 = vadd.f32 %v872_v13, %v4758_v39  ;;  %v1036_v19 = vadd.f32 %v1035_v14, %v4823_v38  ;;  %1830 = vmatprep.mubr.bf16.mxu0 %v1273_v6  ;;  %1993 = vmatprep.mubr.bf16.mxu1 %v1263_v9  ;;  %v1197_v28 = vmax.f32 %v871_v5, 0.0  ;;  %v1175_v40 = vmax.f32 %v1034_v15, 0.0 }
 0x145   : > { %v874_v25 = vpop.f32.mrf.mxu0  ;;  %v1037_v39 = vpop.f32.mrf.mxu1  ;;  %1831 = vmatmul.mubr.bf16.gmra.mxu0 %v1272_v63  ;;  %1994 = vmatmul.mubr.bf16.gmra.mxu1 %v1262_v11  ;;  %v1213_v2 = vmax.f32 %v891_v57, 0.0 }
 0x146   : > { %v1200_v29 = vmax.f32 %v873_v18, 0.0  ;;  %v875_v31 = vadd.f32 %v874_v25, %v4763_v12  ;;  %v1038_v33 = vadd.f32 %v1037_v39, %v4813_v32  ;;  %v1178_v36 = vmax.f32 %v1036_v19, 0.0 }
 0x147   : > { %v1041_v37 = vpop.f32.mrf.mxu1  ;;  %v1285_v13 = vpack.c.bf16 %v1217_v53, %v1213_v2  ;;  %v901_v18 = vadd.f32 %v4800_v4, %v4763_v12 }
 0x148   : > { %v1201_v17 = vmax.f32 %v875_v31, 0.0  ;;  %v1179_v42 = vmax.f32 %v1038_v33, 0.0  ;;  %v1276_v45 = vpack.c.bf16 %v1200_v29, %v1196_v23  ;;  %v1266_v49 = vpack.c.bf16 %v1178_v36, %v1174_v44 }
 0x149   : > { %v1043_v46 = vpop.f32.mrf.mxu1  ;;  %v1042_v55 = vadd.f32 %v1041_v37, %v4823_v38  ;;  %v1221_v39 = vmax.f32 %v901_v18, 0.0 }
 0x14a   : > { %v1277_v47 = vpack.c.bf16 %v1201_v17, %v1197_v28  ;;  %v1267_v48 = vpack.c.bf16 %v1179_v42, %v1175_v40  ;;  %v1044_v52 = vadd.f32 %v1043_v46, %v4813_v32 }
 0x14b   : > { %v1045_v50 = vpop.f32.mrf.mxu1  ;;  %v1182_v0 = vmax.f32 %v1042_v55, 0.0  ;;  %v1289_v12 = vpack.c.bf16 %v1225_v22, %v1221_v39 }
 0x14c   : > { %v1046_v54 = vadd.f32 %v1045_v50, %v4823_v38  ;;  %1840 = vmatprep.mubr.bf16.mxu0 %v1277_v47  ;;  %2003 = vmatprep.mubr.bf16.mxu1 %v1267_v48  ;;  %v1183_v62 = vmax.f32 %v1044_v52, 0.0 }
 0x14d   : > { %v1047_v56 = vpop.f32.mrf.mxu1  ;;  %1841 = vmatmul.mubr.bf16.gmra.mxu0 %v1276_v45  ;;  %2004 = vmatmul.mubr.bf16.gmra.mxu1 %v1266_v49 }
 0x14e   : > { %v1048_v58 = vadd.f32 %v1047_v56, %v4813_v32  ;;  %1850 = vmatprep.mubr.bf16.mxu0 %v1281_v26  ;;  %v1186_v59 = vmax.f32 %v1046_v54, 0.0 }
 0x14f   : > { %v1051_v60 = vpop.f32.mrf.mxu1 }
 0x150   : > { %v1187_v63 = vmax.f32 %v1048_v58, 0.0  ;;  %v1270_v6 = vpack.c.bf16 %v1186_v59, %v1182_v0  ;;  %v1052_v14 = vadd.f32 %v1051_v60, %v4823_v38 }
 0x151   : > { %v1053_v1 = vpop.f32.mrf.mxu1 }
 0x152   : > { %v1271_v5 = vpack.c.bf16 %v1187_v63, %v1183_v62  ;;  %v1054_v11 = vadd.f32 %v1053_v1, %v4813_v32  ;;  %v1190_v24 = vmax.f32 %v1052_v14, 0.0 }
 0x153   : > { %v1055_v9 = vpop.f32.mrf.mxu1 }
 0x154   : > { %v1056_v41 = vadd.f32 %v1055_v9, %v4823_v38  ;;  %2013 = vmatprep.mubr.bf16.mxu1 %v1271_v5  ;;  %v1191_v27 = vmax.f32 %v1054_v11, 0.0 }
 0x155   : > { %v1057_v15 = vpop.f32.mrf.mxu1  ;;  %1851 = vmatmul.mubr.bf16.gmra.mxu0 %v4775_v34  ;;  %2014 = vmatmul.mubr.bf16.gmra.mxu1 %v1270_v6 }
 0x156   : > { %v1058_v19 = vadd.f32 %v1057_v15, %v4813_v32  ;;  %1860 = vmatprep.mubr.bf16.mxu0 %v1285_v13  ;;  %v1194_v21 = vmax.f32 %v1056_v41, 0.0 }
 0x157   : > { %v1061_v20 = vpop.f32.mrf.mxu1 }
 0x158   : > { %v1195_v23 = vmax.f32 %v1058_v19, 0.0  ;;  %v1274_v29 = vpack.c.bf16 %v1194_v21, %v1190_v24  ;;  %v1062_v4 = vadd.f32 %v1061_v20, %v4823_v38 }
 0x159   : > { %v1063_v25 = vpop.f32.mrf.mxu1 }
 0x15a   : > { %v1275_v28 = vpack.c.bf16 %v1195_v23, %v1191_v27  ;;  %v1064_v34 = vadd.f32 %v1063_v25, %v4813_v32  ;;  %v1198_v43 = vmax.f32 %v1062_v4, 0.0 }
 0x15b   : > { %v1065_v31 = vpop.f32.mrf.mxu1 }
 0x15c   : > { %v1066_v33 = vadd.f32 %v1065_v31, %v4823_v38  ;;  %2023 = vmatprep.mubr.bf16.mxu1 %v1275_v28  ;;  %v1199_v17 = vmax.f32 %v1064_v34, 0.0 }
 0x15d   : > { %v1067_v35 = vpop.f32.mrf.mxu1  ;;  %1861 = vmatmul.mubr.bf16.gmra.mxu0 %v4796_v61  ;;  %2024 = vmatmul.mubr.bf16.gmra.mxu1 %v1274_v29 }
 0x15e   : > { %v1068_v36 = vadd.f32 %v1067_v35, %v4813_v32  ;;  %1870 = vmatprep.mubr.bf16.mxu0 %v1289_v12  ;;  %v1202_v37 = vmax.f32 %v1066_v33, 0.0 }
 0x15f   : > { %v1071_v40 = vpop.f32.mrf.mxu1 }
 0x160   : > { %v1203_v42 = vmax.f32 %v1068_v36, 0.0  ;;  %v1278_v46 = vpack.c.bf16 %v1202_v37, %v1198_v43  ;;  %v1072_v61 = vadd.f32 %v1071_v40, %v4823_v38 }
 0x161   : > { %v1073_v44 = vpop.f32.mrf.mxu1 }
 0x162   : > { %v1279_v45 = vpack.c.bf16 %v1203_v42, %v1199_v17  ;;  %v1074_v48 = vadd.f32 %v1073_v44, %v4813_v32  ;;  %v1206_v56 = vmax.f32 %v1072_v61, 0.0 }
 0x163   : > { %v1075_v47 = vpop.f32.mrf.mxu1 }
 0x164   : > { %v1076_v49 = vadd.f32 %v1075_v47, %v4823_v38  ;;  %2033 = vmatprep.mubr.bf16.mxu1 %v1279_v45  ;;  %v1207_v54 = vmax.f32 %v1074_v48, 0.0 }
 0x165   : > { %v1077_v50 = vpop.f32.mrf.mxu1  ;;  %1871 = vmatmul.mubr.bf16.gmra.mxu0 %v4810_v30  ;;  %2034 = vmatmul.mubr.bf16.gmra.mxu1 %v1278_v46 }
 0x166   : > { %v1078_v26 = vadd.f32 %v1077_v50, %v4813_v32  ;;  %v1210_v51 = vmax.f32 %v1076_v49, 0.0 }
 0x167   : > { %v1081_v52 = vpop.f32.mrf.mxu1 }
 0x168   : > { %v1211_v55 = vmax.f32 %v1078_v26, 0.0  ;;  %v1282_v59 = vpack.c.bf16 %v1210_v51, %v1206_v56  ;;  %v1082_v63 = vadd.f32 %v1081_v52, %v4823_v38  ;;  %v4231_v56 = vld [vmem:[%s5489_s7 + $0x30] sm:$0xff]  }
 0x169   : > { %v1083_v57 = vpop.f32.mrf.mxu1 }
 0x16a   : > { %v1283_v58 = vpack.c.bf16 %v1211_v55, %v1207_v54  ;;  %v1084_v53 = vadd.f32 %v1083_v57, %v4813_v32  ;;  %v1214_v9 = vmax.f32 %v1082_v63, 0.0  ;;  %v4230_v55 = vld [vmem:[%s5489_s7 + $0x38] sm:$0xff]  }
 0x16b   : > { %v1085_v60 = vpop.f32.mrf.mxu1  ;;  %3943 = vmatprep.subr.bf16.mxu1 %v4230_v55 }
 0x16c   : > { %v1086_v62 = vadd.f32 %v1085_v60, %v4823_v38  ;;  %2043 = vmatprep.mubr.bf16.mxu1 %v1283_v58  ;;  %v1215_v5 = vmax.f32 %v1084_v53, 0.0  ;;  %3944 = vmatpush3.bf16.msra.mxu1 %v4230_v55 }
 0x16d   : > { %v1087_v30 = vpop.f32.mrf.mxu1  ;;  %2044 = vmatmul.mubr.bf16.gmra.mxu1 %v1282_v59  ;;  %3945 = vmatprep.subr.bf16.mxu1 %v4231_v56 }
 0x16e   : > { %v1088_v0 = vadd.f32 %v1087_v30, %v4813_v32  ;;  %v1218_v1 = vmax.f32 %v1086_v62, 0.0 }
 0x16f   : > { %v1091_v2 = vpop.f32.mrf.mxu1 }
 0x170   : > { %v1219_v6 = vmax.f32 %v1088_v0, 0.0  ;;  %v1286_v41 = vpack.c.bf16 %v1218_v1, %v1214_v9  ;;  %v1092_v18 = vadd.f32 %v1091_v2, %v4823_v38  ;;  %v4232_v1 = vld [vmem:[%s5489_s7 + $0x28] sm:$0xff]   ;;  %3946 = vmatpush3.bf16.msra.mxu1 %v4231_v56 }
 0x171   : > { %v1093_v10 = vpop.f32.mrf.mxu1  ;;  %3947 = vmatprep.subr.bf16.mxu1 %v4232_v1 }
 0x172   : > { %v1287_v11 = vpack.c.bf16 %v1219_v6, %v1215_v5  ;;  %v1094_v14 = vadd.f32 %v1093_v10, %v4813_v32  ;;  %v1222_v23 = vmax.f32 %v1092_v18, 0.0 }
 0x173   : > { %v1095_v13 = vpop.f32.mrf.mxu1 }
 0x174   : > { %v1096_v15 = vadd.f32 %v1095_v13, %v4823_v38  ;;  %2053 = vmatprep.mubr.bf16.mxu1 %v1287_v11  ;;  %v1223_v22 = vmax.f32 %v1094_v14, 0.0  ;;  %3948 = vmatpush3.bf16.msra.mxu1 %v4232_v1 }
 0x175   : > { %v1097_v19 = vpop.f32.mrf.mxu1  ;;  %2054 = vmatmul.mubr.bf16.gmra.mxu1 %v1286_v41 }
 0x176   : > { %v1098_v21 = vadd.f32 %v1097_v19, %v4813_v32  ;;  %v1226_v20 = vmax.f32 %v1096_v15, 0.0  ;;  %v1356_v32 = vld [vmem:[%s5486_s4] sm:$0x3] }
 0x177   : > { %v4985_v40 = vrot.slane %v1356_v32, %v4748_v16  ;;  %v4989_v17 = vrot.slane %v1356_v32, %v571_v3 }
 0x178   : > { %v1227_v27 = vmax.f32 %v1098_v21, 0.0  ;;  %v1290_v25 = vpack.c.bf16 %v1226_v20, %v1222_v23  ;;  %v4233_v20 = vld [vmem:[%s5489_s7 + $0x20] sm:$0xff]  }
 0x179   : > { %3949 = vmatprep.subr.bf16.mxu1 %v4233_v20 }
 0x17a   : > { %v1291_v24 = vpack.c.bf16 %v1227_v27, %v1223_v22  ;;  %3950 = vmatpush3.bf16.msra.mxu1 %v4233_v20 }
 0x17c   : > { %2063 = vmatprep.mubr.bf16.mxu1 %v1291_v24 }
 0x17d   : > { %2064 = vmatmul.mubr.bf16.gmra.mxu1 %v1290_v25 }
 0x1ad   : > { %v1722_v39 = vpop.f32.mrf.mxu0 }
 0x1ae   : > { %v1723_v48 = vadd.f32 %v1722_v39, %v4985_v40 }
 0x1af   : > { %v1724_v28 = vpop.f32.mrf.mxu0 }
 0x1b0   : > { %v1725_v46 = vadd.f32 %v1724_v28, %v4989_v17 }
 0x1b1   : > { %v1726_v29 = vpop.f32.mrf.mxu0 }
 0x1b2   : > { %v1727_v47 = vadd.f32 %v1726_v29, %v4985_v40 }
 0x1b3   : > { %v1728_v31 = vpop.f32.mrf.mxu0 }
 0x1b4   : > { %v1729_v50 = vadd.f32 %v1728_v31, %v4989_v17 }
 0x1b5   : > { %v1732_v34 = vpop.f32.mrf.mxu0 }
 0x1b6   : > { %v1733_v9 = vadd.f32 %v1732_v34, %v4985_v40 }
 0x1b7   : > { %v1734_v33 = vpop.f32.mrf.mxu0 }
 0x1b8   : > { %v1735_v2 = vadd.f32 %v1734_v33, %v4989_v17 }
 0x1b9   : > { %v1736_v12 = vpop.f32.mrf.mxu0 }
 0x1ba   : > { %v1737_v5 = vadd.f32 %v1736_v12, %v4985_v40 }
 0x1bb   : > { %v1738_v38 = vpop.f32.mrf.mxu0 }
 0x1bc   : > { %v1739_v13 = vadd.f32 %v1738_v38, %v4989_v17 }
 0x1bd   : > { %v4973_v4 = vpop.f32.mrf.mxu0 }
 0x1be   : > { %v1743_v38 = vadd.f32 %v4973_v4, %v4985_v40 }
 0x1bf   : > { %v4975_v35 = vpop.f32.mrf.mxu0 }
 0x1c0   : > { %v1745_v34 = vadd.f32 %v4975_v35, %v4989_v17 }
 0x1c1   : > { %v4980_v36 = vpop.f32.mrf.mxu0 }
 0x1c2   : > { %v1747_v33 = vadd.f32 %v4980_v36, %v4985_v40 }
 0x1c3   : > { %v4982_v37 = vpop.f32.mrf.mxu0 }
 0x1c5   : > { %v4991_v42 = vpop.f32.mrf.mxu0  ;;  %v1915_v43 = vpop.f32.mrf.mxu1 }
 0x1c6   : > { %v1916_v51 = vadd.f32 %v1915_v43, %v1723_v48 }
 0x1c7   : > { %v4993_v44 = vpop.f32.mrf.mxu0  ;;  %v1917_v45 = vpop.f32.mrf.mxu1 }
 0x1c8   : > { %v1918_v26 = vadd.f32 %v1917_v45, %v1725_v46  ;;  %v2074_v63 = vmax.f32 %v1916_v51, 0.0  ;;  %v1749_v46 = vadd.f32 %v4982_v37, %v4989_v17 }
 0x1c9   : > { %v4998_v49 = vpop.f32.mrf.mxu0  ;;  %v1919_v61 = vpop.f32.mrf.mxu1 }
 0x1ca   : > { %v1920_v3 = vadd.f32 %v1919_v61, %v1727_v47  ;;  %v2075_v53 = vmax.f32 %v1918_v26, 0.0 }
 0x1cb   : > { %v5001_v52 = vpop.f32.mrf.mxu0  ;;  %v1921_v54 = vpop.f32.mrf.mxu1 }
 0x1cc   : > { %v1922_v57 = vadd.f32 %v1921_v54, %v1729_v50  ;;  %v2076_v58 = vmax.f32 %v1920_v3, 0.0  ;;  %v1759_v1 = vadd.f32 %v5001_v52, %v4989_v17 }
 0x1cd   : > { %v5009_v59 = vpop.f32.mrf.mxu0  ;;  %v1925_v60 = vpop.f32.mrf.mxu1 }
 0x1ce   : > { %v2077_v62 = vmax.f32 %v1922_v57, 0.0  ;;  %v2138_v10 = vpack.c.bf16 %v2076_v58, %v2074_v63  ;;  %v1926_v18 = vadd.f32 %v1925_v60, %v1733_v9  ;;  %v1755_v57 = vadd.f32 %v4993_v44, %v4989_v17 }
 0x1cf   : > { %v5011_v30 = vpop.f32.mrf.mxu0  ;;  %v1927_v0 = vpop.f32.mrf.mxu1  ;;  %v1757_v58 = vadd.f32 %v4998_v49, %v4985_v40 }
 0x1d0   : > { %v2139_v6 = vpack.c.bf16 %v2077_v62, %v2075_v53  ;;  %v1928_v14 = vadd.f32 %v1927_v0, %v1735_v2  ;;  %v2078_v28 = vmax.f32 %v1926_v18, 0.0  ;;  %v1753_v53 = vadd.f32 %v4991_v42, %v4985_v40 }
 0x1d1   : > { %v5019_v11 = vpop.f32.mrf.mxu0  ;;  %v1929_v41 = vpop.f32.mrf.mxu1  ;;  %v1765_v52 = vadd.f32 %v5011_v30, %v4989_v17 }
 0x1d2   : > { %v1930_v15 = vadd.f32 %v1929_v41, %v1737_v5  ;;  %2337 = vmatprep.mubr.bf16.mxu0 %v2139_v6  ;;  %v2079_v25 = vmax.f32 %v1928_v14, 0.0  ;;  %v1767_v20 = vadd.f32 %v5019_v11, %v4985_v40 }
 0x1d3   : > { %v5022_v19 = vpop.f32.mrf.mxu0  ;;  %v1931_v21 = vpop.f32.mrf.mxu1  ;;  %2338 = vmatmul.mubr.bf16.vlgmr.msra.gmra.mxu0 %v2138_v10 }
 0x1d4   : > { %v1932_v22 = vadd.f32 %v1931_v21, %v1739_v13  ;;  %v2080_v27 = vmax.f32 %v1930_v15, 0.0 }
 0x1d5   : > { %v5027_v23 = vpop.f32.mrf.mxu0  ;;  %v1935_v24 = vpop.f32.mrf.mxu1 }
 0x1d6   : > { %v2081_v39 = vmax.f32 %v1932_v22, 0.0  ;;  %v2140_v32 = vpack.c.bf16 %v2080_v27, %v2078_v28  ;;  %v1936_v61 = vadd.f32 %v1935_v24, %v1743_v38  ;;  %v1763_v27 = vadd.f32 %v5009_v59, %v4985_v40 }
 0x1d7   : > { %v5029_v29 = vpop.f32.mrf.mxu0  ;;  %v1937_v31 = vpop.f32.mrf.mxu1  ;;  %v1769_v28 = vadd.f32 %v5022_v19, %v4989_v17 }
 0x1d8   : > { %v2141_v12 = vpack.c.bf16 %v2081_v39, %v2079_v25  ;;  %v1938_v47 = vadd.f32 %v1937_v31, %v1745_v34  ;;  %v2082_v55 = vmax.f32 %v1936_v61, 0.0  ;;  %v1775_v19 = vadd.f32 %v5029_v29, %v4989_v17 }
 0x1d9   : > { %v5037_v43 = vpop.f32.mrf.mxu0  ;;  %v1939_v45 = vpop.f32.mrf.mxu1 }
 0x1da   : > { %v1940_v48 = vadd.f32 %v1939_v45, %v1747_v33  ;;  %2345 = vmatprep.mubr.bf16.mxu0 %v2141_v12  ;;  %v2083_v51 = vmax.f32 %v1938_v47, 0.0 }
 0x1db   : > { %v5041_v35 = vpop.f32.mrf.mxu0  ;;  %v1941_v50 = vpop.f32.mrf.mxu1  ;;  %2346 = vmatmul.mubr.bf16.gmra.mxu0 %v2140_v32 }
 0x1dc   : > { %v1942_v36 = vadd.f32 %v1941_v50, %v1749_v46  ;;  %v2084_v26 = vmax.f32 %v1940_v48, 0.0  ;;  %v1777_v50 = vadd.f32 %v5037_v43, %v4985_v40 }
 0x1dd   : > { %v5043_v3 = vpop.f32.mrf.mxu0  ;;  %v1945_v4 = vpop.f32.mrf.mxu1 }
 0x1de   : > { %v2085_v54 = vmax.f32 %v1942_v36, 0.0  ;;  %v2142_v62 = vpack.c.bf16 %v2084_v26, %v2082_v55  ;;  %v1946_v6 = vadd.f32 %v1945_v4, %v1753_v53  ;;  %v1773_v26 = vadd.f32 %v5027_v23, %v4985_v40 }
 0x1df   : > { %v5045_v56 = vpop.f32.mrf.mxu0  ;;  %v1947_v37 = vpop.f32.mrf.mxu1  ;;  %v1779_v55 = vadd.f32 %v5041_v35, %v4989_v17 }
 0x1e0   : > { %v2143_v60 = vpack.c.bf16 %v2085_v54, %v2083_v51  ;;  %v1948_v2 = vadd.f32 %v1947_v37, %v1755_v57  ;;  %v2086_v15 = vmax.f32 %v1946_v6, 0.0  ;;  %v1785_v35 = vadd.f32 %v5045_v56, %v4989_v17 }
 0x1e1   : > { %v5053_v63 = vpop.f32.mrf.mxu0  ;;  %v1949_v0 = vpop.f32.mrf.mxu1 }
 0x1e2   : > { %v1950_v5 = vadd.f32 %v1949_v0, %v1757_v58  ;;  %2353 = vmatprep.mubr.bf16.mxu0 %v2143_v60  ;;  %v2087_v13 = vmax.f32 %v1948_v2, 0.0 }
 0x1e3   : > { %v5057_v9 = vpop.f32.mrf.mxu0  ;;  %v1951_v44 = vpop.f32.mrf.mxu1  ;;  %2354 = vmatmul.mubr.bf16.gmra.mxu0 %v2142_v62 }
 0x1e4   : > { %v1952_v49 = vadd.f32 %v1951_v44, %v1759_v1  ;;  %v2088_v10 = vmax.f32 %v1950_v5, 0.0  ;;  %v1787_v44 = vadd.f32 %v5053_v63, %v4985_v40 }
 0x1e5   : > { %v5059_v41 = vpop.f32.mrf.mxu0  ;;  %v1955_v42 = vpop.f32.mrf.mxu1 }
 0x1e6   : > { %v2089_v14 = vmax.f32 %v1952_v49, 0.0  ;;  %v2144_v24 = vpack.c.bf16 %v2088_v10, %v2086_v15  ;;  %v1956_v33 = vadd.f32 %v1955_v42, %v1763_v27  ;;  %v1783_v10 = vadd.f32 %v5043_v3, %v4985_v40 }
 0x1e7   : > { %v5061_v18 = vpop.f32.mrf.mxu0  ;;  %v1957_v21 = vpop.f32.mrf.mxu1  ;;  %v1789_v15 = vadd.f32 %v5057_v9, %v4989_v17 }
 0x1e8   : > { %v2145_v22 = vpack.c.bf16 %v2089_v14, %v2087_v13  ;;  %v1958_v31 = vadd.f32 %v1957_v21, %v1765_v52  ;;  %v2090_v47 = vmax.f32 %v1956_v33, 0.0  ;;  %v1795_v9 = vadd.f32 %v5061_v18, %v4989_v17 }
 0x1e9   : > { %v5069_v25 = vpop.f32.mrf.mxu0  ;;  %v1959_v39 = vpop.f32.mrf.mxu1 }
 0x1ea   : > { %v1960_v34 = vadd.f32 %v1959_v39, %v1767_v20  ;;  %2361 = vmatprep.mubr.bf16.mxu0 %v2145_v22  ;;  %v2091_v45 = vmax.f32 %v1958_v31, 0.0 }
 0x1eb   : > { %v5073_v12 = vpop.f32.mrf.mxu0  ;;  %v1961_v30 = vpop.f32.mrf.mxu1  ;;  %2362 = vmatmul.mubr.bf16.gmra.mxu0 %v2144_v24 }
 0x1ec   : > { %v1962_v11 = vadd.f32 %v1961_v30, %v1769_v28  ;;  %v2092_v38 = vmax.f32 %v1960_v34, 0.0  ;;  %v1797_v30 = vadd.f32 %v5069_v25, %v4985_v40 }
 0x1ed   : > { %v5075_v32 = vpop.f32.mrf.mxu0  ;;  %v1965_v59 = vpop.f32.mrf.mxu1 }
 0x1ee   : > { %v2093_v46 = vmax.f32 %v1962_v11, 0.0  ;;  %v2146_v4 = vpack.c.bf16 %v2092_v38, %v2090_v47  ;;  %v1966_v58 = vadd.f32 %v1965_v59, %v1773_v26  ;;  %v1793_v38 = vadd.f32 %v5059_v41, %v4985_v40 }
 0x1ef   : > { %v5077_v48 = vpop.f32.mrf.mxu0  ;;  %v1967_v61 = vpop.f32.mrf.mxu1  ;;  %v1799_v47 = vadd.f32 %v5073_v12, %v4989_v17 }
 0x1f0   : > { %v2147_v36 = vpack.c.bf16 %v2093_v46, %v2091_v45  ;;  %v1968_v37 = vadd.f32 %v1967_v61, %v1775_v19  ;;  %v2094_v2 = vmax.f32 %v1966_v58, 0.0  ;;  %v1805_v12 = vadd.f32 %v5077_v48, %v4989_v17 }
 0x1f1   : > { %v5085_v51 = vpop.f32.mrf.mxu0  ;;  %v1969_v54 = vpop.f32.mrf.mxu1 }
 0x1f2   : > { %v1970_v57 = vadd.f32 %v1969_v54, %v1777_v50  ;;  %2369 = vmatprep.mubr.bf16.mxu0 %v2147_v36  ;;  %v2095_v0 = vmax.f32 %v1968_v37, 0.0 }
 0x1f3   : > { %v5089_v60 = vpop.f32.mrf.mxu0  ;;  %v1971_v29 = vpop.f32.mrf.mxu1  ;;  %2370 = vmatmul.mubr.bf16.gmra.mxu0 %v2146_v4 }
 0x1f4   : > { %v1972_v43 = vadd.f32 %v1971_v29, %v1779_v55  ;;  %v2096_v53 = vmax.f32 %v1970_v57, 0.0  ;;  %v1807_v29 = vadd.f32 %v5085_v51, %v4985_v40 }
 0x1f5   : > { %v5091_v62 = vpop.f32.mrf.mxu0  ;;  %v1975_v23 = vpop.f32.mrf.mxu1 }
 0x1f6   : > { %v2097_v1 = vmax.f32 %v1972_v43, 0.0  ;;  %v2148_v42 = vpack.c.bf16 %v2096_v53, %v2094_v2  ;;  %v1976_v20 = vadd.f32 %v1975_v23, %v1783_v10  ;;  %v1803_v53 = vadd.f32 %v5075_v32, %v4985_v40 }
 0x1f7   : > { %v5093_v5 = vpop.f32.mrf.mxu0  ;;  %v1977_v6 = vpop.f32.mrf.mxu1  ;;  %v1809_v2 = vadd.f32 %v5089_v60, %v4989_v17 }
 0x1f8   : > { %v2149_v49 = vpack.c.bf16 %v2097_v1, %v2095_v0  ;;  %v1978_v21 = vadd.f32 %v1977_v6, %v1785_v35  ;;  %v2098_v31 = vmax.f32 %v1976_v20, 0.0  ;;  %v1815_v60 = vadd.f32 %v5093_v5, %v4989_v17 }
 0x1f9   : > { %v5101_v13 = vpop.f32.mrf.mxu0  ;;  %v1979_v14 = vpop.f32.mrf.mxu1 }
 0x1fa   : > { %v1980_v52 = vadd.f32 %v1979_v14, %v1787_v44  ;;  %2377 = vmatprep.mubr.bf16.mxu0 %v2149_v49  ;;  %v2099_v39 = vmax.f32 %v1978_v21, 0.0 }
 0x1fb   : > { %v5105_v22 = vpop.f32.mrf.mxu0  ;;  %v1981_v56 = vpop.f32.mrf.mxu1  ;;  %2378 = vmatmul.mubr.bf16.gmra.mxu0 %v2148_v42 }
 0x1fc   : > { %v1982_v63 = vadd.f32 %v1981_v56, %v1789_v15  ;;  %v2100_v27 = vmax.f32 %v1980_v52, 0.0  ;;  %v1817_v56 = vadd.f32 %v5101_v13, %v4985_v40 }
 0x1fd   : > { %v5107_v24 = vpop.f32.mrf.mxu0  ;;  %v1985_v3 = vpop.f32.mrf.mxu1 }
 0x1fe   : > { %v2101_v28 = vmax.f32 %v1982_v63, 0.0  ;;  %v2150_v59 = vpack.c.bf16 %v2100_v27, %v2098_v31  ;;  %v1986_v50 = vadd.f32 %v1985_v3, %v1793_v38  ;;  %v1813_v27 = vadd.f32 %v5091_v62, %v4985_v40 }
 0x1ff   : > { %v5109_v34 = vpop.f32.mrf.mxu0  ;;  %v1987_v33 = vpop.f32.mrf.mxu1  ;;  %v1819_v31 = vadd.f32 %v5105_v22, %v4989_v17 }
 0x200   : > { %v2151_v11 = vpack.c.bf16 %v2101_v28, %v2099_v39  ;;  %v1988_v61 = vadd.f32 %v1987_v33, %v1795_v9  ;;  %v2102_v37 = vmax.f32 %v1986_v50, 0.0  ;;  %v1825_v22 = vadd.f32 %v5109_v34, %v4989_v17 }
 0x201   : > { %v5117_v45 = vpop.f32.mrf.mxu0  ;;  %v1989_v46 = vpop.f32.mrf.mxu1 }
 0x202   : > { %v1990_v19 = vadd.f32 %v1989_v46, %v1797_v30  ;;  %2385 = vmatprep.mubr.bf16.mxu0 %v2151_v11  ;;  %v2103_v54 = vmax.f32 %v1988_v61, 0.0 }
 0x203   : > { %v5121_v36 = vpop.f32.mrf.mxu0  ;;  %v1991_v18 = vpop.f32.mrf.mxu1  ;;  %2386 = vmatmul.mubr.bf16.gmra.mxu0 %v2150_v59 }
 0x204   : > { %v1992_v25 = vadd.f32 %v1991_v18, %v1799_v47  ;;  %v2104_v26 = vmax.f32 %v1990_v19, 0.0  ;;  %v1827_v18 = vadd.f32 %v5117_v45, %v4985_v40 }
 0x205   : > { %v5123_v4 = vpop.f32.mrf.mxu0  ;;  %v1995_v41 = vpop.f32.mrf.mxu1 }
 0x206   : > { %v2105_v55 = vmax.f32 %v1992_v25, 0.0  ;;  %v2152_v23 = vpack.c.bf16 %v2104_v26, %v2102_v37  ;;  %v1996_v44 = vadd.f32 %v1995_v41, %v1803_v53  ;;  %v1823_v26 = vadd.f32 %v5107_v24, %v4985_v40 }
 0x207   : > { %v5125_v57 = vpop.f32.mrf.mxu0  ;;  %v1997_v58 = vpop.f32.mrf.mxu1  ;;  %v1829_v37 = vadd.f32 %v5121_v36, %v4989_v17 }
 0x208   : > { %v2153_v43 = vpack.c.bf16 %v2105_v55, %v2103_v54  ;;  %v1998_v6 = vadd.f32 %v1997_v58, %v1805_v12  ;;  %v2106_v21 = vmax.f32 %v1996_v44, 0.0  ;;  %v4234_v55 = vld [vmem:[%s5489_s7 + $0x18] sm:$0xff]   ;;  %v1835_v44 = vadd.f32 %v5125_v57, %v4989_v17 }
 0x209   : > { %v5133_v0 = vpop.f32.mrf.mxu0  ;;  %v1999_v1 = vpop.f32.mrf.mxu1  ;;  %3951 = vmatprep.subr.bf16.mxu1 %v4234_v55 }
 0x20a   : > { %v2000_v35 = vadd.f32 %v1999_v1, %v1807_v29  ;;  %2393 = vmatprep.mubr.bf16.mxu0 %v2153_v43  ;;  %v2107_v14 = vmax.f32 %v1998_v6, 0.0  ;;  %3952 = vmatpush3.bf16.msra.mxu1 %v4234_v55 }
 0x20b   : > { %v5137_v49 = vpop.f32.mrf.mxu0  ;;  %v2001_v48 = vpop.f32.mrf.mxu1  ;;  %2394 = vmatmul.mubr.bf16.gmra.mxu0 %v2152_v23  ;;  %v4235_v23 = vld [vmem:[%s5489_s7 + $0x10] sm:$0xff]  }
 0x20c   : > { %v2002_v51 = vadd.f32 %v2001_v48, %v1809_v2  ;;  %v2108_v10 = vmax.f32 %v2000_v35, 0.0  ;;  %3953 = vmatprep.subr.bf16.mxu1 %v4235_v23  ;;  %v1837_v48 = vadd.f32 %v5133_v0, %v4985_v40 }
 0x20d   : > { %v5139_v42 = vpop.f32.mrf.mxu0  ;;  %v2005_v32 = vpop.f32.mrf.mxu1 }
 0x20e   : > { %v2109_v15 = vmax.f32 %v2002_v51, 0.0  ;;  %v2154_v3 = vpack.c.bf16 %v2108_v10, %v2106_v21  ;;  %v2006_v30 = vadd.f32 %v2005_v32, %v1813_v27  ;;  %3954 = vmatpush3.bf16.msra.mxu1 %v4235_v23  ;;  %v1833_v10 = vadd.f32 %v5123_v4, %v4985_v40 }
 0x20f   : > { %v5141_v52 = vpop.f32.mrf.mxu0  ;;  %v2007_v20 = vpop.f32.mrf.mxu1  ;;  %v1839_v21 = vadd.f32 %v5137_v49, %v4989_v17 }
 0x210   : > { %v2155_v63 = vpack.c.bf16 %v2109_v15, %v2107_v14  ;;  %v2008_v33 = vadd.f32 %v2007_v20, %v1815_v60  ;;  %v2110_v61 = vmax.f32 %v2006_v30, 0.0  ;;  %v4236_v15 = vld [vmem:[%s5489_s7 + $0x8] sm:$0xff]   ;;  %v1845_v30 = vadd.f32 %v5141_v52, %v4989_v17 }
 0x211   : > { %v5149_v39 = vpop.f32.mrf.mxu0  ;;  %v2009_v28 = vpop.f32.mrf.mxu1  ;;  %3955 = vmatprep.subr.bf16.mxu1 %v4236_v15 }
 0x212   : > { %v2010_v9 = vadd.f32 %v2009_v28, %v1817_v56  ;;  %2401 = vmatprep.mubr.bf16.mxu0 %v2155_v63  ;;  %v2111_v46 = vmax.f32 %v2008_v33, 0.0  ;;  %3956 = vmatpush3.bf16.msra.mxu1 %v4236_v15 }
 0x213   : > { %v5153_v11 = vpop.f32.mrf.mxu0  ;;  %v2011_v5 = vpop.f32.mrf.mxu1  ;;  %2402 = vmatmul.mubr.bf16.gmra.mxu0 %v2154_v3  ;;  %v4237_v3 = vld [vmem:[%s5489_s7] sm:$0xff]  }
 0x214   : > { %v2012_v13 = vadd.f32 %v2011_v5, %v1819_v31  ;;  %v2112_v38 = vmax.f32 %v2010_v9, 0.0  ;;  %3957 = vmatprep.subr.bf16.mxu1 %v4237_v3  ;;  %v1847_v5 = vadd.f32 %v5149_v39, %v4985_v40 }
 0x215   : > { %v5155_v59 = vpop.f32.mrf.mxu0  ;;  %v2015_v62 = vpop.f32.mrf.mxu1 }
 0x216   : > { %v2113_v47 = vmax.f32 %v2012_v13, 0.0  ;;  %v2156_v41 = vpack.c.bf16 %v2112_v38, %v2110_v61  ;;  %v2016_v34 = vadd.f32 %v2015_v62, %v1823_v26  ;;  %3958 = vmatpush3.bf16.msra.mxu1 %v4237_v3  ;;  %v1843_v38 = vadd.f32 %v5139_v42, %v4985_v40 }
 0x217   : > { %v5157_v19 = vpop.f32.mrf.mxu0  ;;  %v2017_v50 = vpop.f32.mrf.mxu1 }
 0x218   : > { %v2157_v25 = vpack.c.bf16 %v2113_v47, %v2111_v46  ;;  %v2018_v58 = vadd.f32 %v2017_v50, %v1825_v22  ;;  %v2114_v36 = vmax.f32 %v2016_v34, 0.0  ;;  %v1849_v47 = vadd.f32 %v5153_v11, %v4989_v17 }
 0x219   : > { %v2019_v54 = vpop.f32.mrf.mxu1  ;;  %v5170_v29 = vpop.f32.mrf.mxu0  ;;  %v1853_v34 = vadd.f32 %v5155_v59, %v4985_v40 }
 0x21a   : > { %v2020_v12 = vadd.f32 %v2019_v54, %v1827_v18  ;;  %2409 = vmatprep.mubr.bf16.mxu0 %v2157_v25  ;;  %v2115_v1 = vmax.f32 %v2018_v58, 0.0  ;;  %v1855_v58 = vadd.f32 %v5157_v19, %v4989_v17  ;;  %v1857_v11 = vadd.f32 %v5170_v29, %v4985_v40 }
 0x21b   : > { %v2021_v45 = vpop.f32.mrf.mxu1  ;;  %2410 = vmatmul.mubr.bf16.gmra.mxu0 %v2156_v41  ;;  %v1858_v6 = vpop.f32.mrf.mxu0 }
 0x21c   : > { %v2022_v43 = vadd.f32 %v2021_v45, %v1829_v37  ;;  %v2116_v24 = vmax.f32 %v2020_v12, 0.0 }
 0x21d   : > { %v2025_v53 = vpop.f32.mrf.mxu1  ;;  %v5186_v57 = vpop.f32.mrf.mxu0 }
 0x21e   : > { %v2117_v2 = vmax.f32 %v2022_v43, 0.0  ;;  %v2158_v32 = vpack.c.bf16 %v2116_v24, %v2114_v36  ;;  %v2026_v0 = vadd.f32 %v2025_v53, %v1833_v10  ;;  %v1859_v24 = vadd.f32 %v1858_v6, %v4989_v17 }
 0x21f   : > { %v2027_v35 = vpop.f32.mrf.mxu1  ;;  %v1864_v33 = vpop.f32.mrf.mxu0  ;;  %v1863_v15 = vadd.f32 %v5186_v57, %v4985_v40 }
 0x220   : > { %v2159_v51 = vpack.c.bf16 %v2117_v2, %v2115_v1  ;;  %v2028_v20 = vadd.f32 %v2027_v35, %v1835_v44  ;;  %v2118_v49 = vmax.f32 %v2026_v0, 0.0  ;;  %v1865_v59 = vadd.f32 %v1864_v33, %v4989_v17 }
 0x221   : > { %v2029_v14 = vpop.f32.mrf.mxu1  ;;  %v1866_v22 = vpop.f32.mrf.mxu0 }
 0x222   : > { %v2030_v60 = vadd.f32 %v2029_v14, %v1837_v48  ;;  %2417 = vmatprep.mubr.bf16.mxu0 %v2159_v51  ;;  %v2119_v28 = vmax.f32 %v2028_v20, 0.0  ;;  %v1867_v14 = vadd.f32 %v1866_v22, %v4985_v40 }
 0x223   : > { %v2031_v56 = vpop.f32.mrf.mxu1  ;;  %2418 = vmatmul.mubr.bf16.gmra.mxu0 %v2158_v32  ;;  %v1868_v55 = vpop.f32.mrf.mxu0 }
 0x224   : > { %v2032_v63 = vadd.f32 %v2031_v56, %v1839_v21  ;;  %v2120_v4 = vmax.f32 %v2030_v60, 0.0  ;;  %v1869_v60 = vadd.f32 %v1868_v55, %v4989_v17 }
 0x225   : > { %v2035_v27 = vpop.f32.mrf.mxu1  ;;  %v1872_v1 = vpop.f32.mrf.mxu0 }
 0x226   : > { %v2121_v31 = vmax.f32 %v2032_v63, 0.0  ;;  %v2160_v62 = vpack.c.bf16 %v2120_v4, %v2118_v49  ;;  %v2036_v18 = vadd.f32 %v2035_v27, %v1843_v38 }
 0x227   : > { %v2037_v9 = vpop.f32.mrf.mxu1  ;;  %v1874_v51 = vpop.f32.mrf.mxu0 }
 0x228   : > { %v2161_v13 = vpack.c.bf16 %v2121_v31, %v2119_v28  ;;  %v2038_v61 = vadd.f32 %v2037_v9, %v1845_v30  ;;  %v2122_v37 = vmax.f32 %v2036_v18, 0.0  ;;  %v1875_v57 = vadd.f32 %v1874_v51, %v4989_v17 }
 0x229   : > { %v2039_v46 = vpop.f32.mrf.mxu1  ;;  %v1876_v63 = vpop.f32.mrf.mxu0 }
 0x22a   : > { %v2040_v50 = vadd.f32 %v2039_v46, %v1847_v5  ;;  %2425 = vmatprep.mubr.bf16.mxu0 %v2161_v13  ;;  %v2123_v41 = vmax.f32 %v2038_v61, 0.0  ;;  %v1877_v13 = vadd.f32 %v1876_v63, %v4985_v40 }
 0x22b   : > { %v2041_v25 = vpop.f32.mrf.mxu1  ;;  %2426 = vmatmul.mubr.bf16.gmra.mxu0 %v2160_v62  ;;  %v1878_v9 = vpop.f32.mrf.mxu0  ;;  %v1873_v62 = vadd.f32 %v1872_v1, %v4985_v40 }
 0x22c   : > { %v2042_v52 = vadd.f32 %v2041_v25, %v1849_v47  ;;  %v2124_v26 = vmax.f32 %v2040_v50, 0.0  ;;  %v1879_v61 = vadd.f32 %v1878_v9, %v4989_v17  ;;  %v5218_v17 = vld [vmem:[%s5488_s6] ss:$0 sm:$0xff] }
 0x22d   : > { %v2045_v39 = vpop.f32.mrf.mxu1 }
 0x22e   : > { %v2125_v54 = vmax.f32 %v2042_v52, 0.0  ;;  %v2162_v45 = vpack.c.bf16 %v2124_v26, %v2122_v37  ;;  %v2046_v2 = vadd.f32 %v2045_v39, %v1853_v34 }
 0x22f   : > { %v2047_v42 = vpop.f32.mrf.mxu1 }
 0x230   : > { %v2163_v12 = vpack.c.bf16 %v2125_v54, %v2123_v41  ;;  %v2048_v53 = vadd.f32 %v2047_v42, %v1855_v58  ;;  %v2126_v10 = vmax.f32 %v2046_v2, 0.0 }
 0x231   : > { %v2049_v43 = vpop.f32.mrf.mxu1 }
 0x232   : > { %v2050_v23 = vadd.f32 %v2049_v43, %v1857_v11  ;;  %2433 = vmatprep.mubr.bf16.mxu0 %v2163_v12  ;;  %v2127_v48 = vmax.f32 %v2048_v53, 0.0  ;;  %v4238_v43 = vld [vmem:[%s5491_s9 + $0x18] sm:$0xff]  }
 0x233   : > { %v2051_v36 = vpop.f32.mrf.mxu1  ;;  %2434 = vmatmul.mubr.bf16.gmra.mxu0 %v2162_v45  ;;  %3991 = vmatprep.subr.bf16.mxu1 %v4238_v43 }
 0x234   : > { %v2052_v35 = vadd.f32 %v2051_v36, %v1859_v24  ;;  %v2128_v19 = vmax.f32 %v2050_v23, 0.0 }
 0x235   : > { %v2055_v44 = vpop.f32.mrf.mxu1 }
 0x236   : > { %v2129_v29 = vmax.f32 %v2052_v35, 0.0  ;;  %v2164_v21 = vpack.c.bf16 %v2128_v19, %v2126_v10  ;;  %v2056_v4 = vadd.f32 %v2055_v44, %v1863_v15 }
 0x237   : > { %v2057_v32 = vpop.f32.mrf.mxu1 }
 0x238   : > { %v2165_v6 = vpack.c.bf16 %v2129_v29, %v2127_v48  ;;  %v2058_v0 = vadd.f32 %v2057_v32, %v1865_v59  ;;  %v2130_v30 = vmax.f32 %v2056_v4, 0.0 }
 0x239   : > { %v2059_v20 = vpop.f32.mrf.mxu1 }
 0x23a   : > { %v2060_v56 = vadd.f32 %v2059_v20, %v1867_v14  ;;  %2441 = vmatprep.mubr.bf16.mxu0 %v2165_v6  ;;  %v2131_v49 = vmax.f32 %v2058_v0, 0.0 }
 0x23b   : > { %v2061_v27 = vpop.f32.mrf.mxu1  ;;  %2442 = vmatmul.mubr.bf16.gmra.mxu0 %v2164_v21 }
 0x23c   : > { %v2062_v3 = vadd.f32 %v2061_v27, %v1869_v60  ;;  %v2132_v28 = vmax.f32 %v2060_v56, 0.0 }
 0x23d   : > { %v2065_v31 = vpop.f32.mrf.mxu1 }
 0x23e   : > { %v2133_v33 = vmax.f32 %v2062_v3, 0.0  ;;  %v2166_v46 = vpack.c.bf16 %v2132_v28, %v2130_v30  ;;  %v2066_v18 = vadd.f32 %v2065_v31, %v1873_v62 }
 0x23f   : > { %v2067_v5 = vpop.f32.mrf.mxu1 }
 0x240   : > { %v2167_v38 = vpack.c.bf16 %v2133_v33, %v2131_v49  ;;  %v2068_v50 = vadd.f32 %v2067_v5, %v1875_v57  ;;  %v2134_v54 = vmax.f32 %v2066_v18, 0.0 }
 0x241   : > { %v2069_v47 = vpop.f32.mrf.mxu1 }
 0x242   : > { %v2070_v22 = vadd.f32 %v2069_v47, %v1877_v13  ;;  %2449 = vmatprep.mubr.bf16.mxu0 %v2167_v38  ;;  %v2135_v39 = vmax.f32 %v2068_v50, 0.0 }
 0x243   : > { %v2071_v25 = vpop.f32.mrf.mxu1  ;;  %2450 = vmatmul.mubr.bf16.gmra.mxu0 %v2166_v46 }
 0x244   : > { %v2072_v52 = vadd.f32 %v2071_v25, %v1879_v61  ;;  %v2136_v26 = vmax.f32 %v2070_v22, 0.0 }
 0x246   : > { %v2137_v41 = vmax.f32 %v2072_v52, 0.0  ;;  %v2168_v37 = vpack.c.bf16 %v2136_v26, %v2134_v54 }
 0x248   : > { %v2169_v55 = vpack.c.bf16 %v2137_v41, %v2135_v39 }
 0x24a   : > { %2457 = vmatprep.mubr.bf16.mxu0 %v2169_v55 }
 0x24b   : > { %2458 = vmatmul.mubr.bf16.gmra.mxu0 %v2168_v37 }
 0x293   : > { %v3767_v40 = vpop.f32.mrf.mxu0 }
 0x295   : > { %v3768_v42 = vpop.f32.mrf.mxu0 }
 0x296   : > { %v3769_v58 = vadd.f32 %v3768_v42, %v3767_v40 }
 0x297   : > { %v3770_v11 = vpop.f32.mrf.mxu0 }
 0x298   : > { %v2340_v34 = vadd.f32 %v3769_v58, %v5218_v17 }
 0x299   : > { %v3771_v12 = vpop.f32.mrf.mxu0 }
 0x29a   : > { %v3772_v45 = vadd.f32 %v3771_v12, %v3770_v11  ;;  %v2466_v1 = vmax.f32 %v2340_v34, 0.0 }
 0x29b   : > { %v3773_v24 = vpop.f32.mrf.mxu0 }
 0x29c   : > { %v2343_v53 = vadd.f32 %v3772_v45, %v5218_v17 }
 0x29d   : > { %v3774_v23 = vpop.f32.mrf.mxu0 }
 0x29e   : > { %v2467_v2 = vmax.f32 %v2343_v53, 0.0  ;;  %v3775_v36 = vadd.f32 %v3774_v23, %v3773_v24 }
 0x29f   : > { %v3776_v35 = vpop.f32.mrf.mxu0 }
 0x2a0   : > { %v2498_v19 = vpack.c.bf16 %v2467_v2, %v2466_v1  ;;  %v2348_v48 = vadd.f32 %v3775_v36, %v5218_v17 }
 0x2a1   : > { %v3777_v44 = vpop.f32.mrf.mxu0 }
 0x2a2   : > { %v3778_v29 = vadd.f32 %v3777_v44, %v3776_v35  ;;  %3959 = vmatprep.mubr.bf16.mxu1 %v2498_v19  ;;  %v2468_v59 = vmax.f32 %v2348_v48, 0.0 }
 0x2a3   : > { %v3779_v51 = vpop.f32.mrf.mxu0 }
 0x2a4   : > { %v2351_v10 = vadd.f32 %v3778_v29, %v5218_v17 }
 0x2a5   : > { %v3780_v32 = vpop.f32.mrf.mxu0 }
 0x2a6   : > { %v2469_v14 = vmax.f32 %v2351_v10, 0.0  ;;  %v3781_v6 = vadd.f32 %v3780_v32, %v3779_v51 }
 0x2a7   : > { %v3782_v15 = vpop.f32.mrf.mxu0 }
 0x2a8   : > { %v2499_v21 = vpack.c.bf16 %v2469_v14, %v2468_v59  ;;  %v2356_v60 = vadd.f32 %v3781_v6, %v5218_v17 }
 0x2a9   : > { %v3783_v20 = vpop.f32.mrf.mxu0 }
 0x2aa   : > { %v3784_v0 = vadd.f32 %v3783_v20, %v3782_v15  ;;  %3960 = vmatmul.mubr.bf16.vlgmr.msra.gmra.mxu1 %v2499_v21  ;;  %v2470_v27 = vmax.f32 %v2356_v60, 0.0 }
 0x2ab   : > { %v3785_v56 = vpop.f32.mrf.mxu0  ;;  %3992 = vmatpush3.bf16.msra.mxu1 %v4238_v43 }
 0x2ac   : > { %v2359_v63 = vadd.f32 %v3784_v0, %v5218_v17 }
 0x2ad   : > { %v3786_v4 = vpop.f32.mrf.mxu0 }
 0x2ae   : > { %v2471_v3 = vmax.f32 %v2359_v63, 0.0  ;;  %v3787_v28 = vadd.f32 %v3786_v4, %v3785_v56 }
 0x2af   : > { %v3788_v31 = vpop.f32.mrf.mxu0 }
 0x2b0   : > { %v2500_v49 = vpack.c.bf16 %v2471_v3, %v2470_v27  ;;  %v2364_v9 = vadd.f32 %v3787_v28, %v5218_v17 }
 0x2b1   : > { %v3789_v33 = vpop.f32.mrf.mxu0 }
 0x2b2   : > { %v3790_v30 = vadd.f32 %v3789_v33, %v3788_v31  ;;  %3963 = vmatprep.mubr.bf16.mxu1 %v2500_v49  ;;  %v2472_v38 = vmax.f32 %v2364_v9, 0.0 }
 0x2b3   : > { %v3791_v5 = vpop.f32.mrf.mxu0 }
 0x2b4   : > { %v2367_v57 = vadd.f32 %v3790_v30, %v5218_v17 }
 0x2b5   : > { %v3792_v13 = vpop.f32.mrf.mxu0 }
 0x2b6   : > { %v2473_v62 = vmax.f32 %v2367_v57, 0.0  ;;  %v3793_v46 = vadd.f32 %v3792_v13, %v3791_v5 }
 0x2b7   : > { %v3794_v47 = vpop.f32.mrf.mxu0 }
 0x2b8   : > { %v2501_v61 = vpack.c.bf16 %v2473_v62, %v2472_v38  ;;  %v2372_v22 = vadd.f32 %v3793_v46, %v5218_v17 }
 0x2b9   : > { %v3795_v50 = vpop.f32.mrf.mxu0 }
 0x2ba   : > { %v3796_v18 = vadd.f32 %v3795_v50, %v3794_v47  ;;  %3964 = vmatmul.mubr.bf16.gmra.mxu1 %v2501_v61  ;;  %v2474_v39 = vmax.f32 %v2372_v22, 0.0 }
 0x2bb   : > { %v3797_v25 = vpop.f32.mrf.mxu0 }
 0x2bc   : > { %v2375_v52 = vadd.f32 %v3796_v18, %v5218_v17 }
 0x2bd   : > { %v3798_v26 = vpop.f32.mrf.mxu0 }
 0x2be   : > { %v2475_v41 = vmax.f32 %v2375_v52, 0.0  ;;  %v3799_v54 = vadd.f32 %v3798_v26, %v3797_v25 }
 0x2bf   : > { %v3800_v55 = vpop.f32.mrf.mxu0 }
 0x2c0   : > { %v2502_v37 = vpack.c.bf16 %v2475_v41, %v2474_v39  ;;  %v2380_v42 = vadd.f32 %v3799_v54, %v5218_v17 }
 0x2c1   : > { %v3801_v40 = vpop.f32.mrf.mxu0 }
 0x2c2   : > { %v3802_v58 = vadd.f32 %v3801_v40, %v3800_v55  ;;  %3967 = vmatprep.mubr.bf16.mxu1 %v2502_v37  ;;  %v2476_v45 = vmax.f32 %v2380_v42, 0.0  ;;  %v4239_v37 = vld [vmem:[%s5491_s9 + $0x10] sm:$0xff]  }
 0x2c3   : > { %v3803_v11 = vpop.f32.mrf.mxu0  ;;  %3993 = vmatprep.subr.bf16.mxu1 %v4239_v37 }
 0x2c4   : > { %v2383_v12 = vadd.f32 %v3802_v58, %v5218_v17  ;;  %3994 = vmatpush3.bf16.msra.mxu1 %v4239_v37 }
 0x2c5   : > { %v3804_v34 = vpop.f32.mrf.mxu0 }
 0x2c6   : > { %v2477_v43 = vmax.f32 %v2383_v12, 0.0  ;;  %v3805_v24 = vadd.f32 %v3804_v34, %v3803_v11 }
 0x2c7   : > { %v3806_v53 = vpop.f32.mrf.mxu0 }
 0x2c8   : > { %v2503_v23 = vpack.c.bf16 %v2477_v43, %v2476_v45  ;;  %v2388_v2 = vadd.f32 %v3805_v24, %v5218_v17  ;;  %v4240_v45 = vld [vmem:[%s5491_s9 + $0x8] sm:$0xff]  }
 0x2c9   : > { %v3807_v1 = vpop.f32.mrf.mxu0  ;;  %3995 = vmatprep.subr.bf16.mxu1 %v4240_v45 }
 0x2ca   : > { %v3808_v36 = vadd.f32 %v3807_v1, %v3806_v53  ;;  %3968 = vmatmul.mubr.bf16.gmra.mxu1 %v2503_v23  ;;  %v2478_v48 = vmax.f32 %v2388_v2, 0.0  ;;  %v4241_v2 = vld [vmem:[%s5491_s9] sm:$0xff]  }
 0x2cb   : > { %v3809_v35 = vpop.f32.mrf.mxu0  ;;  %3996 = vmatpush3.bf16.msra.mxu1 %v4240_v45 }
 0x2cc   : > { %v2391_v19 = vadd.f32 %v3808_v36, %v5218_v17  ;;  %3997 = vmatprep.subr.bf16.mxu1 %v4241_v2 }
 0x2cd   : > { %v3810_v44 = vpop.f32.mrf.mxu0 }
 0x2ce   : > { %v2479_v29 = vmax.f32 %v2391_v19, 0.0  ;;  %v3811_v51 = vadd.f32 %v3810_v44, %v3809_v35 }
 0x2cf   : > { %v3812_v10 = vpop.f32.mrf.mxu0  ;;  %3998 = vmatpush3.bf16.msra.mxu1 %v4241_v2 }
 0x2d0   : > { %v2504_v32 = vpack.c.bf16 %v2479_v29, %v2478_v48  ;;  %v2396_v14 = vadd.f32 %v3811_v51, %v5218_v17 }
 0x2d1   : > { %v3813_v59 = vpop.f32.mrf.mxu0 }
 0x2d2   : > { %v3814_v6 = vadd.f32 %v3813_v59, %v3812_v10  ;;  %3971 = vmatprep.mubr.bf16.mxu1 %v2504_v32  ;;  %v2480_v60 = vmax.f32 %v2396_v14, 0.0 }
 0x2d3   : > { %v3815_v15 = vpop.f32.mrf.mxu0 }
 0x2d4   : > { %v2399_v21 = vadd.f32 %v3814_v6, %v5218_v17 }
 0x2d5   : > { %v3816_v20 = vpop.f32.mrf.mxu0 }
 0x2d6   : > { %v2481_v0 = vmax.f32 %v2399_v21, 0.0  ;;  %v3817_v56 = vadd.f32 %v3816_v20, %v3815_v15 }
 0x2d7   : > { %v3818_v63 = vpop.f32.mrf.mxu0 }
 0x2d8   : > { %v2505_v4 = vpack.c.bf16 %v2481_v0, %v2480_v60  ;;  %v2404_v3 = vadd.f32 %v3817_v56, %v5218_v17 }
 0x2d9   : > { %v3819_v27 = vpop.f32.mrf.mxu0 }
 0x2da   : > { %v3820_v28 = vadd.f32 %v3819_v27, %v3818_v63  ;;  %3972 = vmatmul.mubr.bf16.gmra.mxu1 %v2505_v4  ;;  %v2482_v9 = vmax.f32 %v2404_v3, 0.0 }
 0x2db   : > { %v3821_v31 = vpop.f32.mrf.mxu0 }
 0x2dc   : > { %v2407_v49 = vadd.f32 %v3820_v28, %v5218_v17 }
 0x2dd   : > { %v3822_v33 = vpop.f32.mrf.mxu0 }
 0x2de   : > { %v2483_v30 = vmax.f32 %v2407_v49, 0.0  ;;  %v3823_v5 = vadd.f32 %v3822_v33, %v3821_v31 }
 0x2df   : > { %v3824_v57 = vpop.f32.mrf.mxu0 }
 0x2e0   : > { %v2506_v13 = vpack.c.bf16 %v2483_v30, %v2482_v9  ;;  %v2412_v62 = vadd.f32 %v3823_v5, %v5218_v17 }
 0x2e1   : > { %v3825_v38 = vpop.f32.mrf.mxu0 }
 0x2e2   : > { %v3826_v46 = vadd.f32 %v3825_v38, %v3824_v57  ;;  %3975 = vmatprep.mubr.bf16.mxu1 %v2506_v13  ;;  %v2484_v22 = vmax.f32 %v2412_v62, 0.0 }
 0x2e3   : > { %v3827_v47 = vpop.f32.mrf.mxu0 }
 0x2e4   : > { %v2415_v61 = vadd.f32 %v3826_v46, %v5218_v17 }
 0x2e5   : > { %v3828_v50 = vpop.f32.mrf.mxu0 }
 0x2e6   : > { %v2485_v18 = vmax.f32 %v2415_v61, 0.0  ;;  %v3829_v25 = vadd.f32 %v3828_v50, %v3827_v47 }
 0x2e7   : > { %v3830_v52 = vpop.f32.mrf.mxu0 }
 0x2e8   : > { %v2507_v26 = vpack.c.bf16 %v2485_v18, %v2484_v22  ;;  %v2420_v41 = vadd.f32 %v3829_v25, %v5218_v17 }
 0x2e9   : > { %v3831_v39 = vpop.f32.mrf.mxu0 }
 0x2ea   : > { %v3832_v54 = vadd.f32 %v3831_v39, %v3830_v52  ;;  %3976 = vmatmul.mubr.bf16.gmra.mxu1 %v2507_v26  ;;  %v2486_v58 = vmax.f32 %v2420_v41, 0.0 }
 0x2eb   : > { %v3833_v55 = vpop.f32.mrf.mxu0 }
 0x2ec   : > { %v2423_v40 = vadd.f32 %v3832_v54, %v5218_v17 }
 0x2ed   : > { %v3834_v42 = vpop.f32.mrf.mxu0 }
 0x2ee   : > { %v2487_v11 = vmax.f32 %v2423_v40, 0.0  ;;  %v3835_v12 = vadd.f32 %v3834_v42, %v3833_v55  ;;  %v4242_v40 = vld [vmem:[%s5493_s11 + $0x8] sm:$0xff]  }
 0x2ef   : > { %v3836_v34 = vpop.f32.mrf.mxu0  ;;  %4031 = vmatprep.subr.bf16.mxu0 %v4242_v40 }
 0x2f0   : > { %v2508_v43 = vpack.c.bf16 %v2487_v11, %v2486_v58  ;;  %v2428_v53 = vadd.f32 %v3835_v12, %v5218_v17  ;;  %4032 = vmatpush3.bf16.msra.mxu0 %v4242_v40  ;;  %v5270_v11 = vld [vmem:[%s5490_s8] ss:$0 sm:$0xff] }
 0x2f1   : > { %v3837_v24 = vpop.f32.mrf.mxu0 }
 0x2f2   : > { %v3838_v23 = vadd.f32 %v3837_v24, %v3836_v34  ;;  %3979 = vmatprep.mubr.bf16.mxu1 %v2508_v43  ;;  %v2488_v19 = vmax.f32 %v2428_v53, 0.0 }
 0x2f3   : > { %v3839_v1 = vpop.f32.mrf.mxu0 }
 0x2f4   : > { %v2431_v36 = vadd.f32 %v3838_v23, %v5218_v17 }
 0x2f5   : > { %v3840_v35 = vpop.f32.mrf.mxu0 }
 0x2f6   : > { %v2489_v44 = vmax.f32 %v2431_v36, 0.0  ;;  %v3841_v48 = vadd.f32 %v3840_v35, %v3839_v1 }
 0x2f7   : > { %v3842_v29 = vpop.f32.mrf.mxu0 }
 0x2f8   : > { %v2509_v51 = vpack.c.bf16 %v2489_v44, %v2488_v19  ;;  %v2436_v32 = vadd.f32 %v3841_v48, %v5218_v17 }
 0x2f9   : > { %v3843_v10 = vpop.f32.mrf.mxu0 }
 0x2fa   : > { %v3844_v59 = vadd.f32 %v3843_v10, %v3842_v29  ;;  %3980 = vmatmul.mubr.bf16.gmra.mxu1 %v2509_v51  ;;  %v2490_v21 = vmax.f32 %v2436_v32, 0.0 }
 0x2fb   : > { %v3845_v14 = vpop.f32.mrf.mxu0 }
 0x2fc   : > { %v2439_v6 = vadd.f32 %v3844_v59, %v5218_v17 }
 0x2fd   : > { %v3846_v15 = vpop.f32.mrf.mxu0 }
 0x2fe   : > { %v2491_v20 = vmax.f32 %v2439_v6, 0.0  ;;  %v3847_v60 = vadd.f32 %v3846_v15, %v3845_v14 }
 0x2ff   : > { %v3848_v0 = vpop.f32.mrf.mxu0 }
 0x300   : > { %v2510_v56 = vpack.c.bf16 %v2491_v20, %v2490_v21  ;;  %v2444_v4 = vadd.f32 %v3847_v60, %v5218_v17 }
 0x301   : > { %v3849_v63 = vpop.f32.mrf.mxu0 }
 0x302   : > { %v3850_v27 = vadd.f32 %v3849_v63, %v3848_v0  ;;  %3983 = vmatprep.mubr.bf16.mxu1 %v2510_v56  ;;  %v2492_v49 = vmax.f32 %v2444_v4, 0.0 }
 0x303   : > { %v3851_v3 = vpop.f32.mrf.mxu0 }
 0x304   : > { %v2447_v28 = vadd.f32 %v3850_v27, %v5218_v17 }
 0x305   : > { %v3852_v31 = vpop.f32.mrf.mxu0 }
 0x306   : > { %v2493_v33 = vmax.f32 %v2447_v28, 0.0  ;;  %v3853_v9 = vadd.f32 %v3852_v31, %v3851_v3 }
 0x307   : > { %v3854_v30 = vpop.f32.mrf.mxu0 }
 0x308   : > { %v2511_v5 = vpack.c.bf16 %v2493_v33, %v2492_v49  ;;  %v2452_v13 = vadd.f32 %v3853_v9, %v5218_v17 }
 0x309   : > { %v3855_v57 = vpop.f32.mrf.mxu0 }
 0x30a   : > { %v3856_v38 = vadd.f32 %v3855_v57, %v3854_v30  ;;  %3984 = vmatmul.mubr.bf16.gmra.mxu1 %v2511_v5  ;;  %v2494_v61 = vmax.f32 %v2452_v13, 0.0 }
 0x30b   : > { %v3857_v62 = vpop.f32.mrf.mxu0 }
 0x30c   : > { %v2455_v46 = vadd.f32 %v3856_v38, %v5218_v17 }
 0x30d   : > { %v3858_v47 = vpop.f32.mrf.mxu0 }
 0x30e   : > { %v2495_v50 = vmax.f32 %v2455_v46, 0.0  ;;  %v3859_v22 = vadd.f32 %v3858_v47, %v3857_v62 }
 0x30f   : > { %v3860_v18 = vpop.f32.mrf.mxu0 }
 0x310   : > { %v2512_v25 = vpack.c.bf16 %v2495_v50, %v2494_v61  ;;  %v2460_v26 = vadd.f32 %v3859_v22, %v5218_v17 }
 0x311   : > { %v3861_v52 = vpop.f32.mrf.mxu0 }
 0x312   : > { %v3862_v39 = vadd.f32 %v3861_v52, %v3860_v18  ;;  %3987 = vmatprep.mubr.bf16.mxu1 %v2512_v25  ;;  %v2496_v54 = vmax.f32 %v2460_v26, 0.0 }
 0x314   : > { %v2463_v41 = vadd.f32 %v3862_v39, %v5218_v17 }
 0x316   : > { %v2497_v55 = vmax.f32 %v2463_v41, 0.0 }
 0x318   : > { %v2513_v37 = vpack.c.bf16 %v2497_v55, %v2496_v54 }
 0x31a   : > { %3988 = vmatmul.mubr.bf16.gmra.mxu1 %v2513_v37 }
 0x36a   : > { %v3961_v42 = vpop.f32.mrf.mxu1 }
 0x36b   : > { %v2628_v45 = vadd.f32 %v3961_v42, %v5270_v11 }
 0x36c   : > { %v2619_v58 = vpop.f32.mrf.mxu1 }
 0x36d   : > { %v2620_v17 = vadd.f32 %v5270_v11, %v2619_v58  ;;  %v2748_v2 = vmax.f32 %v2628_v45, 0.0 }
 0x36e   : > { %v3962_v12 = vpop.f32.mrf.mxu1 }
 0x36f   : > { %v2631_v34 = vadd.f32 %v3962_v12, %v5270_v11  ;;  %v2746_v23 = vmax.f32 %v2620_v17, 0.0 }
 0x370   : > { %v2622_v43 = vpop.f32.mrf.mxu1 }
 0x371   : > { %v2623_v24 = vadd.f32 %v5270_v11, %v2622_v43  ;;  %v2749_v53 = vmax.f32 %v2631_v34, 0.0 }
 0x373   : > { %v2747_v1 = vmax.f32 %v2623_v24, 0.0  ;;  %v2779_v35 = vpack.c.bf16 %v2749_v53, %v2748_v2 }
 0x375   : > { %v2778_v36 = vpack.c.bf16 %v2747_v1, %v2746_v23 }
 0x377   : > { %3999 = vmatprep.mubr.msk.bf16.mxu1 %vm665_vm0, %v2778_v36 }
 0x378   : > { %4000 = vmatmul.mubr.msk.bf16.vlgmr.msra.gmra.mxu1 %vm665_vm0, %v2779_v35 }
 0x37a   : > { %v3965_v19 = vpop.f32.mrf.mxu1 }
 0x37b   : > { %v2644_v10 = vadd.f32 %v3965_v19, %v5270_v11 }
 0x37c   : > { %v2635_v44 = vpop.f32.mrf.mxu1 }
 0x37d   : > { %v2636_v29 = vadd.f32 %v5270_v11, %v2635_v44  ;;  %v2752_v21 = vmax.f32 %v2644_v10, 0.0 }
 0x37e   : > { %v3966_v48 = vpop.f32.mrf.mxu1 }
 0x37f   : > { %v2647_v51 = vadd.f32 %v3966_v48, %v5270_v11  ;;  %v2750_v6 = vmax.f32 %v2636_v29, 0.0 }
 0x380   : > { %v2638_v32 = vpop.f32.mrf.mxu1 }
 0x381   : > { %v2639_v59 = vadd.f32 %v5270_v11, %v2638_v32  ;;  %v2753_v14 = vmax.f32 %v2647_v51, 0.0  ;;  %v4243_v51 = vld [vmem:[%s5493_s11] sm:$0xff]  }
 0x382   : > { %4033 = vmatprep.subr.bf16.mxu0 %v4243_v51 }
 0x383   : > { %v2751_v15 = vmax.f32 %v2639_v59, 0.0  ;;  %v2781_v60 = vpack.c.bf16 %v2753_v14, %v2752_v21  ;;  %4034 = vmatpush3.bf16.msra.mxu0 %v4243_v51 }
 0x385   : > { %v2780_v20 = vpack.c.bf16 %v2751_v15, %v2750_v6 }
 0x387   : > { %4003 = vmatprep.mubr.msk.bf16.mxu1 %vm665_vm0, %v2780_v20 }
 0x388   : > { %4004 = vmatmul.mubr.msk.bf16.gmra.mxu1 %vm665_vm0, %v2781_v60 }
 0x38a   : > { %v3969_v0 = vpop.f32.mrf.mxu1 }
 0x38b   : > { %v2660_v3 = vadd.f32 %v3969_v0, %v5270_v11 }
 0x38c   : > { %v2651_v56 = vpop.f32.mrf.mxu1 }
 0x38d   : > { %v2652_v4 = vadd.f32 %v5270_v11, %v2651_v56  ;;  %v2756_v30 = vmax.f32 %v2660_v3, 0.0 }
 0x38e   : > { %v3970_v63 = vpop.f32.mrf.mxu1 }
 0x38f   : > { %v2663_v27 = vadd.f32 %v3970_v63, %v5270_v11  ;;  %v2754_v33 = vmax.f32 %v2652_v4, 0.0 }
 0x390   : > { %v2654_v28 = vpop.f32.mrf.mxu1 }
 0x391   : > { %v2655_v31 = vadd.f32 %v5270_v11, %v2654_v28  ;;  %v2757_v49 = vmax.f32 %v2663_v27, 0.0 }
 0x393   : > { %v2755_v9 = vmax.f32 %v2655_v31, 0.0  ;;  %v2783_v57 = vpack.c.bf16 %v2757_v49, %v2756_v30 }
 0x395   : > { %v2782_v5 = vpack.c.bf16 %v2755_v9, %v2754_v33 }
 0x397   : > { %4007 = vmatprep.mubr.msk.bf16.mxu1 %vm665_vm0, %v2782_v5 }
 0x398   : > { %4008 = vmatmul.mubr.msk.bf16.gmra.mxu1 %vm665_vm0, %v2783_v57 }
 0x39a   : > { %v3973_v13 = vpop.f32.mrf.mxu1 }
 0x39b   : > { %v2676_v61 = vadd.f32 %v3973_v13, %v5270_v11 }
 0x39c   : > { %v2667_v38 = vpop.f32.mrf.mxu1 }
 0x39d   : > { %v2668_v46 = vadd.f32 %v5270_v11, %v2667_v38  ;;  %v2760_v26 = vmax.f32 %v2676_v61, 0.0 }
 0x39e   : > { %v3974_v62 = vpop.f32.mrf.mxu1 }
 0x39f   : > { %v2679_v47 = vadd.f32 %v3974_v62, %v5270_v11  ;;  %v2758_v25 = vmax.f32 %v2668_v46, 0.0 }
 0x3a0   : > { %v2670_v50 = vpop.f32.mrf.mxu1 }
 0x3a1   : > { %v2671_v22 = vadd.f32 %v5270_v11, %v2670_v50  ;;  %v2761_v18 = vmax.f32 %v2679_v47, 0.0 }
 0x3a3   : > { %v2759_v52 = vmax.f32 %v2671_v22, 0.0  ;;  %v2785_v41 = vpack.c.bf16 %v2761_v18, %v2760_v26 }
 0x3a5   : > { %v2784_v39 = vpack.c.bf16 %v2759_v52, %v2758_v25 }
 0x3a7   : > { %4011 = vmatprep.mubr.msk.bf16.mxu1 %vm665_vm0, %v2784_v39 }
 0x3a8   : > { %4012 = vmatmul.mubr.msk.bf16.gmra.mxu1 %vm665_vm0, %v2785_v41  ;;  %v5326_v41 = vld [vmem:[%s5492_s10] ss:$0 sm:$0xff] }
 0x3aa   : > { %v3977_v54 = vpop.f32.mrf.mxu1 }
 0x3ab   : > { %v2692_v58 = vadd.f32 %v3977_v54, %v5270_v11 }
 0x3ac   : > { %v2683_v55 = vpop.f32.mrf.mxu1 }
 0x3ad   : > { %v2684_v40 = vadd.f32 %v5270_v11, %v2683_v55  ;;  %v2764_v24 = vmax.f32 %v2692_v58, 0.0 }
 0x3ae   : > { %v3978_v37 = vpop.f32.mrf.mxu1 }
 0x3af   : > { %v2695_v42 = vadd.f32 %v3978_v37, %v5270_v11  ;;  %v2762_v45 = vmax.f32 %v2684_v40, 0.0 }
 0x3b0   : > { %v2686_v12 = vpop.f32.mrf.mxu1 }
 0x3b1   : > { %v2687_v17 = vadd.f32 %v5270_v11, %v2686_v12  ;;  %v2765_v34 = vmax.f32 %v2695_v42, 0.0 }
 0x3b3   : > { %v2763_v43 = vmax.f32 %v2687_v17, 0.0  ;;  %v2787_v23 = vpack.c.bf16 %v2765_v34, %v2764_v24 }
 0x3b5   : > { %v2786_v53 = vpack.c.bf16 %v2763_v43, %v2762_v45 }
 0x3b7   : > { %4015 = vmatprep.mubr.msk.bf16.mxu1 %vm665_vm0, %v2786_v53 }
 0x3b8   : > { %4016 = vmatmul.mubr.msk.bf16.gmra.mxu1 %vm665_vm0, %v2787_v23 }
 0x3ba   : > { %v3981_v1 = vpop.f32.mrf.mxu1 }
 0x3bb   : > { %v2708_v44 = vadd.f32 %v3981_v1, %v5270_v11 }
 0x3bc   : > { %v2699_v2 = vpop.f32.mrf.mxu1 }
 0x3bd   : > { %v2700_v35 = vadd.f32 %v5270_v11, %v2699_v2  ;;  %v2768_v14 = vmax.f32 %v2708_v44, 0.0 }
 0x3be   : > { %v3982_v36 = vpop.f32.mrf.mxu1 }
 0x3bf   : > { %v2711_v19 = vadd.f32 %v3982_v36, %v5270_v11  ;;  %v2766_v32 = vmax.f32 %v2700_v35, 0.0 }
 0x3c0   : > { %v2702_v48 = vpop.f32.mrf.mxu1 }
 0x3c1   : > { %v2703_v29 = vadd.f32 %v5270_v11, %v2702_v48  ;;  %v2769_v10 = vmax.f32 %v2711_v19, 0.0 }
 0x3c3   : > { %v2767_v59 = vmax.f32 %v2703_v29, 0.0  ;;  %v2789_v15 = vpack.c.bf16 %v2769_v10, %v2768_v14 }
 0x3c5   : > { %v2788_v6 = vpack.c.bf16 %v2767_v59, %v2766_v32 }
 0x3c7   : > { %4019 = vmatprep.mubr.msk.bf16.mxu1 %vm665_vm0, %v2788_v6 }
 0x3c8   : > { %4020 = vmatmul.mubr.msk.bf16.gmra.mxu1 %vm665_vm0, %v2789_v15 }
 0x3ca   : > { %v3985_v21 = vpop.f32.mrf.mxu1 }
 0x3cb   : > { %v2724_v63 = vadd.f32 %v3985_v21, %v5270_v11 }
 0x3cc   : > { %v2715_v20 = vpop.f32.mrf.mxu1 }
 0x3cd   : > { %v2716_v0 = vadd.f32 %v5270_v11, %v2715_v20  ;;  %v2772_v49 = vmax.f32 %v2724_v63, 0.0 }
 0x3ce   : > { %v3986_v60 = vpop.f32.mrf.mxu1 }
 0x3cf   : > { %v2727_v56 = vadd.f32 %v3986_v60, %v5270_v11  ;;  %v2770_v28 = vmax.f32 %v2716_v0, 0.0 }
 0x3d0   : > { %v2718_v4 = vpop.f32.mrf.mxu1 }
 0x3d1   : > { %v2719_v27 = vadd.f32 %v5270_v11, %v2718_v4  ;;  %v2773_v3 = vmax.f32 %v2727_v56, 0.0 }
 0x3d3   : > { %v2771_v31 = vmax.f32 %v2719_v27, 0.0  ;;  %v2791_v9 = vpack.c.bf16 %v2773_v3, %v2772_v49 }
 0x3d5   : > { %v2790_v33 = vpack.c.bf16 %v2771_v31, %v2770_v28 }
 0x3d7   : > { %4023 = vmatprep.mubr.msk.bf16.mxu1 %vm665_vm0, %v2790_v33 }
 0x3d8   : > { %4024 = vmatmul.mubr.msk.bf16.gmra.mxu1 %vm665_vm0, %v2791_v9 }
 0x3da   : > { %v3989_v30 = vpop.f32.mrf.mxu1 }
 0x3db   : > { %v2740_v62 = vadd.f32 %v3989_v30, %v5270_v11 }
 0x3dc   : > { %v2731_v5 = vpop.f32.mrf.mxu1 }
 0x3dd   : > { %v2732_v13 = vadd.f32 %v5270_v11, %v2731_v5  ;;  %v2776_v18 = vmax.f32 %v2740_v62, 0.0 }
 0x3de   : > { %v3990_v57 = vpop.f32.mrf.mxu1 }
 0x3df   : > { %v2743_v38 = vadd.f32 %v3990_v57, %v5270_v11  ;;  %v2774_v50 = vmax.f32 %v2732_v13, 0.0 }
 0x3e0   : > { %v2734_v46 = vpop.f32.mrf.mxu1 }
 0x3e1   : > { %v2735_v47 = vadd.f32 %v5270_v11, %v2734_v46  ;;  %v2777_v61 = vmax.f32 %v2743_v38, 0.0 }
 0x3e3   : > { %v2775_v22 = vmax.f32 %v2735_v47, 0.0  ;;  %v2793_v52 = vpack.c.bf16 %v2777_v61, %v2776_v18 }
 0x3e5   : > { %v2792_v25 = vpack.c.bf16 %v2775_v22, %v2774_v50 }
 0x3e7   : > { %4027 = vmatprep.mubr.msk.bf16.mxu1 %vm665_vm0, %v2792_v25 }
 0x3e8   : > { %4028 = vmatmul.mubr.msk.bf16.gmra.mxu1 %vm665_vm0, %v2793_v52 }
 0x438   : > { %v4001_v26 = vpop.f32.mrf.mxu1 }
 0x439   : > { %v2924_v37 = vadd.f32 %v4001_v26, %v5326_v41 }
 0x43a   : > { %v2915_v39 = vpop.f32.mrf.mxu1 }
 0x43b   : > { %v2916_v11 = vadd.f32 %v5326_v41, %v2915_v39  ;;  %v3044_v34 = vmax.f32 %v2924_v37, 0.0 }
 0x43c   : > { %v4002_v54 = vpop.f32.mrf.mxu1 }
 0x43d   : > { %v2927_v55 = vadd.f32 %v4002_v54, %v5326_v41  ;;  %v3042_v12 = vmax.f32 %v2916_v11, 0.0 }
 0x43e   : > { %v2918_v40 = vpop.f32.mrf.mxu1 }
 0x43f   : > { %v2919_v42 = vadd.f32 %v5326_v41, %v2918_v40  ;;  %v3045_v58 = vmax.f32 %v2927_v55, 0.0 }
 0x441   : > { %v3043_v17 = vmax.f32 %v2919_v42, 0.0  ;;  %v3075_v43 = vpack.c.bf16 %v3045_v58, %v3044_v34 }
 0x443   : > { %v3074_v45 = vpack.c.bf16 %v3043_v17, %v3042_v12 }
 0x445   : > { %4035 = vmatprep.mubr.msk.bf16.mxu0 %vm3113_vm1, %v3074_v45 }
 0x446   : > { %4036 = vmatmul.mubr.msk.bf16.vlgmr.msra.gmra.mxu0 %vm3113_vm1, %v3075_v43 }
 0x448   : > { %v4005_v24 = vpop.f32.mrf.mxu1 }
 0x449   : > { %v2940_v36 = vadd.f32 %v4005_v24, %v5326_v41 }
 0x44a   : > { %v2931_v53 = vpop.f32.mrf.mxu1 }
 0x44b   : > { %v2932_v1 = vadd.f32 %v5326_v41, %v2931_v53  ;;  %v3048_v51 = vmax.f32 %v2940_v36, 0.0 }
 0x44c   : > { %v4006_v23 = vpop.f32.mrf.mxu1 }
 0x44d   : > { %v2943_v2 = vadd.f32 %v4006_v23, %v5326_v41  ;;  %v3046_v48 = vmax.f32 %v2932_v1, 0.0 }
 0x44e   : > { %v2934_v35 = vpop.f32.mrf.mxu1 }
 0x44f   : > { %v2935_v19 = vadd.f32 %v5326_v41, %v2934_v35  ;;  %v3049_v44 = vmax.f32 %v2943_v2, 0.0 }
 0x451   : > { %v3047_v29 = vmax.f32 %v2935_v19, 0.0  ;;  %v3077_v32 = vpack.c.bf16 %v3049_v44, %v3048_v51 }
 0x453   : > { %v3076_v10 = vpack.c.bf16 %v3047_v29, %v3046_v48 }
 0x455   : > { %4039 = vmatprep.mubr.msk.bf16.mxu0 %vm3113_vm1, %v3076_v10 }
 0x456   : > { %4040 = vmatmul.mubr.msk.bf16.gmra.mxu0 %vm3113_vm1, %v3077_v32 }
 0x458   : > { %v4009_v59 = vpop.f32.mrf.mxu1 }
 0x459   : > { %v2956_v20 = vadd.f32 %v4009_v59, %v5326_v41 }
 0x45a   : > { %v2947_v14 = vpop.f32.mrf.mxu1 }
 0x45b   : > { %v2948_v15 = vadd.f32 %v5326_v41, %v2947_v14  ;;  %v3052_v27 = vmax.f32 %v2956_v20, 0.0 }
 0x45c   : > { %v4010_v6 = vpop.f32.mrf.mxu1 }
 0x45d   : > { %v2959_v21 = vadd.f32 %v4010_v6, %v5326_v41  ;;  %v3050_v63 = vmax.f32 %v2948_v15, 0.0 }
 0x45e   : > { %v2950_v60 = vpop.f32.mrf.mxu1 }
 0x45f   : > { %v2951_v0 = vadd.f32 %v5326_v41, %v2950_v60  ;;  %v3053_v56 = vmax.f32 %v2959_v21, 0.0 }
 0x461   : > { %v3051_v4 = vmax.f32 %v2951_v0, 0.0  ;;  %v3079_v28 = vpack.c.bf16 %v3053_v56, %v3052_v27 }
 0x463   : > { %v3078_v3 = vpack.c.bf16 %v3051_v4, %v3050_v63 }
 0x465   : > { %4043 = vmatprep.mubr.msk.bf16.mxu0 %vm3113_vm1, %v3078_v3 }
 0x466   : > { %4044 = vmatmul.mubr.msk.bf16.gmra.mxu0 %vm3113_vm1, %v3079_v28 }
 0x468   : > { %v4013_v31 = vpop.f32.mrf.mxu1 }
 0x469   : > { %v2972_v5 = vadd.f32 %v4013_v31, %v5326_v41 }
 0x46a   : > { %v2963_v49 = vpop.f32.mrf.mxu1 }
 0x46b   : > { %v2964_v9 = vadd.f32 %v5326_v41, %v2963_v49  ;;  %v3056_v47 = vmax.f32 %v2972_v5, 0.0 }
 0x46c   : > { %v4014_v33 = vpop.f32.mrf.mxu1 }
 0x46d   : > { %v2975_v30 = vadd.f32 %v4014_v33, %v5326_v41  ;;  %v3054_v62 = vmax.f32 %v2964_v9, 0.0 }
 0x46e   : > { %v2966_v57 = vpop.f32.mrf.mxu1 }
 0x46f   : > { %v2967_v13 = vadd.f32 %v5326_v41, %v2966_v57  ;;  %v3057_v38 = vmax.f32 %v2975_v30, 0.0 }
 0x471   : > { %v3055_v46 = vmax.f32 %v2967_v13, 0.0  ;;  %v3081_v50 = vpack.c.bf16 %v3057_v38, %v3056_v47  ;;  %v5379_v47 = vld [vmem:[%s5494_s12] ss:$0 sm:$0xff] }
 0x473   : > { %v3080_v61 = vpack.c.bf16 %v3055_v46, %v3054_v62 }
 0x475   : > { %4047 = vmatprep.mubr.msk.bf16.mxu0 %vm3113_vm1, %v3080_v61 }
 0x476   : > { %4048 = vmatmul.mubr.msk.bf16.gmra.mxu0 %vm3113_vm1, %v3081_v50 }
 0x478   : > { %v4017_v22 = vpop.f32.mrf.mxu1 }
 0x479   : > { %v2988_v39 = vadd.f32 %v4017_v22, %v5326_v41 }
 0x47a   : > { %v2979_v18 = vpop.f32.mrf.mxu1 }
 0x47b   : > { %v2980_v52 = vadd.f32 %v5326_v41, %v2979_v18  ;;  %v3060_v42 = vmax.f32 %v2988_v39, 0.0 }
 0x47c   : > { %v4018_v25 = vpop.f32.mrf.mxu1 }
 0x47d   : > { %v2991_v26 = vadd.f32 %v4018_v25, %v5326_v41  ;;  %v3058_v37 = vmax.f32 %v2980_v52, 0.0 }
 0x47e   : > { %v2982_v54 = vpop.f32.mrf.mxu1 }
 0x47f   : > { %v2983_v11 = vadd.f32 %v5326_v41, %v2982_v54  ;;  %v3061_v55 = vmax.f32 %v2991_v26, 0.0 }
 0x481   : > { %v3059_v40 = vmax.f32 %v2983_v11, 0.0  ;;  %v3083_v12 = vpack.c.bf16 %v3061_v55, %v3060_v42 }
 0x483   : > { %v3082_v58 = vpack.c.bf16 %v3059_v40, %v3058_v37 }
 0x485   : > { %4051 = vmatprep.mubr.msk.bf16.mxu0 %vm3113_vm1, %v3082_v58 }
 0x486   : > { %4052 = vmatmul.mubr.msk.bf16.gmra.mxu0 %vm3113_vm1, %v3083_v12 }
 0x488   : > { %v4021_v17 = vpop.f32.mrf.mxu1 }
 0x489   : > { %v3004_v53 = vadd.f32 %v4021_v17, %v5326_v41 }
 0x48a   : > { %v2995_v34 = vpop.f32.mrf.mxu1 }
 0x48b   : > { %v2996_v43 = vadd.f32 %v5326_v41, %v2995_v34  ;;  %v3064_v19 = vmax.f32 %v3004_v53, 0.0 }
 0x48c   : > { %v4022_v45 = vpop.f32.mrf.mxu1 }
 0x48d   : > { %v3007_v24 = vadd.f32 %v4022_v45, %v5326_v41  ;;  %v3062_v36 = vmax.f32 %v2996_v43, 0.0 }
 0x48e   : > { %v2998_v23 = vpop.f32.mrf.mxu1 }
 0x48f   : > { %v2999_v1 = vadd.f32 %v5326_v41, %v2998_v23  ;;  %v3065_v2 = vmax.f32 %v3007_v24, 0.0 }
 0x491   : > { %v3063_v35 = vmax.f32 %v2999_v1, 0.0  ;;  %v3085_v48 = vpack.c.bf16 %v3065_v2, %v3064_v19 }
 0x493   : > { %v3084_v44 = vpack.c.bf16 %v3063_v35, %v3062_v36 }
 0x495   : > { %4055 = vmatprep.mubr.msk.bf16.mxu0 %vm3113_vm1, %v3084_v44 }
 0x496   : > { %4056 = vmatmul.mubr.msk.bf16.gmra.mxu0 %vm3113_vm1, %v3085_v48 }
 0x498   : > { %v4025_v29 = vpop.f32.mrf.mxu1 }
 0x499   : > { %v3020_v14 = vadd.f32 %v4025_v29, %v5326_v41 }
 0x49a   : > { %v3011_v51 = vpop.f32.mrf.mxu1 }
 0x49b   : > { %v3012_v32 = vadd.f32 %v5326_v41, %v3011_v51  ;;  %v3068_v0 = vmax.f32 %v3020_v14, 0.0  ;;  %v5406_v51 = vld [vmem:[%s5495_s13] sm:$0x1] }
 0x49c   : > { %v4026_v10 = vpop.f32.mrf.mxu1  ;;  %3941 = vmatprep.mubr.msk.bf16.mxu1 %vm3382_vm2, %v5406_v51 }
 0x49d   : > { %v3023_v59 = vadd.f32 %v4026_v10, %v5326_v41  ;;  %v3066_v20 = vmax.f32 %v3012_v32, 0.0 }
 0x49e   : > { %v3014_v6 = vpop.f32.mrf.mxu1 }
 0x49f   : > { %v3015_v15 = vadd.f32 %v5326_v41, %v3014_v6  ;;  %v3069_v21 = vmax.f32 %v3023_v59, 0.0  ;;  %v3372_v59 = vld [vmem:[#allocation2] sm:$0x1] }
 0x4a0   : > { %3375 = vperm.xlu0 %4093, %v3372_v59  }
 0x4a1   : > { %v3067_v60 = vmax.f32 %v3015_v15, 0.0  ;;  %v3087_v63 = vpack.c.bf16 %v3069_v21, %v3068_v0 }
 0x4a3   : > { %v3086_v56 = vpack.c.bf16 %v3067_v60, %v3066_v20 }
 0x4a5   : > { %4059 = vmatprep.mubr.msk.bf16.mxu0 %vm3113_vm1, %v3086_v56 }
 0x4a6   : > { %4060 = vmatmul.mubr.msk.bf16.gmra.mxu0 %vm3113_vm1, %v3087_v63 }
 0x4a8   : > { %v4029_v4 = vpop.f32.mrf.mxu1 }
 0x4a9   : > { %v3036_v49 = vadd.f32 %v4029_v4, %v5326_v41 }
 0x4aa   : > { %v3027_v27 = vpop.f32.mrf.mxu1 }
 0x4ab   : > { %v3028_v28 = vadd.f32 %v5326_v41, %v3027_v27  ;;  %v3072_v13 = vmax.f32 %v3036_v49, 0.0 }
 0x4ac   : > { %v4030_v3 = vpop.f32.mrf.mxu1 }
 0x4ad   : > { %v3039_v31 = vadd.f32 %v4030_v3, %v5326_v41  ;;  %v3070_v5 = vmax.f32 %v3028_v28, 0.0 }
 0x4ae   : > { %v3030_v33 = vpop.f32.mrf.mxu1 }
 0x4af   : > { %v3031_v9 = vadd.f32 %v5326_v41, %v3030_v33  ;;  %v3073_v30 = vmax.f32 %v3039_v31, 0.0 }
 0x4b1   : > { %v3071_v57 = vmax.f32 %v3031_v9, 0.0  ;;  %v3089_v62 = vpack.c.bf16 %v3073_v30, %v3072_v13 }
 0x4b3   : > { %v3088_v38 = vpack.c.bf16 %v3071_v57, %v3070_v5 }
 0x4b5   : > { %4063 = vmatprep.mubr.msk.bf16.mxu0 %vm3113_vm1, %v3088_v38 }
 0x4b6   : > { %4064 = vmatmul.mubr.msk.bf16.gmra.mxu0 %vm3113_vm1, %v3089_v62 }
 0x506   : > { %v4037_v46 = vpop.f32.mrf.mxu0 }
 0x507   : > { %v3205_v50 = vadd.f32 %v4037_v46, %v5379_v47 }
 0x508   : > { %v3196_v61 = vpop.f32.mrf.mxu0 }
 0x509   : > { %v3197_v22 = vadd.f32 %v5379_v47, %v3196_v61  ;;  %v3325_v52 = vmax.f32 %v3205_v50, 0.0 }
 0x50a   : > { %v4038_v41 = vpop.f32.mrf.mxu0 }
 0x50b   : > { %v3208_v18 = vadd.f32 %v4038_v41, %v5379_v47  ;;  %v3323_v54 = vmax.f32 %v3197_v22, 0.0 }
 0x50c   : > { %v3199_v25 = vpop.f32.mrf.mxu0 }
 0x50d   : > { %v3326_v26 = vmax.f32 %v3208_v18, 0.0  ;;  %v3200_v39 = vadd.f32 %v5379_v47, %v3199_v25 }
 0x50f   : > { %v5385_v11 = vpack.c.bf16 %v3326_v26, %v3325_v52  ;;  %v3324_v55 = vmax.f32 %v3200_v39, 0.0 }
 0x511   : > { %v5387_v37 = vpack.c.bf16 %v3324_v55, %v3323_v54 }
 0x516   : > { %v4041_v40 = vpop.f32.mrf.mxu0 }
 0x517   : > { %v3221_v58 = vadd.f32 %v4041_v40, %v5379_v47 }
 0x518   : > { %v3212_v42 = vpop.f32.mrf.mxu0 }
 0x519   : > { %v3213_v17 = vadd.f32 %v5379_v47, %v3212_v42  ;;  %v3329_v43 = vmax.f32 %v3221_v58, 0.0 }
 0x51a   : > { %v4042_v12 = vpop.f32.mrf.mxu0 }
 0x51b   : > { %v3224_v34 = vadd.f32 %v4042_v12, %v5379_v47  ;;  %v3327_v23 = vmax.f32 %v3213_v17, 0.0 }
 0x51c   : > { %v3215_v45 = vpop.f32.mrf.mxu0 }
 0x51d   : > { %v3330_v24 = vmax.f32 %v3224_v34, 0.0  ;;  %v3216_v53 = vadd.f32 %v5379_v47, %v3215_v45 }
 0x51f   : > { %v5393_v1 = vpack.c.bf16 %v3330_v24, %v3329_v43  ;;  %v3328_v2 = vmax.f32 %v3216_v53, 0.0 }
 0x521   : > { %v5395_v36 = vpack.c.bf16 %v3328_v2, %v3327_v23 }
 0x526   : > { %v5397_v35 = vpop.f32.mrf.mxu0 }
 0x528   : > { %v5399_v19 = vpop.f32.mrf.mxu0 }
 0x52a   : > { %v4046_v44 = vpop.f32.mrf.mxu0 }
 0x52b   : > { %v3240_v59 = vadd.f32 %v4046_v44, %v5379_v47 }
 0x52c   : > { %v5401_v48 = vpop.f32.mrf.mxu0 }
 0x52d   : > { %v3232_v44 = vadd.f32 %v5379_v47, %v5401_v48 }
 0x536   : > { %v4049_v29 = vpop.f32.mrf.mxu0 }
 0x537   : > { %v3253_v50 = vadd.f32 %v4049_v29, %v5379_v47 }
 0x538   : > { %v3244_v10 = vpop.f32.mrf.mxu0 }
 0x539   : > { %v3337_v52 = vmax.f32 %v3253_v50, 0.0  ;;  %v3245_v17 = vadd.f32 %v5379_v47, %v3244_v10 }
 0x53a   : > { %v4050_v32 = vpop.f32.mrf.mxu0 }
 0x53b   : > { %v3256_v46 = vadd.f32 %v4050_v32, %v5379_v47  ;;  %v3335_v29 = vmax.f32 %v3245_v17, 0.0 }
 0x53c   : > { %v3247_v14 = vpop.f32.mrf.mxu0 }
 0x53d   : > { %v3338_v22 = vmax.f32 %v3256_v46, 0.0  ;;  %v3248_v54 = vadd.f32 %v5379_v47, %v3247_v14 }
 0x53f   : > { %v3362_v40 = vpack.c.bf16 %v3338_v22, %v3337_v52  ;;  %v3336_v24 = vmax.f32 %v3248_v54, 0.0  ;;  %v3396_v52 = vsel %vm3382_vm2, %v5393_v1, 0  ;;  %v3387_v1 = vsel %vm3382_vm2, %v5387_v37, 0 }
 0x541   : > { %v3408_v2 = vsel %vm3382_vm2, %v3362_v40, 0  ;;  %v3361_v10 = vpack.c.bf16 %v3336_v24, %v3335_v29 }
 0x546   : > { %v4053_v6 = vpop.f32.mrf.mxu0 }
 0x547   : > { %v3269_v21 = vadd.f32 %v4053_v6, %v5379_v47  ;;  %v3237_v6 = vadd.f32 %v5397_v35, %v5379_v47  ;;  %v3229_v35 = vadd.f32 %v5379_v47, %v5399_v19 }
 0x548   : > { %v3260_v15 = vpop.f32.mrf.mxu0 }
 0x549   : > { %v3261_v60 = vadd.f32 %v5379_v47, %v3260_v15  ;;  %v3341_v63 = vmax.f32 %v3269_v21, 0.0  ;;  %v3334_v21 = vmax.f32 %v3240_v59, 0.0  ;;  %v3331_v46 = vmax.f32 %v3229_v35, 0.0 }
 0x54a   : > { %v4054_v20 = vpop.f32.mrf.mxu0 }
 0x54b   : > { %v3272_v0 = vadd.f32 %v4054_v20, %v5379_v47  ;;  %v3339_v3 = vmax.f32 %v3261_v60, 0.0 }
 0x54c   : > { %v3263_v56 = vpop.f32.mrf.mxu0 }
 0x54d   : > { %v3342_v4 = vmax.f32 %v3272_v0, 0.0  ;;  %v3264_v27 = vadd.f32 %v5379_v47, %v3263_v56  ;;  %v3405_v0 = vsel %vm3382_vm2, %v3361_v10, 0  ;;  %v3333_v56 = vmax.f32 %v3237_v6, 0.0 }
 0x54f   : > { %v5414_v28 = vpack.c.bf16 %v3342_v4, %v3341_v63  ;;  %v3340_v31 = vmax.f32 %v3264_v27, 0.0  ;;  %v3360_v4 = vpack.c.bf16 %v3334_v21, %v3333_v56 }
 0x551   : > { %v5416_v49 = vpack.c.bf16 %v3340_v31, %v3339_v3  ;;  %v3332_v31 = vmax.f32 %v3232_v44, 0.0 }
 0x556   : > { %v4057_v33 = vpop.f32.mrf.mxu0 }
 0x558   : > { %v5418_v9 = vpop.f32.mrf.mxu0 }
 0x55a   : > { %v4058_v30 = vpop.f32.mrf.mxu0 }
 0x55c   : > { %v5420_v5 = vpop.f32.mrf.mxu0 }
 0x55d   : > { %v3280_v19 = vadd.f32 %v5379_v47, %v5420_v5  ;;  %v3393_v5 = vsel %vm3382_vm2, %v5395_v36, 0 }
 0x566   : > { %v4061_v57 = vpop.f32.mrf.mxu0 }
 0x567   : > { %v3301_v32 = vadd.f32 %v4061_v57, %v5379_v47  ;;  %v3288_v57 = vadd.f32 %v4058_v30, %v5379_v47  ;;  %v3277_v30 = vadd.f32 %v5379_v47, %v5418_v9  ;;  %v3376_v9 = vpop.permute.xlu0 %3375 }
 0x568   : > { %v3292_v13 = vpop.f32.mrf.mxu0  ;;  %v3381_v36 = vrot.slane %v3376_v9, %v4748_v16 }
 0x569   : > { %v3349_v15 = vmax.f32 %v3301_v32, 0.0  ;;  %v3293_v63 = vadd.f32 %v5379_v47, %v3292_v13  ;;  %v3285_v13 = vadd.f32 %v4057_v33, %v5379_v47  ;;  %v3346_v50 = vmax.f32 %v3288_v57, 0.0 }
 0x56a   : > { %v4062_v38 = vpop.f32.mrf.mxu0 }
 0x56b   : > { %v3304_v53 = vadd.f32 %v4062_v38, %v5379_v47  ;;  %v3347_v3 = vmax.f32 %v3293_v63, 0.0  ;;  %v3345_v48 = vmax.f32 %v3285_v13, 0.0 }
 0x56c   : > { %v3295_v62 = vpop.f32.mrf.mxu0 }
 0x56d   : > { %v3350_v14 = vmax.f32 %v3304_v53, 0.0  ;;  %v3296_v60 = vadd.f32 %v5379_v47, %v3295_v62  ;;  %v3402_v62 = vsel %vm3382_vm2, %v3360_v4, 0 }
 0x56f   : > { %v3368_v20 = vpack.c.bf16 %v3350_v14, %v3349_v15  ;;  %v3348_v27 = vmax.f32 %v3296_v60, 0.0 }
 0x571   : > { %v3367_v38 = vpack.c.bf16 %v3348_v27, %v3347_v3 }
 0x576   : > { %v4065_v61 = vpop.f32.mrf.mxu0 }
 0x577   : > { %v3317_v18 = vadd.f32 %v4065_v61, %v5379_v47  ;;  %v3359_v61 = vpack.c.bf16 %v3332_v31, %v3331_v46 }
 0x578   : > { %v3308_v41 = vpop.f32.mrf.mxu0 }
 0x579   : > { %v3309_v26 = vadd.f32 %v5379_v47, %v3308_v41  ;;  %v3353_v42 = vmax.f32 %v3317_v18, 0.0  ;;  %v3366_v41 = vpack.c.bf16 %v3346_v50, %v3345_v48  ;;  %v3399_v22 = vsel %vm3382_vm2, %v3359_v61, 0 }
 0x57a   : > { %v4066_v25 = vpop.f32.mrf.mxu0  ;;  %v3344_v18 = vmax.f32 %v3280_v19, 0.0 }
 0x57b   : > { %v3320_v39 = vadd.f32 %v4066_v25, %v5379_v47  ;;  %v3351_v34 = vmax.f32 %v3309_v26, 0.0  ;;  %v3343_v25 = vmax.f32 %v3277_v30, 0.0 }
 0x57c   : > { %v3311_v55 = vpop.f32.mrf.mxu0 }
 0x57d   : > { %v3354_v58 = vmax.f32 %v3320_v39, 0.0  ;;  %v3312_v12 = vadd.f32 %v5379_v47, %v3311_v55  ;;  %v3365_v33 = vpack.c.bf16 %v3344_v18, %v3343_v25  ;;  %v3390_v47 = vsel %vm3382_vm2, %v5385_v11, 0 }
 0x57f   : > { %v3370_v45 = vpack.c.bf16 %v3354_v58, %v3353_v42  ;;  %v3352_v43 = vmax.f32 %v3312_v12, 0.0 }
 0x581   : > { %v3369_v23 = vpack.c.bf16 %v3352_v43, %v3351_v34  ;;  %4075 = vmatprep.subr.msk.bf16.mxu1 %vm3382_vm2, %v3370_v45 }
 0x582   : > { %3926 = vmatpush3.bf16.xpose.msra.mxu1 %v3408_v2 }
 0x583   : > { %4076 = vmatprep.subr.msk.bf16.mxu1 %vm3382_vm2, %v3369_v23 }
 0x58a   : > { %3928 = vmatpush3.bf16.xpose.msra.mxu1 %v3405_v0 }
 0x58b   : > { %4077 = vmatprep.subr.msk.bf16.mxu1 %vm3382_vm2, %v3368_v20 }
 0x592   : > { %3930 = vmatpush3.bf16.xpose.msra.mxu1 %v3402_v62 }
 0x593   : > { %4078 = vmatprep.subr.msk.bf16.mxu1 %vm3382_vm2, %v3367_v38 }
 0x59a   : > { %3932 = vmatpush3.bf16.xpose.msra.mxu1 %v3399_v22 }
 0x59b   : > { %4079 = vmatprep.subr.msk.bf16.mxu1 %vm3382_vm2, %v3366_v41 }
 0x5a2   : > { %3934 = vmatpush3.bf16.xpose.msra.mxu1 %v3396_v52 }
 0x5a3   : > { %4080 = vmatprep.subr.msk.bf16.mxu1 %vm3382_vm2, %v3365_v33 }
 0x5aa   : > { %3936 = vmatpush3.bf16.xpose.msra.mxu1 %v3393_v5 }
 0x5ab   : > { %4081 = vmatprep.subr.msk.bf16.mxu1 %vm3382_vm2, %v5414_v28 }
 0x5b2   : > { %3938 = vmatpush3.bf16.xpose.msra.mxu1 %v3390_v47 }
 0x5b3   : > { %4082 = vmatprep.subr.msk.bf16.mxu1 %vm3382_vm2, %v5416_v49 }
 0x5ba   : > { %3940 = vmatpush3.bf16.xpose.msra.mxu1 %v3387_v1 }
 0x5c1   : > { %3942 = vmatmul.mubr.msk.bf16.vlgmr.msra.gmra.mxu1 %vm3382_vm2, %v5406_v51  ;;  %v4261_v51 = vmov 1966171168  }
 0x5c2   : > { %v3491_v17 = vunpack.c.l.s4 %v4261_v51 }
 0x5c4   : > { %v3492_v16 = vunpack.c.0.s8 %v3491_v17 }
 0x5c6   : > { %v3495_v45 = vsub.s32 %v3492_v16, %v4742_v8 }
 0x681   : > { %v3468_v26 = vpop.f32.mrf.mxu1 }
 0x682   : > { %v3469_v39 = vadd.f32 %v3468_v26, %v3381_v36 }
 0x683   : > { %v3470_v28 = vpop.f32.mrf.mxu1 }
 0x684   : > { %v3747_v54 = vmul.f32 -1.442695, %v3469_v39  ;;  %v3471_v11 = vadd.f32 %v3470_v28, %v3381_v36 }
 0x685   : > { %v3472_v55 = vpop.f32.mrf.mxu1 }
 0x686   : > { %4244 = vpow2.f32 %v3747_v54  ;;  %v3748_v40 = vmul.f32 -1.442695, %v3471_v11 }
 0x687   : > { %v3473_v49 = vpop.f32.mrf.mxu1 }
 0x688   : > { %4246 = vpow2.f32 %v3748_v40 }
 0x693   : > { %v4245_v42 = vpop.eup %4244 }
 0x694   : > { %v3481_v37 = vadd.f32 1.0, %v4245_v42 }
 0x695   : > { %v4247_v58 = vpop.eup %4246 }
 0x696   : > { %v3482_v12 = vadd.f32 1.0, %v4247_v58  ;;  %4248 = vrcp.f32 %v3481_v37 }
 0x698   : > { %4250 = vrcp.f32 %v3482_v12 }
 0x6a3   : > { %v4249_v34 = vpop.eup %4248 }
 0x6a5   : > { %v4251_v43 = vpop.eup %4250 }
 0x6a6   : > { %v3489_v24 = vcombine.low %v4249_v34, %v4251_v43 }
 0x6a8   : > { %v3496_v53 = vrot.slane %v3489_v24, %v3495_v45 }
 0x6aa   : > { %v3503_v23 = vrot.slane %v3496_v53, %v3495_v45 }
 0x6ac   : > { %3509 = vst.msk [vmem:[%s496_s22] sm:$0x3] %vm3507_vm3, %v3503_v23 }
 0x6ad PF: > { %s27_s20 = sadd.s32 1, %s4258_s20  }
 0x6ae   : > { %p24_p5 = scmp.ge.s32.totalorder %s27_s20, 4  }
 0x6b0   :  { %26 = sbr.rel (!%p24_p5) target bundleno = 3 (0x3), region = 110 }

</bundles_post_ra>
